<compile_context>
chip_gen: v7x
topology: tpu7x:2x2x1
jax: 0.10.0
libtpu: 0.0.40
codegen_flags: <defaults>
</compile_context>

<pallas_src>
import functools

import jax
import jax.numpy as jnp
from jax.experimental import pallas as pl
from jax.experimental.pallas import tpu as pltpu

NEG_SLOPE = 0.2          # nn.LeakyReLU(negative_slope=0.2)
LANE = 128               # TPU lane width
TILE_M = 256             # rows of the im2col matrix handled per grid step


def _round_up(x, m):
    return (x + m - 1) // m * m


# ----------------------------- Pallas kernel ------------------------------ #
def _conv_mm_kernel(p_ref, w_ref, b_ref, o_ref, *, apply_relu):
    """One M-tile of the fused im2col conv: o = leaky_relu(P @ W + b).

    p_ref : (tile_m, Kp)    bf16   (tiled over the grid)
    w_ref : (Kp, Coutp)     bf16   (resident across the grid)
    b_ref : (1, Coutp)      f32
    o_ref : (tile_m, Coutp) bf16 / f32
    """
    acc = jnp.dot(p_ref[...], w_ref[...], preferred_element_type=jnp.float32)
    acc = acc + b_ref[...]                                   # f32 bias
    if apply_relu:
        acc = jnp.where(acc >= 0.0, acc, NEG_SLOPE * acc)    # f32 LeakyReLU
    o_ref[...] = acc.astype(o_ref.dtype)


def _tiled_conv_matmul(P, Wm, b2, apply_relu, out_dtype):
    """Gridded, pipelined matmul + bias + LeakyReLU over the padded im2col matrix."""
    M_pad, Kp = P.shape
    Coutp = Wm.shape[1]
    tile_m = min(TILE_M, M_pad)          # M_pad is always a multiple of tile_m
    grid = (M_pad // tile_m,)

    out_itemsize = jnp.dtype(out_dtype).itemsize
    est_vmem = (2 * tile_m * Kp * 2            # P tile, double-buffered, bf16
                + 2 * Kp * Coutp * 2           # resident W (conservatively x2)
                + 2 * Coutp * 4                # bias
                + 2 * tile_m * Coutp * out_itemsize)
    # Bounded at 32 MiB: safe scoped limit on v5e/v6e/v7x, >> working set here.
    vmem_limit = int(min(32 * 1024 * 1024, max(8 * 1024 * 1024, 2 * est_vmem)))

    return pl.pallas_call(
        functools.partial(_conv_mm_kernel, apply_relu=apply_relu),
        out_shape=jax.ShapeDtypeStruct((M_pad, Coutp), out_dtype),
        grid=grid,
        in_specs=[
            pl.BlockSpec((tile_m, Kp), lambda i: (i, 0)),     # P: tiled over M
            pl.BlockSpec((Kp, Coutp), lambda i: (0, 0)),      # W: resident
            pl.BlockSpec((1, Coutp), lambda i: (0, 0)),       # bias: resident
        ],
        out_specs=pl.BlockSpec((tile_m, Coutp), lambda i: (i, 0)),
        compiler_params=pltpu.CompilerParams(
            dimension_semantics=("parallel",),
            vmem_limit_bytes=vmem_limit,
        ),
    )(P, Wm, b2)


def conv4x4_s2_p1(x_nhwc, w_oihw, b, apply_relu, out_dtype=jnp.bfloat16):
    """Conv2d(kernel=4, stride=2, padding=1) on NHWC input via a tiled Pallas matmul."""
    N, H, W, Cin = x_nhwc.shape
    Cout = w_oihw.shape[0]
    OH, OW = H // 2, W // 2              # floor((H + 2 - 4)/2) + 1 for even H

    # --- im2col (XLA glue, bf16: pad + 16 strided slices + concat) ---
    xb = x_nhwc.astype(jnp.bfloat16)
    xp = jnp.pad(xb, ((0, 0), (1, 1), (1, 1), (0, 0)))
    patches = []
    for kh in range(4):
        for kw in range(4):
            patches.append(
                jax.lax.slice(
                    xp,
                    (0, kh, kw, 0),
                    (N, kh + 2 * OH - 1, kw + 2 * OW - 1, Cin),
                    (1, 2, 2, 1),
                )
            )  # (N, OH, OW, Cin)
    K = 16 * Cin
    M = N * OH * OW
    P = jnp.concatenate(patches, axis=-1).reshape(M, K)

    # --- pad to MXU / lane-friendly shapes (zero padding, sliced off below) ---
    Kp = _round_up(K, LANE)
    Coutp = _round_up(Cout, LANE)
    tile_m = min(TILE_M, _round_up(M, 8))
    M_pad = _round_up(M, tile_m)
    P = jnp.pad(P, ((0, M_pad - M), (0, Kp - K)))

    # PyTorch weight (Cout, Cin, KH, KW) -> (KH, KW, Cin, Cout) -> (K, Cout) -> padded bf16
    Wm = jnp.transpose(w_oihw, (2, 3, 1, 0)).reshape(K, Cout)
    Wm = jnp.pad(Wm, ((0, Kp - K), (0, Coutp - Cout))).astype(jnp.bfloat16)
    b2 = jnp.pad(b.astype(jnp.float32), (0, Coutp - Cout)).reshape(1, Coutp)

    out = _tiled_conv_matmul(P, Wm, b2, apply_relu, out_dtype)
    return out[:M, :Cout].reshape(N, OH, OW, Cout)


# ------------------------- spectral norm (glue) ---------------------------- #
def spectral_normalize(w_oihw, n_iter=20, eps=1e-12):
    """W / sigma_max(W.reshape(Cout, -1)) via power iteration.
    Note: torch.nn.utils.spectral_norm uses 1 iteration with a persistent u
    buffer; this converged estimate matches its fixed point, not bit-for-bit."""
    Cout = w_oihw.shape[0]
    Wm = w_oihw.reshape(Cout, -1).astype(jnp.float32)
    u = jnp.ones((Cout,), jnp.float32) / jnp.sqrt(jnp.float32(Cout))

    def body(_, u):
        v = Wm.T @ u
        v = v / (jnp.linalg.norm(v) + eps)
        u = Wm @ v
        u = u / (jnp.linalg.norm(u) + eps)
        return u

    u = jax.lax.fori_loop(0, n_iter, body, u)
    v = Wm.T @ u
    v = v / (jnp.linalg.norm(v) + eps)
    sigma = u @ (Wm @ v)
    return w_oihw / sigma


# ------------------------------ full model --------------------------------- #
def init_params(key, num_classes, ndf):
    """Deterministic synthetic init (PyTorch-like uniform(-1/sqrt(fan_in), ...))."""
    shapes = [
        (ndf, num_classes, 4, 4),
        (ndf * 2, ndf, 4, 4),
        (ndf * 4, ndf * 2, 4, 4),
        (ndf * 8, ndf * 4, 4, 4),
        (1, ndf * 8, 4, 4),
    ]
    params = []
    for s in shapes:
        key, kw, kb = jax.random.split(key, 3)
        fan_in = s[1] * s[2] * s[3]
        bound = 1.0 / jnp.sqrt(jnp.float32(fan_in))
        w = jax.random.uniform(kw, s, jnp.float32, -bound, bound)
        b = jax.random.uniform(kb, (s[0],), jnp.float32, -bound, bound)
        w = spectral_normalize(w)               # spectral_norm wrapper semantics
        params.append((w, b))
    return params


@jax.jit
def sp_fc_discriminator_forward(x_nchw, params):
    x = jnp.transpose(x_nchw, (0, 2, 3, 1))     # NCHW -> NHWC
    n_layers = len(params)
    for i, (w, b) in enumerate(params):
        last = i == n_layers - 1
        x = conv4x4_s2_p1(
            x, w, b,
            apply_relu=not last,                               # no act after classifier
            out_dtype=jnp.float32 if last else jnp.bfloat16,   # bf16 hidden acts
        )
    return jnp.transpose(x, (0, 3, 1, 2))       # NHWC -> NCHW


# --------------------------------- main ------------------------------------ #
if __name__ == "__main__":
    num_classes = 4
    ndf = 32
    N, H, W = 2, 32, 32                         # 32 -> 16 -> 8 -> 4 -> 2 -> 1

    key = jax.random.PRNGKey(0)
    kx, kp = jax.random.split(key)
    x = jax.random.normal(kx, (N, num_classes, H, W), jnp.float32)  # NCHW input
    params = init_params(kp, num_classes, ndf)

    out = sp_fc_discriminator_forward(x, params)
    jax.block_until_ready(out)

    assert out.shape == (N, 1, 1, 1), out.shape
    print("KERNEL_OK")
</pallas_src>

<mosaic_0001>
module attributes {stable_mosaic.version = 11 : i64} {
  func.func @_conv_mm_kernel(%arg0: i32, %arg1: memref<256x128xbf16, #tpu.memory_space<vmem>>, %arg2: memref<128x128xbf16, #tpu.memory_space<vmem>>, %arg3: memref<1x128xf32, #tpu.memory_space<vmem>>, %arg4: memref<256x128xbf16, #tpu.memory_space<vmem>>) attributes {dimension_semantics = [#tpu.dimension_semantics<parallel>], iteration_bounds = array<i64: 2>, scalar_prefetch = 0 : i64, scratch_operands = 0 : i64, tpu.core_type = #tpu.core_type<tc>, window_params = [{transform_indices = @transform_0, window_bounds = array<i64: 256, 128>}, {pipeline_mode = #tpu.pipeline_mode<synchronous>, transform_indices = @transform_1, window_bounds = array<i64: 128, 128>}, {pipeline_mode = #tpu.pipeline_mode<synchronous>, transform_indices = @transform_2, window_bounds = array<i64: 1, 128>}, {transform_indices = @transform_3, window_bounds = array<i64: 256, 128>}]} {
    %c0 = arith.constant 0 : index
    %c0_0 = arith.constant 0 : index
    %0 = vector.load %arg1[%c0, %c0_0] : memref<256x128xbf16, #tpu.memory_space<vmem>>, vector<256x128xbf16>
    %c0_1 = arith.constant 0 : index
    %c0_2 = arith.constant 0 : index
    %1 = vector.load %arg2[%c0_1, %c0_2] : memref<128x128xbf16, #tpu.memory_space<vmem>>, vector<128x128xbf16>
    %cst = arith.constant dense<0.000000e+00> : vector<256x128xf32>
    %2 = tpu.matmul %0, %1, %cst {dimension_numbers = #tpu.dot_dimension_numbers<[1], [0], [0], [1], [0, 0, 1, 1], [], []>} : vector<256x128xbf16>, vector<128x128xbf16>, vector<256x128xf32> -> vector<256x128xf32>
    %c0_3 = arith.constant 0 : index
    %c0_4 = arith.constant 0 : index
    %3 = vector.load %arg3[%c0_3, %c0_4] : memref<1x128xf32, #tpu.memory_space<vmem>>, vector<1x128xf32>
    %4 = vector.broadcast %3 : vector<1x128xf32> to vector<256x128xf32>
    %5 = arith.addf %2, %4 : vector<256x128xf32>
    %cst_5 = arith.constant 0.000000e+00 : f32
    %6 = vector.broadcast %cst_5 : f32 to vector<256x128xf32>
    %7 = arith.cmpf oge, %5, %6 : vector<256x128xf32>
    %cst_6 = arith.constant 2.000000e-01 : f32
    %8 = vector.broadcast %cst_6 : f32 to vector<256x128xf32>
    %9 = arith.mulf %8, %5 : vector<256x128xf32>
    %10 = arith.select %7, %5, %9 : vector<256x128xi1>, vector<256x128xf32>
    %11 = arith.truncf %10 : vector<256x128xf32> to vector<256x128xbf16>
    %c0_7 = arith.constant 0 : index
    %c0_8 = arith.constant 0 : index
    %12 = vector.load %arg4[%c0_7, %c0_8] : memref<256x128xbf16, #tpu.memory_space<vmem>>, vector<256x128xbf16>
    tpu.vector_store %arg4[%c0_7, %c0_8], %11 {strides = array<i32>} : memref<256x128xbf16, #tpu.memory_space<vmem>>, vector<256x128xbf16>,
    return
  }
  func.func @transform_0(%arg0: i32) -> (i32, i32) {
    %c0_i32 = arith.constant 0 : i32
    %c0_i32_0 = arith.constant 0 : i32
    return %arg0, %c0_i32 : i32, i32
  }
  func.func @transform_1(%arg0: i32) -> (i32, i32) {
    %c0_i32 = arith.constant 0 : i32
    %c0_i32_0 = arith.constant 0 : i32
    %c0_i32_1 = arith.constant 0 : i32
    return %c0_i32, %c0_i32_0 : i32, i32
  }
  func.func @transform_2(%arg0: i32) -> (i32, i32) {
    %c0_i32 = arith.constant 0 : i32
    %c0_i32_0 = arith.constant 0 : i32
    %c0_i32_1 = arith.constant 0 : i32
    return %c0_i32, %c0_i32_0 : i32, i32
  }
  func.func @transform_3(%arg0: i32) -> (i32, i32) {
    %c0_i32 = arith.constant 0 : i32
    %c0_i32_0 = arith.constant 0 : i32
    return %arg0, %c0_i32 : i32, i32
  }
}

module attributes {stable_mosaic.version = 11 : i64} {
  func.func @_conv_mm_kernel(%arg0: i32, %arg1: memref<128x512xbf16, #tpu.memory_space<vmem>>, %arg2: memref<512x128xbf16, #tpu.memory_space<vmem>>, %arg3: memref<1x128xf32, #tpu.memory_space<vmem>>, %arg4: memref<128x128xbf16, #tpu.memory_space<vmem>>) attributes {dimension_semantics = [#tpu.dimension_semantics<parallel>], iteration_bounds = array<i64: 1>, scalar_prefetch = 0 : i64, scratch_operands = 0 : i64, tpu.core_type = #tpu.core_type<tc>, window_params = [{transform_indices = @transform_0, window_bounds = array<i64: 128, 512>}, {pipeline_mode = #tpu.pipeline_mode<synchronous>, transform_indices = @transform_1, window_bounds = array<i64: 512, 128>}, {pipeline_mode = #tpu.pipeline_mode<synchronous>, transform_indices = @transform_2, window_bounds = array<i64: 1, 128>}, {transform_indices = @transform_3, window_bounds = array<i64: 128, 128>}]} {
    %c0 = arith.constant 0 : index
    %c0_0 = arith.constant 0 : index
    %0 = vector.load %arg1[%c0, %c0_0] : memref<128x512xbf16, #tpu.memory_space<vmem>>, vector<128x512xbf16>
    %c0_1 = arith.constant 0 : index
    %c0_2 = arith.constant 0 : index
    %1 = vector.load %arg2[%c0_1, %c0_2] : memref<512x128xbf16, #tpu.memory_space<vmem>>, vector<512x128xbf16>
    %cst = arith.constant dense<0.000000e+00> : vector<128x128xf32>
    %2 = tpu.matmul %0, %1, %cst {dimension_numbers = #tpu.dot_dimension_numbers<[1], [0], [0], [1], [0, 0, 1, 1], [], []>} : vector<128x512xbf16>, vector<512x128xbf16>, vector<128x128xf32> -> vector<128x128xf32>
    %c0_3 = arith.constant 0 : index
    %c0_4 = arith.constant 0 : index
    %3 = vector.load %arg3[%c0_3, %c0_4] : memref<1x128xf32, #tpu.memory_space<vmem>>, vector<1x128xf32>
    %4 = vector.broadcast %3 : vector<1x128xf32> to vector<128x128xf32>
    %5 = arith.addf %2, %4 : vector<128x128xf32>
    %cst_5 = arith.constant 0.000000e+00 : f32
    %6 = vector.broadcast %cst_5 : f32 to vector<128x128xf32>
    %7 = arith.cmpf oge, %5, %6 : vector<128x128xf32>
    %cst_6 = arith.constant 2.000000e-01 : f32
    %8 = vector.broadcast %cst_6 : f32 to vector<128x128xf32>
    %9 = arith.mulf %8, %5 : vector<128x128xf32>
    %10 = arith.select %7, %5, %9 : vector<128x128xi1>, vector<128x128xf32>
    %11 = arith.truncf %10 : vector<128x128xf32> to vector<128x128xbf16>
    %c0_7 = arith.constant 0 : index
    %c0_8 = arith.constant 0 : index
    %12 = vector.load %arg4[%c0_7, %c0_8] : memref<128x128xbf16, #tpu.memory_space<vmem>>, vector<128x128xbf16>
    tpu.vector_store %arg4[%c0_7, %c0_8], %11 {strides = array<i32>} : memref<128x128xbf16, #tpu.memory_space<vmem>>, vector<128x128xbf16>,
    return
  }
  func.func @transform_0(%arg0: i32) -> (i32, i32) {
    %c0_i32 = arith.constant 0 : i32
    %c0_i32_0 = arith.constant 0 : i32
    return %arg0, %c0_i32 : i32, i32
  }
  func.func @transform_1(%arg0: i32) -> (i32, i32) {
    %c0_i32 = arith.constant 0 : i32
    %c0_i32_0 = arith.constant 0 : i32
    %c0_i32_1 = arith.constant 0 : i32
    return %c0_i32, %c0_i32_0 : i32, i32
  }
  func.func @transform_2(%arg0: i32) -> (i32, i32) {
    %c0_i32 = arith.constant 0 : i32
    %c0_i32_0 = arith.constant 0 : i32
    %c0_i32_1 = arith.constant 0 : i32
    return %c0_i32, %c0_i32_0 : i32, i32
  }
  func.func @transform_3(%arg0: i32) -> (i32, i32) {
    %c0_i32 = arith.constant 0 : i32
    %c0_i32_0 = arith.constant 0 : i32
    return %arg0, %c0_i32 : i32, i32
  }
}

module attributes {stable_mosaic.version = 11 : i64} {
  func.func @_conv_mm_kernel(%arg0: i32, %arg1: memref<32x1024xbf16, #tpu.memory_space<vmem>>, %arg2: memref<1024x128xbf16, #tpu.memory_space<vmem>>, %arg3: memref<1x128xf32, #tpu.memory_space<vmem>>, %arg4: memref<32x128xbf16, #tpu.memory_space<vmem>>) attributes {dimension_semantics = [#tpu.dimension_semantics<parallel>], iteration_bounds = array<i64: 1>, scalar_prefetch = 0 : i64, scratch_operands = 0 : i64, tpu.core_type = #tpu.core_type<tc>, window_params = [{transform_indices = @transform_0, window_bounds = array<i64: 32, 1024>}, {pipeline_mode = #tpu.pipeline_mode<synchronous>, transform_indices = @transform_1, window_bounds = array<i64: 1024, 128>}, {pipeline_mode = #tpu.pipeline_mode<synchronous>, transform_indices = @transform_2, window_bounds = array<i64: 1, 128>}, {transform_indices = @transform_3, window_bounds = array<i64: 32, 128>}]} {
    %c0 = arith.constant 0 : index
    %c0_0 = arith.constant 0 : index
    %0 = vector.load %arg1[%c0, %c0_0] : memref<32x1024xbf16, #tpu.memory_space<vmem>>, vector<32x1024xbf16>
    %c0_1 = arith.constant 0 : index
    %c0_2 = arith.constant 0 : index
    %1 = vector.load %arg2[%c0_1, %c0_2] : memref<1024x128xbf16, #tpu.memory_space<vmem>>, vector<1024x128xbf16>
    %cst = arith.constant dense<0.000000e+00> : vector<32x128xf32>
    %2 = tpu.matmul %0, %1, %cst {dimension_numbers = #tpu.dot_dimension_numbers<[1], [0], [0], [1], [0, 0, 1, 1], [], []>} : vector<32x1024xbf16>, vector<1024x128xbf16>, vector<32x128xf32> -> vector<32x128xf32>
    %c0_3 = arith.constant 0 : index
    %c0_4 = arith.constant 0 : index
    %3 = vector.load %arg3[%c0_3, %c0_4] : memref<1x128xf32, #tpu.memory_space<vmem>>, vector<1x128xf32>
    %4 = vector.broadcast %3 : vector<1x128xf32> to vector<32x128xf32>
    %5 = arith.addf %2, %4 : vector<32x128xf32>
    %cst_5 = arith.constant 0.000000e+00 : f32
    %6 = vector.broadcast %cst_5 : f32 to vector<32x128xf32>
    %7 = arith.cmpf oge, %5, %6 : vector<32x128xf32>
    %cst_6 = arith.constant 2.000000e-01 : f32
    %8 = vector.broadcast %cst_6 : f32 to vector<32x128xf32>
    %9 = arith.mulf %8, %5 : vector<32x128xf32>
    %10 = arith.select %7, %5, %9 : vector<32x128xi1>, vector<32x128xf32>
    %11 = arith.truncf %10 : vector<32x128xf32> to vector<32x128xbf16>
    %c0_7 = arith.constant 0 : index
    %c0_8 = arith.constant 0 : index
    %12 = vector.load %arg4[%c0_7, %c0_8] : memref<32x128xbf16, #tpu.memory_space<vmem>>, vector<32x128xbf16>
    tpu.vector_store %arg4[%c0_7, %c0_8], %11 {strides = array<i32>} : memref<32x128xbf16, #tpu.memory_space<vmem>>, vector<32x128xbf16>,
    return
  }
  func.func @transform_0(%arg0: i32) -> (i32, i32) {
    %c0_i32 = arith.constant 0 : i32
    %c0_i32_0 = arith.constant 0 : i32
    return %arg0, %c0_i32 : i32, i32
  }
  func.func @transform_1(%arg0: i32) -> (i32, i32) {
    %c0_i32 = arith.constant 0 : i32
    %c0_i32_0 = arith.constant 0 : i32
    %c0_i32_1 = arith.constant 0 : i32
    return %c0_i32, %c0_i32_0 : i32, i32
  }
  func.func @transform_2(%arg0: i32) -> (i32, i32) {
    %c0_i32 = arith.constant 0 : i32
    %c0_i32_0 = arith.constant 0 : i32
    %c0_i32_1 = arith.constant 0 : i32
    return %c0_i32, %c0_i32_0 : i32, i32
  }
  func.func @transform_3(%arg0: i32) -> (i32, i32) {
    %c0_i32 = arith.constant 0 : i32
    %c0_i32_0 = arith.constant 0 : i32
    return %arg0, %c0_i32 : i32, i32
  }
}

module attributes {stable_mosaic.version = 11 : i64} {
  func.func @_conv_mm_kernel(%arg0: i32, %arg1: memref<8x2048xbf16, #tpu.memory_space<vmem>>, %arg2: memref<2048x256xbf16, #tpu.memory_space<vmem>>, %arg3: memref<1x256xf32, #tpu.memory_space<vmem>>, %arg4: memref<8x256xbf16, #tpu.memory_space<vmem>>) attributes {dimension_semantics = [#tpu.dimension_semantics<parallel>], iteration_bounds = array<i64: 1>, scalar_prefetch = 0 : i64, scratch_operands = 0 : i64, tpu.core_type = #tpu.core_type<tc>, window_params = [{transform_indices = @transform_0, window_bounds = array<i64: 8, 2048>}, {pipeline_mode = #tpu.pipeline_mode<synchronous>, transform_indices = @transform_1, window_bounds = array<i64: 2048, 256>}, {pipeline_mode = #tpu.pipeline_mode<synchronous>, transform_indices = @transform_2, window_bounds = array<i64: 1, 256>}, {transform_indices = @transform_3, window_bounds = array<i64: 8, 256>}]} {
    %c0 = arith.constant 0 : index
    %c0_0 = arith.constant 0 : index
    %0 = vector.load %arg1[%c0, %c0_0] : memref<8x2048xbf16, #tpu.memory_space<vmem>>, vector<8x2048xbf16>
    %c0_1 = arith.constant 0 : index
    %c0_2 = arith.constant 0 : index
    %1 = vector.load %arg2[%c0_1, %c0_2] : memref<2048x256xbf16, #tpu.memory_space<vmem>>, vector<2048x256xbf16>
    %cst = arith.constant dense<0.000000e+00> : vector<8x256xf32>
    %2 = tpu.matmul %0, %1, %cst {dimension_numbers = #tpu.dot_dimension_numbers<[1], [0], [0], [1], [0, 0, 1, 1], [], []>} : vector<8x2048xbf16>, vector<2048x256xbf16>, vector<8x256xf32> -> vector<8x256xf32>
    %c0_3 = arith.constant 0 : index
    %c0_4 = arith.constant 0 : index
    %3 = vector.load %arg3[%c0_3, %c0_4] : memref<1x256xf32, #tpu.memory_space<vmem>>, vector<1x256xf32>
    %4 = vector.broadcast %3 : vector<1x256xf32> to vector<8x256xf32>
    %5 = arith.addf %2, %4 : vector<8x256xf32>
    %cst_5 = arith.constant 0.000000e+00 : f32
    %6 = vector.broadcast %cst_5 : f32 to vector<8x256xf32>
    %7 = arith.cmpf oge, %5, %6 : vector<8x256xf32>
    %cst_6 = arith.constant 2.000000e-01 : f32
    %8 = vector.broadcast %cst_6 : f32 to vector<8x256xf32>
    %9 = arith.mulf %8, %5 : vector<8x256xf32>
    %10 = arith.select %7, %5, %9 : vector<8x256xi1>, vector<8x256xf32>
    %11 = arith.truncf %10 : vector<8x256xf32> to vector<8x256xbf16>
    %c0_7 = arith.constant 0 : index
    %c0_8 = arith.constant 0 : index
    %12 = vector.load %arg4[%c0_7, %c0_8] : memref<8x256xbf16, #tpu.memory_space<vmem>>, vector<8x256xbf16>
    tpu.vector_store %arg4[%c0_7, %c0_8], %11 {strides = array<i32>} : memref<8x256xbf16, #tpu.memory_space<vmem>>, vector<8x256xbf16>,
    return
  }
  func.func @transform_0(%arg0: i32) -> (i32, i32) {
    %c0_i32 = arith.constant 0 : i32
    %c0_i32_0 = arith.constant 0 : i32
    return %arg0, %c0_i32 : i32, i32
  }
  func.func @transform_1(%arg0: i32) -> (i32, i32) {
    %c0_i32 = arith.constant 0 : i32
    %c0_i32_0 = arith.constant 0 : i32
    %c0_i32_1 = arith.constant 0 : i32
    return %c0_i32, %c0_i32_0 : i32, i32
  }
  func.func @transform_2(%arg0: i32) -> (i32, i32) {
    %c0_i32 = arith.constant 0 : i32
    %c0_i32_0 = arith.constant 0 : i32
    %c0_i32_1 = arith.constant 0 : i32
    return %c0_i32, %c0_i32_0 : i32, i32
  }
  func.func @transform_3(%arg0: i32) -> (i32, i32) {
    %c0_i32 = arith.constant 0 : i32
    %c0_i32_0 = arith.constant 0 : i32
    return %arg0, %c0_i32 : i32, i32
  }
}

module attributes {stable_mosaic.version = 11 : i64} {
  func.func @_conv_mm_kernel(%arg0: i32, %arg1: memref<8x4096xbf16, #tpu.memory_space<vmem>>, %arg2: memref<4096x128xbf16, #tpu.memory_space<vmem>>, %arg3: memref<1x128xf32, #tpu.memory_space<vmem>>, %arg4: memref<8x128xf32, #tpu.memory_space<vmem>>) attributes {dimension_semantics = [#tpu.dimension_semantics<parallel>], iteration_bounds = array<i64: 1>, scalar_prefetch = 0 : i64, scratch_operands = 0 : i64, tpu.core_type = #tpu.core_type<tc>, window_params = [{transform_indices = @transform_0, window_bounds = array<i64: 8, 4096>}, {pipeline_mode = #tpu.pipeline_mode<synchronous>, transform_indices = @transform_1, window_bounds = array<i64: 4096, 128>}, {pipeline_mode = #tpu.pipeline_mode<synchronous>, transform_indices = @transform_2, window_bounds = array<i64: 1, 128>}, {transform_indices = @transform_3, window_bounds = array<i64: 8, 128>}]} {
    %c0 = arith.constant 0 : index
    %c0_0 = arith.constant 0 : index
    %0 = vector.load %arg1[%c0, %c0_0] : memref<8x4096xbf16, #tpu.memory_space<vmem>>, vector<8x4096xbf16>
    %c0_1 = arith.constant 0 : index
    %c0_2 = arith.constant 0 : index
    %1 = vector.load %arg2[%c0_1, %c0_2] : memref<4096x128xbf16, #tpu.memory_space<vmem>>, vector<4096x128xbf16>
    %cst = arith.constant dense<0.000000e+00> : vector<8x128xf32>
    %2 = tpu.matmul %0, %1, %cst {dimension_numbers = #tpu.dot_dimension_numbers<[1], [0], [0], [1], [0, 0, 1, 1], [], []>} : vector<8x4096xbf16>, vector<4096x128xbf16>, vector<8x128xf32> -> vector<8x128xf32>
    %c0_3 = arith.constant 0 : index
    %c0_4 = arith.constant 0 : index
    %3 = vector.load %arg3[%c0_3, %c0_4] : memref<1x128xf32, #tpu.memory_space<vmem>>, vector<1x128xf32>
    %4 = vector.broadcast %3 : vector<1x128xf32> to vector<8x128xf32>
    %5 = arith.addf %2, %4 : vector<8x128xf32>
    %c0_5 = arith.constant 0 : index
    %c0_6 = arith.constant 0 : index
    %6 = vector.load %arg4[%c0_5, %c0_6] : memref<8x128xf32, #tpu.memory_space<vmem>>, vector<8x128xf32>
    tpu.vector_store %arg4[%c0_5, %c0_6], %5 {strides = array<i32>} : memref<8x128xf32, #tpu.memory_space<vmem>>, vector<8x128xf32>,
    return
  }
  func.func @transform_0(%arg0: i32) -> (i32, i32) {
    %c0_i32 = arith.constant 0 : i32
    %c0_i32_0 = arith.constant 0 : i32
    return %arg0, %c0_i32 : i32, i32
  }
  func.func @transform_1(%arg0: i32) -> (i32, i32) {
    %c0_i32 = arith.constant 0 : i32
    %c0_i32_0 = arith.constant 0 : i32
    %c0_i32_1 = arith.constant 0 : i32
    return %c0_i32, %c0_i32_0 : i32, i32
  }
  func.func @transform_2(%arg0: i32) -> (i32, i32) {
    %c0_i32 = arith.constant 0 : i32
    %c0_i32_0 = arith.constant 0 : i32
    %c0_i32_1 = arith.constant 0 : i32
    return %c0_i32, %c0_i32_0 : i32, i32
  }
  func.func @transform_3(%arg0: i32) -> (i32, i32) {
    %c0_i32 = arith.constant 0 : i32
    %c0_i32_0 = arith.constant 0 : i32
    return %arg0, %c0_i32 : i32, i32
  }
}

</mosaic_0001>

<bundles_post_ra>
// kernel: sp_fc_discriminator_forward.5
= control target key start
LH: loop header
LB: loop body
LE: loop exit
PB: predicated region body
PF: predicated region fallthrough
CT: control target
= control target key end

     0   :  { %s1190_s12 = smov 0   ;;  %s1317_s0 = inlined_call_operand.vmem [shape: bf16[512,128], index: 0, kind: input, shape index: {}]   ;;  %s1318_s1 = inlined_call_operand.vmem [shape: bf16[128,128], index: 1, kind: input, shape index: {}]   ;;  %s1319_s2 = inlined_call_operand.vmem [shape: f32[1,128], index: 2, kind: input, shape index: {}]   ;;  %s1320_s3 = inlined_call_operand.vmem [shape: bf16[512,128], index: 3, kind: output, shape index: {}]  }
   0x1 LB: > { %s847_s13 = sadd.s32 4294967295, %s1168_s12   ;;  %p851_p0 = scmp.ge.s32.totalorder %s1168_s12, 1  ;;  %s1168_s12 = sphi %s1190_s12, %s13_s12  }
   0x2   : > { %p138_p1 = scmp.lt.s32.totalorder %s1168_s12, 3 }
   0x4   : > { %p139_p2 = pnand %p851_p0, %p138_p1 }
   0x5   : > { %v1138_v0 = vld [vmem:[%s1318_s1] sm:$0xff] (!%p139_p2)   ;;  %s852_s16 = sshll.u32 (!%p139_p2), %s847_s13, 5  ;;  %v1139_v1 = vld [vmem:[%s1318_s1 + $0x8] sm:$0xff] (!%p139_p2)   ;;  %v1140_v2 = vld [vmem:[%s1318_s1 + $0x10] sm:$0xff] (!%p139_p2)  }
   0x6   : > { %142 = sbr.rel (%p139_p2) target bundleno = 293 (0x125), region = 32  ;;  %p163_p3 = scmp.lt.s32.totalorder (!%p139_p2), %s852_s16, 63  ;;  %1066 = vmatprep.subr.bf16.mxu0 (!%p139_p2), %v1138_v0  ;;  %1114 = vmatprep.subr.bf16.mxu1 (!%p139_p2), %v1138_v0  ;;  %v1141_v3 = vld [vmem:[%s1318_s1 + $0x18] sm:$0xff] (!%p139_p2)   ;;  %v1142_v6 = vld [vmem:[%s1318_s1 + $0x20] sm:$0xff] (!%p139_p2)   ;;  %v1143_v7 = vld [vmem:[%s1318_s1 + $0x28] sm:$0xff] (!%p139_p2)  }
   0x7   : > { %1067 = vmatpush3.bf16.msra.mxu0 (!%p139_p2), %v1138_v0  ;;  %1122 = vmatpush3.bf16.msra.mxu1 (!%p139_p2), %v1138_v0  ;;  %v1144_v8 = vld [vmem:[%s1318_s1 + $0x30] sm:$0xff] (!%p139_p2)   ;;  %v1145_v9 = vld [vmem:[%s1318_s1 + $0x38] sm:$0xff] (!%p139_p2)   ;;  %v1251_v24 = vld [vmem:[%s1319_s2] ss:$0 sm:$0xff] (!%p139_p2) }
   0x8   : > { %1068 = vmatprep.subr.bf16.mxu0 (!%p139_p2), %v1139_v1  ;;  %1115 = vmatprep.subr.bf16.mxu1 (!%p139_p2), %v1139_v1 }
   0xb   : > { %1069 = vmatpush3.bf16.msra.mxu0 (!%p139_p2), %v1139_v1  ;;  %1123 = vmatpush3.bf16.msra.mxu1 (!%p139_p2), %v1139_v1 }
   0xc   : > { %1070 = vmatprep.subr.bf16.mxu0 (!%p139_p2), %v1140_v2  ;;  %1116 = vmatprep.subr.bf16.mxu1 (!%p139_p2), %v1140_v2 }
   0xd   : > { %s1322_s16 = smov (!%p163_p3, %s852_s16), 63 }
   0xe   : > { %s853_s21 = sshll.u32 %s1322_s16, 2 }
   0xf   : > { %s1215_s24 = scalar_lea.vmem %s1317_s0, %s853_s21  ;;  %1071 = vmatpush3.bf16.msra.mxu0 %v1140_v2  ;;  %1124 = vmatpush3.bf16.msra.mxu1 %v1140_v2  ;;  %s1268_s13 = scalar_lea.vmem %s1320_s3, %s853_s21 }
  0x10   : > { %v1146_v4 = vld [vmem:[%s1215_s24] sm:$0xff]   ;;  %1072 = vmatprep.subr.bf16.mxu0 %v1141_v3  ;;  %1117 = vmatprep.subr.bf16.mxu1 %v1141_v3  ;;  %v1148_v10 = vld [vmem:[%s1215_s24 + $0x8] sm:$0xff]   ;;  %v1150_v12 = vld [vmem:[%s1215_s24 + $0x10] sm:$0xff]  }
  0x11   : > { %v1147_v5 = vld [vmem:[%s1215_s24 + $0x40] sm:$0xff]   ;;  %1082 = vmatprep.mubr.bf16.mxu0 %v1146_v4  ;;  %v1149_v11 = vld [vmem:[%s1215_s24 + $0x48] sm:$0xff]   ;;  %v1151_v13 = vld [vmem:[%s1215_s24 + $0x50] sm:$0xff]  }
  0x12   : > { %1098 = vmatprep.mubr.bf16.mxu1 %v1147_v5  ;;  %v1152_v14 = vld [vmem:[%s1215_s24 + $0x18] sm:$0xff]   ;;  %v1154_v16 = vld [vmem:[%s1215_s24 + $0x20] sm:$0xff]   ;;  %v1156_v18 = vld [vmem:[%s1215_s24 + $0x28] sm:$0xff]  }
  0x13   : > { %1073 = vmatpush3.bf16.msra.mxu0 %v1141_v3  ;;  %1125 = vmatpush3.bf16.msra.mxu1 %v1141_v3  ;;  %v1153_v15 = vld [vmem:[%s1215_s24 + $0x58] sm:$0xff]   ;;  %v1155_v17 = vld [vmem:[%s1215_s24 + $0x60] sm:$0xff]   ;;  %v1157_v19 = vld [vmem:[%s1215_s24 + $0x68] sm:$0xff]  }
  0x14   : > { %1074 = vmatprep.subr.bf16.mxu0 %v1142_v6  ;;  %1118 = vmatprep.subr.bf16.mxu1 %v1142_v6  ;;  %v1158_v20 = vld [vmem:[%s1215_s24 + $0x30] sm:$0xff]   ;;  %v1160_v22 = vld [vmem:[%s1215_s24 + $0x38] sm:$0xff]  }
  0x15   : > { %v1159_v21 = vld [vmem:[%s1215_s24 + $0x70] sm:$0xff]   ;;  %v1161_v23 = vld [vmem:[%s1215_s24 + $0x78] sm:$0xff]  }
  0x17   : > { %1075 = vmatpush3.bf16.msra.mxu0 %v1142_v6  ;;  %1126 = vmatpush3.bf16.msra.mxu1 %v1142_v6 }
  0x18   : > { %1076 = vmatprep.subr.bf16.mxu0 %v1143_v7  ;;  %1119 = vmatprep.subr.bf16.mxu1 %v1143_v7 }
  0x1b   : > { %1077 = vmatpush3.bf16.msra.mxu0 %v1143_v7  ;;  %1127 = vmatpush3.bf16.msra.mxu1 %v1143_v7 }
  0x1c   : > { %1078 = vmatprep.subr.bf16.mxu0 %v1144_v8  ;;  %1120 = vmatprep.subr.bf16.mxu1 %v1144_v8 }
  0x1f   : > { %1079 = vmatpush3.bf16.msra.mxu0 %v1144_v8  ;;  %1128 = vmatpush3.bf16.msra.mxu1 %v1144_v8 }
  0x20   : > { %1080 = vmatprep.subr.bf16.mxu0 %v1145_v9  ;;  %1121 = vmatprep.subr.bf16.mxu1 %v1145_v9 }
  0x23   : > { %1081 = vmatpush3.bf16.msra.mxu0 %v1145_v9  ;;  %1129 = vmatpush3.bf16.msra.mxu1 %v1145_v9 }
  0x26   : > { %1083 = vmatmul.mubr.bf16.vlgmr.msra.gmra.mrb[0].mxu0 %v1148_v10  ;;  %1099 = vmatmul.mubr.bf16.vlgmr.msra.gmra.mrb[0].mxu1 %v1149_v11 }
  0x27   : > { %1086 = vmatprep.mubr.bf16.mxu0 %v1150_v12  ;;  %1102 = vmatprep.mubr.bf16.mxu1 %v1151_v13 }
  0x2e   : > { %1087 = vmatmul.mubr.bf16.gmra.mrb[4].mxu0 %v1152_v14  ;;  %1103 = vmatmul.mubr.bf16.gmra.mrb[4].mxu1 %v1153_v15 }
  0x2f   : > { %1090 = vmatprep.mubr.bf16.mxu0 %v1154_v16  ;;  %1106 = vmatprep.mubr.bf16.mxu1 %v1155_v17 }
  0x36   : > { %1091 = vmatmul.mubr.bf16.gmra.mrb[8].mxu0 %v1156_v18  ;;  %1107 = vmatmul.mubr.bf16.gmra.mrb[8].mxu1 %v1157_v19 }
  0x37   : > { %1094 = vmatprep.mubr.bf16.mxu0 %v1158_v20  ;;  %1110 = vmatprep.mubr.bf16.mxu1 %v1159_v21 }
  0x3e   : > { %1095 = vmatmul.mubr.bf16.gmra.mrb[12].mxu0 %v1160_v22  ;;  %1111 = vmatmul.mubr.bf16.gmra.mrb[12].mxu1 %v1161_v23 }
  0xf9   : > { %v1084_v25 = vpop.f32.mrb[0].mxu0  ;;  %v1100_v26 = vpop.f32.mrb[0].mxu1 }
  0xfa   : > { %v417_v27 = vadd.f32 %v1084_v25, %v1251_v24  ;;  %v481_v28 = vadd.f32 %v1100_v26, %v1251_v24  ;;  %v408_v29 = vpop.f32.mrb[1].mxu0  ;;  %v472_v30 = vpop.f32.mrb[1].mxu1 }
  0xfb   : > { %v409_v31 = vadd.f32 %v1251_v24, %v408_v29  ;;  %v473_v32 = vadd.f32 %v1251_v24, %v472_v30  ;;  %v1085_v33 = vpop.f32.mrb[2].mxu0  ;;  %v1101_v34 = vpop.f32.mrb[2].mxu1 }
  0xfc   : > { %vm537_vm0 = vcmp.ge.f32.partialorder %v417_v27, 0.0  ;;  %v569_v35 = vmul.f32 0.2, %v417_v27  ;;  %vm553_vm1 = vcmp.ge.f32.partialorder %v481_v28, 0.0  ;;  %v585_v36 = vmul.f32 0.2, %v481_v28 }
  0xfd   : > { %vm535_vm2 = vcmp.ge.f32.partialorder %v409_v31, 0.0  ;;  %v567_v37 = vmul.f32 0.2, %v409_v31  ;;  %vm551_vm3 = vcmp.ge.f32.partialorder %v473_v32, 0.0  ;;  %v583_v38 = vmul.f32 0.2, %v473_v32 }
  0xfe   : > { %v420_v39 = vadd.f32 %v1085_v33, %v1251_v24  ;;  %v484_v40 = vadd.f32 %v1101_v34, %v1251_v24  ;;  %v411_v41 = vpop.f32.mrb[3].mxu0  ;;  %v475_v42 = vpop.f32.mrb[3].mxu1  ;;  %v601_v43 = vsel %vm537_vm0, %v417_v27, %v569_v35  ;;  %v617_v44 = vsel %vm553_vm1, %v481_v28, %v585_v36 }
  0xff   : > { %v412_v45 = vadd.f32 %v1251_v24, %v411_v41  ;;  %v476_v46 = vadd.f32 %v1251_v24, %v475_v42  ;;  %v599_v51 = vsel %vm535_vm2, %v409_v31, %v567_v37  ;;  %v615_v52 = vsel %vm551_vm3, %v473_v32, %v583_v38 }
 0x100   : > { %vm538_vm4 = vcmp.ge.f32.partialorder %v420_v39, 0.0  ;;  %v570_v47 = vmul.f32 0.2, %v420_v39  ;;  %vm554_vm5 = vcmp.ge.f32.partialorder %v484_v40, 0.0  ;;  %v586_v48 = vmul.f32 0.2, %v484_v40 }
 0x101   : > { %vm536_vm6 = vcmp.ge.f32.partialorder %v412_v45, 0.0  ;;  %v568_v49 = vmul.f32 0.2, %v412_v45  ;;  %vm552_vm7 = vcmp.ge.f32.partialorder %v476_v46, 0.0  ;;  %v584_v50 = vmul.f32 0.2, %v476_v46 }
 0x102   : > { %v602_v53 = vsel %vm538_vm4, %v420_v39, %v570_v47  ;;  %v618_v54 = vsel %vm554_vm5, %v484_v40, %v586_v48  ;;  %v1088_v55 = vpop.f32.mrb[4].mxu0  ;;  %v1104_v56 = vpop.f32.mrb[4].mxu1 }
 0x103   : > { %v955_v57 = vpack.c.bf16 %v602_v53, %v601_v43  ;;  %v995_v58 = vpack.c.bf16 %v618_v54, %v617_v44  ;;  %v600_v59 = vsel %vm536_vm6, %v412_v45, %v568_v49  ;;  %v616_v60 = vsel %vm552_vm7, %v476_v46, %v584_v50  ;;  %v424_v61 = vpop.f32.mrb[5].mxu0  ;;  %v488_v62 = vpop.f32.mrb[5].mxu1 }
 0x104   : > { %v950_v63 = vpack.c.bf16 %v600_v59, %v599_v51  ;;  %v990_v0 = vpack.c.bf16 %v616_v60, %v615_v52  ;;  %v433_v1 = vadd.f32 %v1088_v55, %v1251_v24  ;;  %v497_v2 = vadd.f32 %v1104_v56, %v1251_v24  ;;  %v1089_v3 = vpop.f32.mrb[6].mxu0  ;;  %v1105_v4 = vpop.f32.mrb[6].mxu1 }
 0x105   : > { %1027 = vst [vmem:[%s1268_s13 + $0x8] sm:$0xff] %v955_v57   ;;  %1035 = vst [vmem:[%s1268_s13 + $0x48] sm:$0xff] %v995_v58   ;;  %v425_v5 = vadd.f32 %v1251_v24, %v424_v61  ;;  %v489_v6 = vadd.f32 %v1251_v24, %v488_v62  ;;  %v436_v7 = vadd.f32 %v1089_v3, %v1251_v24  ;;  %v427_v9 = vpop.f32.mrb[7].mxu0  ;;  %v491_v10 = vpop.f32.mrb[7].mxu1 }
 0x106   : > { %v500_v8 = vadd.f32 %v1105_v4, %v1251_v24  ;;  %951 = vst [vmem:[%s1268_s13] sm:$0xff] %v950_v63   ;;  %1034 = vst [vmem:[%s1268_s13 + $0x40] sm:$0xff] %v990_v0   ;;  %vm541_vm8 = vcmp.ge.f32.partialorder %v433_v1, 0.0  ;;  %v573_v11 = vmul.f32 0.2, %v433_v1  ;;  %vm557_vm9 = vcmp.ge.f32.partialorder %v497_v2, 0.0 }
 0x107   : > { %v589_v12 = vmul.f32 0.2, %v497_v2  ;;  %vm539_vm10 = vcmp.ge.f32.partialorder %v425_v5, 0.0  ;;  %v571_v13 = vmul.f32 0.2, %v425_v5  ;;  %vm555_vm11 = vcmp.ge.f32.partialorder %v489_v6, 0.0 }
 0x108   : > { %v605_v14 = vsel %vm541_vm8, %v433_v1, %v573_v11  ;;  %v587_v15 = vmul.f32 0.2, %v489_v6  ;;  %vm542_vm12 = vcmp.ge.f32.partialorder %v436_v7, 0.0  ;;  %v574_v16 = vmul.f32 0.2, %v436_v7 }
 0x109   : > { %v621_v17 = vsel %vm557_vm9, %v497_v2, %v589_v12  ;;  %v603_v18 = vsel %vm539_vm10, %v425_v5, %v571_v13  ;;  %vm558_vm13 = vcmp.ge.f32.partialorder %v500_v8, 0.0  ;;  %v590_v19 = vmul.f32 0.2, %v500_v8  ;;  %v1092_v20 = vpop.f32.mrb[8].mxu0  ;;  %v1108_v21 = vpop.f32.mrb[8].mxu1 }
 0x10a   : > { %v606_v22 = vsel %vm542_vm12, %v436_v7, %v574_v16  ;;  %v428_v23 = vadd.f32 %v1251_v24, %v427_v9  ;;  %v492_v25 = vadd.f32 %v1251_v24, %v491_v10  ;;  %v449_v26 = vadd.f32 %v1092_v20, %v1251_v24  ;;  %v440_v27 = vpop.f32.mrb[9].mxu0  ;;  %v504_v28 = vpop.f32.mrb[9].mxu1 }
 0x10b   : > { %v965_v29 = vpack.c.bf16 %v606_v22, %v605_v14  ;;  %v622_v30 = vsel %vm558_vm13, %v500_v8, %v590_v19  ;;  %v513_v31 = vadd.f32 %v1108_v21, %v1251_v24  ;;  %v441_v32 = vadd.f32 %v1251_v24, %v440_v27  ;;  %v1093_v33 = vpop.f32.mrb[10].mxu0  ;;  %v1109_v34 = vpop.f32.mrb[10].mxu1 }
 0x10c   : > { %v1005_v35 = vpack.c.bf16 %v622_v30, %v621_v17  ;;  %vm540_vm14 = vcmp.ge.f32.partialorder %v428_v23, 0.0  ;;  %v572_v36 = vmul.f32 0.2, %v428_v23  ;;  %vm556_vm15 = vcmp.ge.f32.partialorder %v492_v25, 0.0  ;;  %v443_v37 = vpop.f32.mrb[11].mxu0  ;;  %v507_v38 = vpop.f32.mrb[11].mxu1 }
 0x10d   : > { %1029 = vst [vmem:[%s1268_s13 + $0x18] sm:$0xff] %v965_v29   ;;  %v588_v39 = vmul.f32 0.2, %v492_v25  ;;  %vm545_vm0 = vcmp.ge.f32.partialorder %v449_v26, 0.0  ;;  %v577_v40 = vmul.f32 0.2, %v449_v26  ;;  %v619_v41 = vsel %vm555_vm11, %v489_v6, %v587_v15 }
 0x10e   : > { %vm561_vm1 = vcmp.ge.f32.partialorder %v513_v31, 0.0  ;;  %1037 = vst [vmem:[%s1268_s13 + $0x58] sm:$0xff] %v1005_v35   ;;  %v604_v42 = vsel %vm540_vm14, %v428_v23, %v572_v36  ;;  %v593_v43 = vmul.f32 0.2, %v513_v31  ;;  %vm543_vm2 = vcmp.ge.f32.partialorder %v441_v32, 0.0 }
 0x10f   : > { %v960_v44 = vpack.c.bf16 %v604_v42, %v603_v18  ;;  %v620_v45 = vsel %vm556_vm15, %v492_v25, %v588_v39  ;;  %v575_v46 = vmul.f32 0.2, %v441_v32  ;;  %v505_v47 = vadd.f32 %v1251_v24, %v504_v28 }
 0x110   : > { %v1000_v48 = vpack.c.bf16 %v620_v45, %v619_v41  ;;  %v609_v49 = vsel %vm545_vm0, %v449_v26, %v577_v40  ;;  %v625_v50 = vsel %vm561_vm1, %v513_v31, %v593_v43  ;;  %v452_v51 = vadd.f32 %v1093_v33, %v1251_v24 }
 0x111   : > { %1028 = vst [vmem:[%s1268_s13 + $0x10] sm:$0xff] %v960_v44   ;;  %vm559_vm3 = vcmp.ge.f32.partialorder %v505_v47, 0.0  ;;  %v591_v52 = vmul.f32 0.2, %v505_v47  ;;  %v516_v53 = vadd.f32 %v1109_v34, %v1251_v24  ;;  %v444_v54 = vadd.f32 %v1251_v24, %v443_v37  ;;  %v1096_v55 = vpop.f32.mrb[12].mxu0  ;;  %v1112_v56 = vpop.f32.mrb[12].mxu1 }
 0x112   : > { %1036 = vst [vmem:[%s1268_s13 + $0x50] sm:$0xff] %v1000_v48   ;;  %vm546_vm4 = vcmp.ge.f32.partialorder %v452_v51, 0.0  ;;  %v578_v57 = vmul.f32 0.2, %v452_v51  ;;  %v508_v58 = vadd.f32 %v1251_v24, %v507_v38  ;;  %v465_v59 = vadd.f32 %v1096_v55, %v1251_v24  ;;  %v456_v60 = vpop.f32.mrb[13].mxu0  ;;  %v520_v61 = vpop.f32.mrb[13].mxu1 }
 0x113   : > { %v607_v62 = vsel %vm543_vm2, %v441_v32, %v575_v46  ;;  %vm562_vm5 = vcmp.ge.f32.partialorder %v516_v53, 0.0  ;;  %v594_v63 = vmul.f32 0.2, %v516_v53  ;;  %vm544_vm6 = vcmp.ge.f32.partialorder %v444_v54, 0.0  ;;  %v1097_v0 = vpop.f32.mrb[14].mxu0  ;;  %v1113_v1 = vpop.f32.mrb[14].mxu1 }
 0x114   : > { %v610_v2 = vsel %vm546_vm4, %v452_v51, %v578_v57  ;;  %v576_v3 = vmul.f32 0.2, %v444_v54  ;;  %vm560_vm7 = vcmp.ge.f32.partialorder %v508_v58, 0.0  ;;  %v592_v4 = vmul.f32 0.2, %v508_v58  ;;  %v459_v5 = vpop.f32.mrb[15].mxu0 }
 0x115   : > { %v623_v6 = vsel %vm559_vm3, %v505_v47, %v591_v52  ;;  %v975_v7 = vpack.c.bf16 %v610_v2, %v609_v49  ;;  %v626_v8 = vsel %vm562_vm5, %v516_v53, %v594_v63  ;;  %v581_v9 = vmul.f32 0.2, %v465_v59  ;;  %v523_v10 = vpop.f32.mrb[15].mxu1 }
 0x116   : > { %v1015_v11 = vpack.c.bf16 %v626_v8, %v625_v50  ;;  %v608_v12 = vsel %vm544_vm6, %v444_v54, %v576_v3  ;;  %v624_v13 = vsel %vm560_vm7, %v508_v58, %v592_v4  ;;  %v529_v14 = vadd.f32 %v1112_v56, %v1251_v24 }
 0x117   : > { %1031 = vst [vmem:[%s1268_s13 + $0x28] sm:$0xff] %v975_v7   ;;  %v970_v15 = vpack.c.bf16 %v608_v12, %v607_v62  ;;  %v1010_v16 = vpack.c.bf16 %v624_v13, %v623_v6  ;;  %vm549_vm8 = vcmp.ge.f32.partialorder %v465_v59, 0.0  ;;  %v457_v17 = vadd.f32 %v1251_v24, %v456_v60 }
 0x118   : > { %1039 = vst [vmem:[%s1268_s13 + $0x68] sm:$0xff] %v1015_v11   ;;  %vm565_vm9 = vcmp.ge.f32.partialorder %v529_v14, 0.0  ;;  %v597_v18 = vmul.f32 0.2, %v529_v14  ;;  %v521_v19 = vadd.f32 %v1251_v24, %v520_v61  ;;  %v468_v20 = vadd.f32 %v1097_v0, %v1251_v24 }
 0x119   : > { %1030 = vst [vmem:[%s1268_s13 + $0x20] sm:$0xff] %v970_v15   ;;  %1038 = vst [vmem:[%s1268_s13 + $0x60] sm:$0xff] %v1010_v16   ;;  %v579_v21 = vmul.f32 0.2, %v457_v17  ;;  %v532_v22 = vadd.f32 %v1113_v1, %v1251_v24  ;;  %v460_v23 = vadd.f32 %v1251_v24, %v459_v5  ;;  %v613_v25 = vsel %vm549_vm8, %v465_v59, %v581_v9 }
 0x11a   : > { %vm547_vm10 = vcmp.ge.f32.partialorder %v457_v17, 0.0  ;;  %vm550_vm11 = vcmp.ge.f32.partialorder %v468_v20, 0.0  ;;  %v629_v26 = vsel %vm565_vm9, %v529_v14, %v597_v18  ;;  %v582_v27 = vmul.f32 0.2, %v468_v20 }
 0x11b   : > { %vm566_vm12 = vcmp.ge.f32.partialorder %v532_v22, 0.0  ;;  %v598_v28 = vmul.f32 0.2, %v532_v22  ;;  %vm563_vm13 = vcmp.ge.f32.partialorder %v521_v19, 0.0  ;;  %vm548_vm14 = vcmp.ge.f32.partialorder %v460_v23, 0.0 }
 0x11c   : > { %v580_v29 = vmul.f32 0.2, %v460_v23  ;;  %v524_v30 = vadd.f32 %v1251_v24, %v523_v10  ;;  %v611_v31 = vsel %vm547_vm10, %v457_v17, %v579_v21  ;;  %v595_v32 = vmul.f32 0.2, %v521_v19 }
 0x11d   : > { %v614_v33 = vsel %vm550_vm11, %v468_v20, %v582_v27  ;;  %v630_v34 = vsel %vm566_vm12, %v532_v22, %v598_v28 }
 0x11e   : > { %v985_v35 = vpack.c.bf16 %v614_v33, %v613_v25  ;;  %v1025_v36 = vpack.c.bf16 %v630_v34, %v629_v26  ;;  %v612_v37 = vsel %vm548_vm14, %v460_v23, %v580_v29  ;;  %vm564_vm15 = vcmp.ge.f32.partialorder %v524_v30, 0.0 }
 0x11f   : > { %v980_v38 = vpack.c.bf16 %v612_v37, %v611_v31  ;;  %v596_v39 = vmul.f32 0.2, %v524_v30  ;;  %v627_v40 = vsel %vm563_vm13, %v521_v19, %v595_v32 }
 0x120   : > { %1033 = vst [vmem:[%s1268_s13 + $0x38] sm:$0xff] %v985_v35   ;;  %1041 = vst [vmem:[%s1268_s13 + $0x78] sm:$0xff] %v1025_v36  }
 0x121   : > { %1032 = vst [vmem:[%s1268_s13 + $0x30] sm:$0xff] %v980_v38   ;;  %v628_v41 = vsel %vm564_vm15, %v524_v30, %v596_v39 }
 0x122   : > { %v1020_v42 = vpack.c.bf16 %v628_v41, %v627_v40 }
 0x124   : > { %1040 = vst [vmem:[%s1268_s13 + $0x70] sm:$0xff] %v1020_v42  }
 0x125 PF: > { %s13_s12 = sadd.s32 1, %s1168_s12  }
 0x126   : > { %p10_p4 = scmp.ge.s32.totalorder %s13_s12, 4  }
 0x128   :  { %12 = sbr.rel (!%p10_p4) target bundleno = 1 (0x1), region = 62 }

// kernel: sp_fc_discriminator_forward.6
= control target key start
LH: loop header
LB: loop body
LE: loop exit
PB: predicated region body
PF: predicated region fallthrough
CT: control target
= control target key end

     0   :  { %s1405_s1 = inlined_call_operand.vmem [shape: bf16[512,128], index: 1, kind: input, shape index: {}]   ;;  %s1406_s0 = inlined_call_operand.vmem [shape: bf16[128,512], index: 0, kind: input, shape index: {}]   ;;  %s1407_s2 = inlined_call_operand.vmem [shape: f32[1,128], index: 2, kind: input, shape index: {}]   ;;  %s1408_s3 = inlined_call_operand.vmem [shape: bf16[128,128], index: 3, kind: output, shape index: {}]  }
   0x1   :  { %v1068_v0 = vld [vmem:[%s1405_s1 + $0x40] sm:$0xff]   ;;  %v1072_v4 = vld [vmem:[%s1405_s1 + $0x48] sm:$0xff]   ;;  %v1076_v8 = vld [vmem:[%s1405_s1 + $0x50] sm:$0xff]  }
   0x2   :  { %v1069_v1 = vld [vmem:[%s1405_s1 + $0xc0] sm:$0xff]   ;;  %940 = vmatprep.subr.bf16.mxu0 %v1068_v0  ;;  %v1073_v5 = vld [vmem:[%s1405_s1 + $0xc8] sm:$0xff]   ;;  %v1077_v9 = vld [vmem:[%s1405_s1 + $0xd0] sm:$0xff]  }
   0x3   :  { %v1070_v2 = vld [vmem:[%s1405_s1] sm:$0xff]   ;;  %1004 = vmatprep.subr.bf16.mxu1 %v1069_v1  ;;  %v1074_v6 = vld [vmem:[%s1405_s1 + $0x8] sm:$0xff]   ;;  %v1078_v10 = vld [vmem:[%s1405_s1 + $0x10] sm:$0xff]  }
   0x4   :  { %v1071_v3 = vld [vmem:[%s1405_s1 + $0x80] sm:$0xff]   ;;  %941 = vmatpush3.bf16.msra.mxu0 %v1070_v2  ;;  %v1075_v7 = vld [vmem:[%s1405_s1 + $0x88] sm:$0xff]   ;;  %v1079_v11 = vld [vmem:[%s1405_s1 + $0x90] sm:$0xff]  }
   0x5   :  { %1005 = vmatpush3.bf16.msra.mxu1 %v1071_v3  ;;  %942 = vmatprep.subr.bf16.mxu0 %v1072_v4  ;;  %v1080_v12 = vld [vmem:[%s1405_s1 + $0x58] sm:$0xff]   ;;  %v1084_v16 = vld [vmem:[%s1405_s1 + $0x60] sm:$0xff]   ;;  %v1088_v20 = vld [vmem:[%s1405_s1 + $0x68] sm:$0xff]  }
   0x6   :  { %1006 = vmatprep.subr.bf16.mxu1 %v1073_v5  ;;  %v1081_v13 = vld [vmem:[%s1405_s1 + $0xd8] sm:$0xff]   ;;  %v1085_v17 = vld [vmem:[%s1405_s1 + $0xe0] sm:$0xff]   ;;  %v1089_v21 = vld [vmem:[%s1405_s1 + $0xe8] sm:$0xff]  }
   0x7   :  { %v1082_v14 = vld [vmem:[%s1405_s1 + $0x18] sm:$0xff]   ;;  %v1086_v18 = vld [vmem:[%s1405_s1 + $0x20] sm:$0xff]   ;;  %v1090_v22 = vld [vmem:[%s1405_s1 + $0x28] sm:$0xff]  }
   0x8   :  { %943 = vmatpush3.bf16.msra.mxu0 %v1074_v6  ;;  %v1083_v15 = vld [vmem:[%s1405_s1 + $0x98] sm:$0xff]   ;;  %v1087_v19 = vld [vmem:[%s1405_s1 + $0xa0] sm:$0xff]   ;;  %v1091_v23 = vld [vmem:[%s1405_s1 + $0xa8] sm:$0xff]  }
   0x9   :  { %1007 = vmatpush3.bf16.msra.mxu1 %v1075_v7  ;;  %944 = vmatprep.subr.bf16.mxu0 %v1076_v8  ;;  %v1092_v24 = vld [vmem:[%s1405_s1 + $0x70] sm:$0xff]   ;;  %v1096_v28 = vld [vmem:[%s1405_s1 + $0x78] sm:$0xff]   ;;  %v1363_v2 = vld [vmem:[%s1407_s2] ss:$0 sm:$0xff] }
   0xa   :  { %1008 = vmatprep.subr.bf16.mxu1 %v1077_v9  ;;  %v1093_v25 = vld [vmem:[%s1405_s1 + $0xf0] sm:$0xff]   ;;  %v1097_v29 = vld [vmem:[%s1405_s1 + $0xf8] sm:$0xff]  }
   0xb   :  { %v1094_v26 = vld [vmem:[%s1405_s1 + $0x30] sm:$0xff]   ;;  %v1098_v30 = vld [vmem:[%s1405_s1 + $0x38] sm:$0xff]  }
   0xc   :  { %945 = vmatpush3.bf16.msra.mxu0 %v1078_v10  ;;  %v1095_v27 = vld [vmem:[%s1405_s1 + $0xb0] sm:$0xff]   ;;  %v1099_v31 = vld [vmem:[%s1405_s1 + $0xb8] sm:$0xff]  }
   0xd   :  { %1009 = vmatpush3.bf16.msra.mxu1 %v1079_v11  ;;  %946 = vmatprep.subr.bf16.mxu0 %v1080_v12  ;;  %v1100_v32 = vld [vmem:[%s1406_s0] ss:$16 sps:$4 sm:$0xff]   ;;  %v1102_v33 = vld [vmem:[%s1406_s0 + $0x4] ss:$16 sps:$4 sm:$0xff]   ;;  %v1103_v34 = vld [vmem:[%s1406_s0 + $0x8] ss:$16 sps:$4 sm:$0xff]  }
   0xe   :  { %1010 = vmatprep.subr.bf16.mxu1 %v1081_v13  ;;  %v1105_v35 = vld [vmem:[%s1406_s0 + $0xc] ss:$16 sps:$4 sm:$0xff]   ;;  %502 = vmatprep.mubr.bf16.mxu0 %v1102_v33  ;;  %v1106_v36 = vld [vmem:[%s1406_s0 + $0x24] ss:$16 sps:$4 sm:$0xff]   ;;  %v1110_v38 = vld [vmem:[%s1406_s0 + $0x20] ss:$16 sps:$4 sm:$0xff]  }
   0xf   :  { %599 = vmatprep.mubr.bf16.mxu1 %v1105_v35  ;;  %v1108_v37 = vld [vmem:[%s1406_s0 + $0x2c] ss:$16 sps:$4 sm:$0xff]   ;;  %v1111_v39 = vld [vmem:[%s1406_s0 + $0x28] ss:$16 sps:$4 sm:$0xff]   ;;  %v1112_v40 = vld [vmem:[%s1406_s0 + $0x44] ss:$16 sps:$4 sm:$0xff]  }
  0x10   :  { %947 = vmatpush3.bf16.msra.mxu0 %v1082_v14  ;;  %v1114_v41 = vld [vmem:[%s1406_s0 + $0x4c] ss:$16 sps:$4 sm:$0xff]   ;;  %v1116_v42 = vld [vmem:[%s1406_s0 + $0x40] ss:$16 sps:$4 sm:$0xff]   ;;  %v1117_v43 = vld [vmem:[%s1406_s0 + $0x48] ss:$16 sps:$4 sm:$0xff]  }
  0x11   :  { %1011 = vmatpush3.bf16.msra.mxu1 %v1083_v15  ;;  %948 = vmatprep.subr.bf16.mxu0 %v1084_v16  ;;  %v1118_v44 = vld [vmem:[%s1406_s0 + $0x64] ss:$16 sps:$4 sm:$0xff]   ;;  %v1120_v45 = vld [vmem:[%s1406_s0 + $0x6c] ss:$16 sps:$4 sm:$0xff]   ;;  %v1122_v46 = vld [vmem:[%s1406_s0 + $0x60] ss:$16 sps:$4 sm:$0xff]  }
  0x12   :  { %1012 = vmatprep.subr.bf16.mxu1 %v1085_v17  ;;  %v1123_v47 = vld [vmem:[%s1406_s0 + $0x68] ss:$16 sps:$4 sm:$0xff]   ;;  %v1124_v48 = vld [vmem:[%s1406_s0 + $0x84] ss:$16 sps:$4 sm:$0xff]   ;;  %v1126_v49 = vld [vmem:[%s1406_s0 + $0x8c] ss:$16 sps:$4 sm:$0xff]  }
  0x13   :  { %v1128_v50 = vld [vmem:[%s1406_s0 + $0x80] ss:$16 sps:$4 sm:$0xff]   ;;  %v1129_v51 = vld [vmem:[%s1406_s0 + $0x88] ss:$16 sps:$4 sm:$0xff]   ;;  %v1130_v52 = vld [vmem:[%s1406_s0 + $0xa4] ss:$16 sps:$4 sm:$0xff]  }
  0x14   :  { %949 = vmatpush3.bf16.msra.mxu0 %v1086_v18  ;;  %v1132_v53 = vld [vmem:[%s1406_s0 + $0xac] ss:$16 sps:$4 sm:$0xff]   ;;  %v1134_v54 = vld [vmem:[%s1406_s0 + $0xa0] ss:$16 sps:$4 sm:$0xff]   ;;  %v1135_v55 = vld [vmem:[%s1406_s0 + $0xa8] ss:$16 sps:$4 sm:$0xff]  }
  0x15   :  { %1013 = vmatpush3.bf16.msra.mxu1 %v1087_v19  ;;  %950 = vmatprep.subr.bf16.mxu0 %v1088_v20  ;;  %v1136_v56 = vld [vmem:[%s1406_s0 + $0xc4] ss:$16 sps:$4 sm:$0xff]   ;;  %v1138_v57 = vld [vmem:[%s1406_s0 + $0xcc] ss:$16 sps:$4 sm:$0xff]   ;;  %v1140_v58 = vld [vmem:[%s1406_s0 + $0xc0] ss:$16 sps:$4 sm:$0xff]  }
  0x16   :  { %1014 = vmatprep.subr.bf16.mxu1 %v1089_v21  ;;  %v1141_v59 = vld [vmem:[%s1406_s0 + $0xc8] ss:$16 sps:$4 sm:$0xff]   ;;  %v1142_v60 = vld [vmem:[%s1406_s0 + $0xe4] ss:$16 sps:$4 sm:$0xff]   ;;  %v1144_v61 = vld [vmem:[%s1406_s0 + $0xec] ss:$16 sps:$4 sm:$0xff]  }
  0x17   :  { %v1146_v62 = vld [vmem:[%s1406_s0 + $0xe0] ss:$16 sps:$4 sm:$0xff]   ;;  %v1147_v63 = vld [vmem:[%s1406_s0 + $0xe8] ss:$16 sps:$4 sm:$0xff]  }
  0x18   :  { %951 = vmatpush3.bf16.msra.mxu0 %v1090_v22 }
  0x19   :  { %1015 = vmatpush3.bf16.msra.mxu1 %v1091_v23  ;;  %952 = vmatprep.subr.bf16.mxu0 %v1092_v24 }
  0x1a   :  { %1016 = vmatprep.subr.bf16.mxu1 %v1093_v25 }
  0x1c   :  { %953 = vmatpush3.bf16.msra.mxu0 %v1094_v26 }
  0x1d   :  { %1017 = vmatpush3.bf16.msra.mxu1 %v1095_v27  ;;  %954 = vmatprep.subr.bf16.mxu0 %v1096_v28 }
  0x1e   :  { %1018 = vmatprep.subr.bf16.mxu1 %v1097_v29 }
  0x20   :  { %955 = vmatpush3.bf16.msra.mxu0 %v1098_v30 }
  0x21   :  { %1019 = vmatpush3.bf16.msra.mxu1 %v1099_v31 }
  0x23   :  { %503 = vmatmul.mubr.bf16.vlgmr.msra.gmra.mrb[0].mxu0 %v1100_v32 }
  0x24   :  { %600 = vmatmul.mubr.bf16.vlgmr.msra.gmra.mrb[0].mxu1 %v1103_v34  ;;  %510 = vmatprep.mubr.bf16.mxu0 %v1106_v36 }
  0x25   :  { %607 = vmatprep.mubr.bf16.mxu1 %v1108_v37 }
  0x2b   :  { %511 = vmatmul.mubr.bf16.gmra.mrb[4].mxu0 %v1110_v38 }
  0x2c   :  { %608 = vmatmul.mubr.bf16.gmra.mrb[4].mxu1 %v1111_v39  ;;  %518 = vmatprep.mubr.bf16.mxu0 %v1112_v40 }
  0x2d   :  { %615 = vmatprep.mubr.bf16.mxu1 %v1114_v41 }
  0x33   :  { %519 = vmatmul.mubr.bf16.gmra.mrb[8].mxu0 %v1116_v42 }
  0x34   :  { %616 = vmatmul.mubr.bf16.gmra.mrb[8].mxu1 %v1117_v43  ;;  %526 = vmatprep.mubr.bf16.mxu0 %v1118_v44 }
  0x35   :  { %623 = vmatprep.mubr.bf16.mxu1 %v1120_v45 }
  0x3b   :  { %527 = vmatmul.mubr.bf16.gmra.mrb[12].mxu0 %v1122_v46 }
  0x3c   :  { %624 = vmatmul.mubr.bf16.gmra.mrb[12].mxu1 %v1123_v47  ;;  %534 = vmatprep.mubr.bf16.mxu0 %v1124_v48 }
  0x3d   :  { %631 = vmatprep.mubr.bf16.mxu1 %v1126_v49 }
  0x43   :  { %535 = vmatmul.mubr.bf16.gmra.mrb[16].mxu0 %v1128_v50 }
  0x44   :  { %632 = vmatmul.mubr.bf16.gmra.mrb[16].mxu1 %v1129_v51  ;;  %542 = vmatprep.mubr.bf16.mxu0 %v1130_v52 }
  0x45   :  { %639 = vmatprep.mubr.bf16.mxu1 %v1132_v53 }
  0x4b   :  { %543 = vmatmul.mubr.bf16.gmra.mrb[20].mxu0 %v1134_v54 }
  0x4c   :  { %640 = vmatmul.mubr.bf16.gmra.mrb[20].mxu1 %v1135_v55  ;;  %550 = vmatprep.mubr.bf16.mxu0 %v1136_v56 }
  0x4d   :  { %647 = vmatprep.mubr.bf16.mxu1 %v1138_v57 }
  0x53   :  { %551 = vmatmul.mubr.bf16.gmra.mrb[24].mxu0 %v1140_v58 }
  0x54   :  { %648 = vmatmul.mubr.bf16.gmra.mrb[24].mxu1 %v1141_v59  ;;  %558 = vmatprep.mubr.bf16.mxu0 %v1142_v60 }
  0x55   :  { %655 = vmatprep.mubr.bf16.mxu1 %v1144_v61 }
  0x5b   :  { %559 = vmatmul.mubr.bf16.gmra.mrb[28].mxu0 %v1146_v62 }
  0x5c   :  { %656 = vmatmul.mubr.bf16.gmra.mrb[28].mxu1 %v1147_v63 }
  0xf6   :  { %v956_v0 = vpop.f32.mrb[0].mxu0 }
  0xf7   :  { %v1020_v1 = vpop.f32.mrb[0].mxu1  ;;  %v957_v3 = vpop.f32.mrb[1].mxu0 }
  0xf8   :  { %v958_v4 = vadd.f32 %v957_v3, %v956_v0  ;;  %v1021_v5 = vpop.f32.mrb[1].mxu1  ;;  %v959_v6 = vpop.f32.mrb[2].mxu0 }
  0xf9   :  { %v1022_v7 = vadd.f32 %v1021_v5, %v1020_v1  ;;  %v1023_v8 = vpop.f32.mrb[2].mxu1  ;;  %v960_v9 = vpop.f32.mrb[3].mxu0 }
  0xfa   :  { %v505_v10 = vadd.f32 %v958_v4, %v1363_v2  ;;  %v961_v11 = vadd.f32 %v960_v9, %v959_v6  ;;  %v1024_v12 = vpop.f32.mrb[3].mxu1 }
  0xfb   :  { %v1025_v13 = vadd.f32 %v1024_v12, %v1023_v8 }
  0xfc   :  { %v602_v14 = vadd.f32 %v1022_v7, %v505_v10  ;;  %v508_v15 = vadd.f32 %v961_v11, %v1363_v2 }
  0xfe   :  { %v680_v16 = vmul.f32 0.2, %v602_v14  ;;  %v605_v17 = vadd.f32 %v1025_v13, %v508_v15  ;;  %v962_v18 = vpop.f32.mrb[4].mxu0  ;;  %vm664_vm0 = vcmp.ge.f32.partialorder %v602_v14, 0.0 }
  0xff   :  { %v1026_v19 = vpop.f32.mrb[4].mxu1  ;;  %v963_v20 = vpop.f32.mrb[5].mxu0 }
 0x100   :  { %vm665_vm1 = vcmp.ge.f32.partialorder %v605_v17, 0.0  ;;  %v681_v21 = vmul.f32 0.2, %v605_v17  ;;  %v964_v22 = vadd.f32 %v963_v20, %v962_v18  ;;  %v1027_v23 = vpop.f32.mrb[5].mxu1  ;;  %v965_v24 = vpop.f32.mrb[6].mxu0  ;;  %v696_v28 = vsel %vm664_vm0, %v602_v14, %v680_v16 }
 0x101   :  { %v1028_v25 = vadd.f32 %v1027_v23, %v1026_v19  ;;  %v1029_v26 = vpop.f32.mrb[6].mxu1  ;;  %v966_v27 = vpop.f32.mrb[7].mxu0 }
 0x102   :  { %v697_v29 = vsel %vm665_vm1, %v605_v17, %v681_v21  ;;  %v513_v30 = vadd.f32 %v964_v22, %v1363_v2  ;;  %v967_v31 = vadd.f32 %v966_v27, %v965_v24  ;;  %v1030_v32 = vpop.f32.mrb[7].mxu1 }
 0x103   :  { %v896_v33 = vpack.c.bf16 %v697_v29, %v696_v28  ;;  %v1031_v34 = vadd.f32 %v1030_v32, %v1029_v26 }
 0x104   :  { %v610_v35 = vadd.f32 %v1028_v25, %v513_v30  ;;  %v516_v36 = vadd.f32 %v967_v31, %v1363_v2 }
 0x105   :  { %897 = vst [vmem:[%s1408_s3] sm:$0xff] %v896_v33  }
 0x106   :  { %v682_v37 = vmul.f32 0.2, %v610_v35  ;;  %v613_v38 = vadd.f32 %v1031_v34, %v516_v36  ;;  %v968_v39 = vpop.f32.mrb[8].mxu0  ;;  %vm666_vm2 = vcmp.ge.f32.partialorder %v610_v35, 0.0 }
 0x107   :  { %v1032_v40 = vpop.f32.mrb[8].mxu1  ;;  %v969_v41 = vpop.f32.mrb[9].mxu0 }
 0x108   :  { %vm667_vm3 = vcmp.ge.f32.partialorder %v613_v38, 0.0  ;;  %v683_v42 = vmul.f32 0.2, %v613_v38  ;;  %v970_v43 = vadd.f32 %v969_v41, %v968_v39  ;;  %v1033_v44 = vpop.f32.mrb[9].mxu1  ;;  %v971_v45 = vpop.f32.mrb[10].mxu0  ;;  %v698_v49 = vsel %vm666_vm2, %v610_v35, %v682_v37 }
 0x109   :  { %v1034_v46 = vadd.f32 %v1033_v44, %v1032_v40  ;;  %v1035_v47 = vpop.f32.mrb[10].mxu1  ;;  %v972_v48 = vpop.f32.mrb[11].mxu0 }
 0x10a   :  { %v699_v50 = vsel %vm667_vm3, %v613_v38, %v683_v42  ;;  %v521_v51 = vadd.f32 %v970_v43, %v1363_v2  ;;  %v973_v52 = vadd.f32 %v972_v48, %v971_v45  ;;  %v1036_v53 = vpop.f32.mrb[11].mxu1 }
 0x10b   :  { %v901_v54 = vpack.c.bf16 %v699_v50, %v698_v49  ;;  %v1037_v55 = vadd.f32 %v1036_v53, %v1035_v47 }
 0x10c   :  { %v618_v56 = vadd.f32 %v1034_v46, %v521_v51  ;;  %v524_v57 = vadd.f32 %v973_v52, %v1363_v2 }
 0x10d   :  { %933 = vst [vmem:[%s1408_s3 + $0x8] sm:$0xff] %v901_v54  }
 0x10e   :  { %v684_v58 = vmul.f32 0.2, %v618_v56  ;;  %v621_v59 = vadd.f32 %v1037_v55, %v524_v57  ;;  %v974_v60 = vpop.f32.mrb[12].mxu0  ;;  %vm668_vm4 = vcmp.ge.f32.partialorder %v618_v56, 0.0 }
 0x10f   :  { %v1038_v61 = vpop.f32.mrb[12].mxu1  ;;  %v975_v62 = vpop.f32.mrb[13].mxu0 }
 0x110   :  { %vm669_vm5 = vcmp.ge.f32.partialorder %v621_v59, 0.0  ;;  %v685_v63 = vmul.f32 0.2, %v621_v59  ;;  %v976_v0 = vadd.f32 %v975_v62, %v974_v60  ;;  %v1039_v1 = vpop.f32.mrb[13].mxu1  ;;  %v977_v3 = vpop.f32.mrb[14].mxu0  ;;  %v700_v7 = vsel %vm668_vm4, %v618_v56, %v684_v58 }
 0x111   :  { %v1040_v4 = vadd.f32 %v1039_v1, %v1038_v61  ;;  %v1041_v5 = vpop.f32.mrb[14].mxu1  ;;  %v978_v6 = vpop.f32.mrb[15].mxu0 }
 0x112   :  { %v701_v8 = vsel %vm669_vm5, %v621_v59, %v685_v63  ;;  %v529_v9 = vadd.f32 %v976_v0, %v1363_v2  ;;  %v979_v10 = vadd.f32 %v978_v6, %v977_v3  ;;  %v1042_v11 = vpop.f32.mrb[15].mxu1 }
 0x113   :  { %v906_v12 = vpack.c.bf16 %v701_v8, %v700_v7  ;;  %v1043_v13 = vadd.f32 %v1042_v11, %v1041_v5 }
 0x114   :  { %v626_v14 = vadd.f32 %v1040_v4, %v529_v9  ;;  %v532_v15 = vadd.f32 %v979_v10, %v1363_v2 }
 0x115   :  { %934 = vst [vmem:[%s1408_s3 + $0x10] sm:$0xff] %v906_v12  }
 0x116   :  { %v686_v16 = vmul.f32 0.2, %v626_v14  ;;  %v629_v17 = vadd.f32 %v1043_v13, %v532_v15  ;;  %v980_v18 = vpop.f32.mrb[16].mxu0  ;;  %vm670_vm6 = vcmp.ge.f32.partialorder %v626_v14, 0.0 }
 0x117   :  { %v1044_v19 = vpop.f32.mrb[16].mxu1  ;;  %v981_v20 = vpop.f32.mrb[17].mxu0 }
 0x118   :  { %vm671_vm7 = vcmp.ge.f32.partialorder %v629_v17, 0.0  ;;  %v687_v21 = vmul.f32 0.2, %v629_v17  ;;  %v982_v22 = vadd.f32 %v981_v20, %v980_v18  ;;  %v1045_v23 = vpop.f32.mrb[17].mxu1  ;;  %v983_v24 = vpop.f32.mrb[18].mxu0  ;;  %v702_v28 = vsel %vm670_vm6, %v626_v14, %v686_v16 }
 0x119   :  { %v1046_v25 = vadd.f32 %v1045_v23, %v1044_v19  ;;  %v1047_v26 = vpop.f32.mrb[18].mxu1  ;;  %v984_v27 = vpop.f32.mrb[19].mxu0 }
 0x11a   :  { %v703_v29 = vsel %vm671_vm7, %v629_v17, %v687_v21  ;;  %v537_v30 = vadd.f32 %v982_v22, %v1363_v2  ;;  %v985_v31 = vadd.f32 %v984_v27, %v983_v24  ;;  %v1048_v32 = vpop.f32.mrb[19].mxu1 }
 0x11b   :  { %v911_v33 = vpack.c.bf16 %v703_v29, %v702_v28  ;;  %v1049_v34 = vadd.f32 %v1048_v32, %v1047_v26 }
 0x11c   :  { %v634_v35 = vadd.f32 %v1046_v25, %v537_v30  ;;  %v540_v36 = vadd.f32 %v985_v31, %v1363_v2 }
 0x11d   :  { %935 = vst [vmem:[%s1408_s3 + $0x18] sm:$0xff] %v911_v33  }
 0x11e   :  { %v688_v37 = vmul.f32 0.2, %v634_v35  ;;  %v637_v38 = vadd.f32 %v1049_v34, %v540_v36  ;;  %v986_v39 = vpop.f32.mrb[20].mxu0  ;;  %vm672_vm8 = vcmp.ge.f32.partialorder %v634_v35, 0.0 }
 0x11f   :  { %v1050_v40 = vpop.f32.mrb[20].mxu1  ;;  %v987_v41 = vpop.f32.mrb[21].mxu0 }
 0x120   :  { %vm673_vm9 = vcmp.ge.f32.partialorder %v637_v38, 0.0  ;;  %v689_v42 = vmul.f32 0.2, %v637_v38  ;;  %v988_v43 = vadd.f32 %v987_v41, %v986_v39  ;;  %v1051_v44 = vpop.f32.mrb[21].mxu1  ;;  %v989_v45 = vpop.f32.mrb[22].mxu0  ;;  %v704_v49 = vsel %vm672_vm8, %v634_v35, %v688_v37 }
 0x121   :  { %v1052_v46 = vadd.f32 %v1051_v44, %v1050_v40  ;;  %v1053_v47 = vpop.f32.mrb[22].mxu1  ;;  %v990_v48 = vpop.f32.mrb[23].mxu0 }
 0x122   :  { %v705_v50 = vsel %vm673_vm9, %v637_v38, %v689_v42  ;;  %v545_v51 = vadd.f32 %v988_v43, %v1363_v2  ;;  %v991_v52 = vadd.f32 %v990_v48, %v989_v45  ;;  %v1054_v53 = vpop.f32.mrb[23].mxu1 }
 0x123   :  { %v916_v54 = vpack.c.bf16 %v705_v50, %v704_v49  ;;  %v1055_v55 = vadd.f32 %v1054_v53, %v1053_v47 }
 0x124   :  { %v642_v56 = vadd.f32 %v1052_v46, %v545_v51  ;;  %v548_v57 = vadd.f32 %v991_v52, %v1363_v2 }
 0x125   :  { %936 = vst [vmem:[%s1408_s3 + $0x20] sm:$0xff] %v916_v54  }
 0x126   :  { %v690_v58 = vmul.f32 0.2, %v642_v56  ;;  %v645_v59 = vadd.f32 %v1055_v55, %v548_v57  ;;  %v992_v60 = vpop.f32.mrb[24].mxu0  ;;  %vm674_vm10 = vcmp.ge.f32.partialorder %v642_v56, 0.0 }
 0x127   :  { %v1056_v61 = vpop.f32.mrb[24].mxu1  ;;  %v993_v62 = vpop.f32.mrb[25].mxu0 }
 0x128   :  { %vm675_vm11 = vcmp.ge.f32.partialorder %v645_v59, 0.0  ;;  %v691_v63 = vmul.f32 0.2, %v645_v59  ;;  %v994_v0 = vadd.f32 %v993_v62, %v992_v60  ;;  %v1057_v1 = vpop.f32.mrb[25].mxu1  ;;  %v995_v3 = vpop.f32.mrb[26].mxu0  ;;  %v706_v7 = vsel %vm674_vm10, %v642_v56, %v690_v58 }
 0x129   :  { %v1058_v4 = vadd.f32 %v1057_v1, %v1056_v61  ;;  %v1059_v5 = vpop.f32.mrb[26].mxu1  ;;  %v996_v6 = vpop.f32.mrb[27].mxu0 }
 0x12a   :  { %v707_v8 = vsel %vm675_vm11, %v645_v59, %v691_v63  ;;  %v553_v9 = vadd.f32 %v994_v0, %v1363_v2  ;;  %v997_v10 = vadd.f32 %v996_v6, %v995_v3  ;;  %v1060_v11 = vpop.f32.mrb[27].mxu1 }
 0x12b   :  { %v921_v12 = vpack.c.bf16 %v707_v8, %v706_v7  ;;  %v1061_v13 = vadd.f32 %v1060_v11, %v1059_v5 }
 0x12c   :  { %v650_v14 = vadd.f32 %v1058_v4, %v553_v9  ;;  %v556_v15 = vadd.f32 %v997_v10, %v1363_v2 }
 0x12d   :  { %937 = vst [vmem:[%s1408_s3 + $0x28] sm:$0xff] %v921_v12  }
 0x12e   :  { %v692_v16 = vmul.f32 0.2, %v650_v14  ;;  %v653_v17 = vadd.f32 %v1061_v13, %v556_v15  ;;  %v998_v18 = vpop.f32.mrb[28].mxu0  ;;  %vm676_vm12 = vcmp.ge.f32.partialorder %v650_v14, 0.0 }
 0x12f   :  { %v1062_v19 = vpop.f32.mrb[28].mxu1  ;;  %v999_v20 = vpop.f32.mrb[29].mxu0 }
 0x130   :  { %vm677_vm13 = vcmp.ge.f32.partialorder %v653_v17, 0.0  ;;  %v693_v21 = vmul.f32 0.2, %v653_v17  ;;  %v1000_v22 = vadd.f32 %v999_v20, %v998_v18  ;;  %v1063_v23 = vpop.f32.mrb[29].mxu1  ;;  %v1001_v24 = vpop.f32.mrb[30].mxu0  ;;  %v708_v28 = vsel %vm676_vm12, %v650_v14, %v692_v16 }
 0x131   :  { %v1064_v25 = vadd.f32 %v1063_v23, %v1062_v19  ;;  %v1065_v26 = vpop.f32.mrb[30].mxu1  ;;  %v1002_v27 = vpop.f32.mrb[31].mxu0 }
 0x132   :  { %v709_v29 = vsel %vm677_vm13, %v653_v17, %v693_v21  ;;  %v561_v30 = vadd.f32 %v1000_v22, %v1363_v2  ;;  %v1003_v31 = vadd.f32 %v1002_v27, %v1001_v24  ;;  %v1066_v32 = vpop.f32.mrb[31].mxu1 }
 0x133   :  { %v926_v33 = vpack.c.bf16 %v709_v29, %v708_v28  ;;  %v1067_v34 = vadd.f32 %v1066_v32, %v1065_v26 }
 0x134   :  { %v658_v35 = vadd.f32 %v1064_v25, %v561_v30  ;;  %v564_v36 = vadd.f32 %v1003_v31, %v1363_v2 }
 0x135   :  { %938 = vst [vmem:[%s1408_s3 + $0x30] sm:$0xff] %v926_v33  }
 0x136   :  { %v694_v37 = vmul.f32 0.2, %v658_v35  ;;  %v661_v38 = vadd.f32 %v1067_v34, %v564_v36  ;;  %vm678_vm14 = vcmp.ge.f32.partialorder %v658_v35, 0.0 }
 0x138   :  { %vm679_vm15 = vcmp.ge.f32.partialorder %v661_v38, 0.0  ;;  %v695_v39 = vmul.f32 0.2, %v661_v38  ;;  %v710_v40 = vsel %vm678_vm14, %v658_v35, %v694_v37 }
 0x13a   :  { %v711_v41 = vsel %vm679_vm15, %v661_v38, %v695_v39 }
 0x13b   :  { %v931_v42 = vpack.c.bf16 %v711_v41, %v710_v40 }
 0x13d   :  { %939 = vst [vmem:[%s1408_s3 + $0x38] sm:$0xff] %v931_v42  }

// kernel: sp_fc_discriminator_forward.7
= control target key start
LH: loop header
LB: loop body
LE: loop exit
PB: predicated region body
PF: predicated region fallthrough
CT: control target
= control target key end

     0   :  { %s1407_s1 = inlined_call_operand.vmem [shape: bf16[1024,128], index: 1, kind: input, shape index: {}]   ;;  %s1408_s0 = inlined_call_operand.vmem [shape: bf16[32,1024], index: 0, kind: input, shape index: {}]   ;;  %s1409_s2 = inlined_call_operand.vmem [shape: f32[1,128], index: 2, kind: input, shape index: {}]   ;;  %s1410_s3 = inlined_call_operand.vmem [shape: bf16[32,128], index: 3, kind: output, shape index: {}]  }
   0x1   :  { %v1074_v0 = vld [vmem:[%s1407_s1 + $0x40] sm:$0xff]   ;;  %v1078_v4 = vld [vmem:[%s1407_s1 + $0x48] sm:$0xff]   ;;  %v1082_v8 = vld [vmem:[%s1407_s1 + $0x50] sm:$0xff]  }
   0x2   :  { %v1075_v1 = vld [vmem:[%s1407_s1 + $0xc0] sm:$0xff]   ;;  %962 = vmatprep.subr.bf16.mxu0 %v1074_v0  ;;  %v1079_v5 = vld [vmem:[%s1407_s1 + $0xc8] sm:$0xff]   ;;  %v1083_v9 = vld [vmem:[%s1407_s1 + $0xd0] sm:$0xff]  }
   0x3   :  { %v1076_v2 = vld [vmem:[%s1407_s1] sm:$0xff]   ;;  %990 = vmatprep.subr.bf16.mxu1 %v1075_v1  ;;  %v1080_v6 = vld [vmem:[%s1407_s1 + $0x8] sm:$0xff]   ;;  %v1084_v10 = vld [vmem:[%s1407_s1 + $0x10] sm:$0xff]  }
   0x4   :  { %v1077_v3 = vld [vmem:[%s1407_s1 + $0x80] sm:$0xff]   ;;  %963 = vmatpush3.bf16.msra.mxu0 %v1076_v2  ;;  %v1081_v7 = vld [vmem:[%s1407_s1 + $0x88] sm:$0xff]   ;;  %v1085_v11 = vld [vmem:[%s1407_s1 + $0x90] sm:$0xff]  }
   0x5   :  { %991 = vmatpush3.bf16.msra.mxu1 %v1077_v3  ;;  %964 = vmatprep.subr.bf16.mxu0 %v1078_v4  ;;  %v1086_v12 = vld [vmem:[%s1407_s1 + $0x58] sm:$0xff]   ;;  %v1090_v16 = vld [vmem:[%s1407_s1 + $0x60] sm:$0xff]   ;;  %v1094_v20 = vld [vmem:[%s1407_s1 + $0x68] sm:$0xff]  }
   0x6   :  { %992 = vmatprep.subr.bf16.mxu1 %v1079_v5  ;;  %v1087_v13 = vld [vmem:[%s1407_s1 + $0xd8] sm:$0xff]   ;;  %v1091_v17 = vld [vmem:[%s1407_s1 + $0xe0] sm:$0xff]   ;;  %v1095_v21 = vld [vmem:[%s1407_s1 + $0xe8] sm:$0xff]  }
   0x7   :  { %v1088_v14 = vld [vmem:[%s1407_s1 + $0x18] sm:$0xff]   ;;  %v1092_v18 = vld [vmem:[%s1407_s1 + $0x20] sm:$0xff]   ;;  %v1096_v22 = vld [vmem:[%s1407_s1 + $0x28] sm:$0xff]  }
   0x8   :  { %965 = vmatpush3.bf16.msra.mxu0 %v1080_v6  ;;  %v1089_v15 = vld [vmem:[%s1407_s1 + $0x98] sm:$0xff]   ;;  %v1093_v19 = vld [vmem:[%s1407_s1 + $0xa0] sm:$0xff]   ;;  %v1097_v23 = vld [vmem:[%s1407_s1 + $0xa8] sm:$0xff]  }
   0x9   :  { %993 = vmatpush3.bf16.msra.mxu1 %v1081_v7  ;;  %966 = vmatprep.subr.bf16.mxu0 %v1082_v8  ;;  %v1098_v24 = vld [vmem:[%s1407_s1 + $0x70] sm:$0xff]   ;;  %v1102_v28 = vld [vmem:[%s1407_s1 + $0x78] sm:$0xff]   ;;  %v15_v32 = vld [vmem:[%s1408_s0] sm:$0xff] }
   0xa   :  { %994 = vmatprep.subr.bf16.mxu1 %v1083_v9  ;;  %v1099_v25 = vld [vmem:[%s1407_s1 + $0xf0] sm:$0xff]   ;;  %v1103_v29 = vld [vmem:[%s1407_s1 + $0xf8] sm:$0xff]   ;;  %v19_v33 = vld [vmem:[%s1408_s0 + $0x20] sm:$0xff] }
   0xb   :  { %v1100_v26 = vld [vmem:[%s1407_s1 + $0x30] sm:$0xff]   ;;  %v1104_v30 = vld [vmem:[%s1407_s1 + $0x38] sm:$0xff]   ;;  %v16_v34 = vld [vmem:[%s1408_s0 + $0x8] sm:$0xff]  ;;  %v863_v35 = vcombine.low %v15_v32, %v19_v33  ;;  %v864_v36 = vcombine.high %v15_v32, %v19_v33 }
   0xc   :  { %967 = vmatpush3.bf16.msra.mxu0 %v1084_v10  ;;  %v1101_v27 = vld [vmem:[%s1407_s1 + $0xb0] sm:$0xff]   ;;  %v1105_v31 = vld [vmem:[%s1407_s1 + $0xb8] sm:$0xff]   ;;  %v20_v37 = vld [vmem:[%s1408_s0 + $0x28] sm:$0xff] }
   0xd   :  { %995 = vmatpush3.bf16.msra.mxu1 %v1085_v11  ;;  %968 = vmatprep.subr.bf16.mxu0 %v1086_v12  ;;  %v865_v38 = vcombine.low %v16_v34, %v20_v37  ;;  %v866_v39 = vcombine.high %v16_v34, %v20_v37  ;;  %v1106_v40 = vld [vmem:[%s1407_s1 + $0x140] sm:$0xff]   ;;  %v1110_v44 = vld [vmem:[%s1407_s1 + $0x148] sm:$0xff]   ;;  %v1114_v48 = vld [vmem:[%s1407_s1 + $0x150] sm:$0xff]  }
   0xe   :  { %996 = vmatprep.subr.bf16.mxu1 %v1087_v13  ;;  %662 = vmatprep.mubr.bf16.mxu0 %v864_v36  ;;  %v1107_v41 = vld [vmem:[%s1407_s1 + $0x1c0] sm:$0xff]   ;;  %v1111_v45 = vld [vmem:[%s1407_s1 + $0x1c8] sm:$0xff]   ;;  %v1115_v49 = vld [vmem:[%s1407_s1 + $0x1d0] sm:$0xff]  }
   0xf   :  { %711 = vmatprep.mubr.bf16.mxu1 %v866_v39  ;;  %v1108_v42 = vld [vmem:[%s1407_s1 + $0x100] sm:$0xff]   ;;  %v1112_v46 = vld [vmem:[%s1407_s1 + $0x108] sm:$0xff]   ;;  %v1116_v50 = vld [vmem:[%s1407_s1 + $0x110] sm:$0xff]  }
  0x10   :  { %969 = vmatpush3.bf16.msra.mxu0 %v1088_v14  ;;  %v1109_v43 = vld [vmem:[%s1407_s1 + $0x180] sm:$0xff]   ;;  %v1113_v47 = vld [vmem:[%s1407_s1 + $0x188] sm:$0xff]   ;;  %v1117_v51 = vld [vmem:[%s1407_s1 + $0x190] sm:$0xff]  }
  0x11   :  { %997 = vmatpush3.bf16.msra.mxu1 %v1089_v15  ;;  %970 = vmatprep.subr.bf16.mxu0 %v1090_v16  ;;  %v1118_v52 = vld [vmem:[%s1407_s1 + $0x158] sm:$0xff]   ;;  %v1122_v56 = vld [vmem:[%s1407_s1 + $0x160] sm:$0xff]   ;;  %v1126_v63 = vld [vmem:[%s1407_s1 + $0x168] sm:$0xff]  }
  0x12   :  { %998 = vmatprep.subr.bf16.mxu1 %v1091_v17  ;;  %v1119_v53 = vld [vmem:[%s1407_s1 + $0x1d8] sm:$0xff]   ;;  %v1123_v57 = vld [vmem:[%s1407_s1 + $0x1e0] sm:$0xff]   ;;  %v1127_v1 = vld [vmem:[%s1407_s1 + $0x1e8] sm:$0xff]  }
  0x13   :  { %v1120_v54 = vld [vmem:[%s1407_s1 + $0x118] sm:$0xff]   ;;  %v1124_v58 = vld [vmem:[%s1407_s1 + $0x120] sm:$0xff]   ;;  %v1128_v2 = vld [vmem:[%s1407_s1 + $0x128] sm:$0xff]  }
  0x14   :  { %971 = vmatpush3.bf16.msra.mxu0 %v1092_v18  ;;  %v1121_v55 = vld [vmem:[%s1407_s1 + $0x198] sm:$0xff]   ;;  %v1125_v59 = vld [vmem:[%s1407_s1 + $0x1a0] sm:$0xff]   ;;  %v1129_v3 = vld [vmem:[%s1407_s1 + $0x1a8] sm:$0xff]  }
  0x15   :  { %999 = vmatpush3.bf16.msra.mxu1 %v1093_v19  ;;  %972 = vmatprep.subr.bf16.mxu0 %v1094_v20  ;;  %v23_v60 = vld [vmem:[%s1408_s0 + $0x40] sm:$0xff]  ;;  %v24_v4 = vld [vmem:[%s1408_s0 + $0x48] sm:$0xff]  ;;  %v1130_v8 = vld [vmem:[%s1407_s1 + $0x170] sm:$0xff]  }
  0x16   :  { %1000 = vmatprep.subr.bf16.mxu1 %v1095_v21  ;;  %v27_v61 = vld [vmem:[%s1408_s0 + $0x60] sm:$0xff]  ;;  %v28_v5 = vld [vmem:[%s1408_s0 + $0x68] sm:$0xff]  ;;  %v1131_v9 = vld [vmem:[%s1407_s1 + $0x1f0] sm:$0xff]  }
  0x17   :  { %v872_v62 = vcombine.high %v23_v60, %v27_v61  ;;  %v871_v0 = vcombine.low %v23_v60, %v27_v61  ;;  %v874_v6 = vcombine.high %v24_v4, %v28_v5  ;;  %v873_v7 = vcombine.low %v24_v4, %v28_v5  ;;  %v1132_v10 = vld [vmem:[%s1407_s1 + $0x130] sm:$0xff]   ;;  %v1134_v12 = vld [vmem:[%s1407_s1 + $0x178] sm:$0xff]   ;;  %v862_v34 = vld [vmem:[%s1409_s2] ss:$0 sm:$0xff] }
  0x18   :  { %973 = vmatpush3.bf16.msra.mxu0 %v1096_v22  ;;  %v1133_v11 = vld [vmem:[%s1407_s1 + $0x1b0] sm:$0xff]   ;;  %v1135_v13 = vld [vmem:[%s1407_s1 + $0x1f8] sm:$0xff]  }
  0x19   :  { %1001 = vmatpush3.bf16.msra.mxu1 %v1097_v23  ;;  %974 = vmatprep.subr.bf16.mxu0 %v1098_v24  ;;  %v1136_v14 = vld [vmem:[%s1407_s1 + $0x138] sm:$0xff]   ;;  %v17_v16 = vld [vmem:[%s1408_s0 + $0x10] sm:$0xff] }
  0x1a   :  { %1002 = vmatprep.subr.bf16.mxu1 %v1099_v25  ;;  %v1137_v15 = vld [vmem:[%s1407_s1 + $0x1b8] sm:$0xff]   ;;  %v21_v17 = vld [vmem:[%s1408_s0 + $0x30] sm:$0xff] }
  0x1b   :  { %v18_v18 = vld [vmem:[%s1408_s0 + $0x18] sm:$0xff]  ;;  %v867_v20 = vcombine.low %v17_v16, %v21_v17  ;;  %v868_v21 = vcombine.high %v17_v16, %v21_v17  ;;  %v25_v24 = vld [vmem:[%s1408_s0 + $0x50] sm:$0xff] }
  0x1c   :  { %975 = vmatpush3.bf16.msra.mxu0 %v1100_v26  ;;  %v22_v19 = vld [vmem:[%s1408_s0 + $0x38] sm:$0xff]  ;;  %v29_v25 = vld [vmem:[%s1408_s0 + $0x70] sm:$0xff] }
  0x1d   :  { %1003 = vmatpush3.bf16.msra.mxu1 %v1101_v27  ;;  %976 = vmatprep.subr.bf16.mxu0 %v1102_v28  ;;  %v869_v22 = vcombine.low %v18_v18, %v22_v19  ;;  %v870_v23 = vcombine.high %v18_v18, %v22_v19  ;;  %v26_v26 = vld [vmem:[%s1408_s0 + $0x58] sm:$0xff]  ;;  %v876_v27 = vcombine.high %v25_v24, %v29_v25 }
  0x1e   :  { %1004 = vmatprep.subr.bf16.mxu1 %v1103_v29  ;;  %v30_v28 = vld [vmem:[%s1408_s0 + $0x78] sm:$0xff] }
  0x1f   :  { %v878_v29 = vcombine.high %v26_v26, %v30_v28 }
  0x20   :  { %977 = vmatpush3.bf16.msra.mxu0 %v1104_v30  ;;  %v875_v30 = vcombine.low %v25_v24, %v29_v25 }
  0x21   :  { %1005 = vmatpush3.bf16.msra.mxu1 %v1105_v31  ;;  %1018 = vmatprep.subr.bf16.mxu0 %v1106_v40  ;;  %v877_v31 = vcombine.low %v26_v26, %v30_v28 }
  0x22   :  { %1046 = vmatprep.subr.bf16.mxu1 %v1107_v41 }
  0x23   :  { %663 = vmatmul.mubr.bf16.vlgmr.msra.gmra.mrb[0].mxu0 %v863_v35 }
  0x24   :  { %712 = vmatmul.mubr.bf16.vlgmr.msra.gmra.mrb[0].mxu1 %v865_v38  ;;  %1019 = vmatpush3.bf16.msra.mxu0 %v1108_v42 }
  0x25   :  { %1047 = vmatpush3.bf16.msra.mxu1 %v1109_v43  ;;  %1020 = vmatprep.subr.bf16.mxu0 %v1110_v44 }
  0x26   :  { %1048 = vmatprep.subr.bf16.mxu1 %v1111_v45  ;;  %670 = vmatprep.mubr.bf16.mxu0 %v872_v62 }
  0x27   :  { %719 = vmatprep.mubr.bf16.mxu1 %v874_v6 }
  0x28   :  { %1021 = vmatpush3.bf16.msra.mxu0 %v1112_v46 }
  0x29   :  { %1049 = vmatpush3.bf16.msra.mxu1 %v1113_v47  ;;  %1022 = vmatprep.subr.bf16.mxu0 %v1114_v48 }
  0x2a   :  { %1050 = vmatprep.subr.bf16.mxu1 %v1115_v49 }
  0x2b   :  { %671 = vmatmul.mubr.bf16.gmra.mrb[4].mxu0 %v871_v0 }
  0x2c   :  { %1023 = vmatpush3.bf16.msra.mxu0 %v1116_v50  ;;  %720 = vmatmul.mubr.bf16.gmra.mrb[4].mxu1 %v873_v7 }
  0x2d   :  { %1051 = vmatpush3.bf16.msra.mxu1 %v1117_v51  ;;  %1024 = vmatprep.subr.bf16.mxu0 %v1118_v52 }
  0x2e   :  { %1052 = vmatprep.subr.bf16.mxu1 %v1119_v53  ;;  %760 = vmatprep.mubr.bf16.mxu0 %v868_v21 }
  0x2f   :  { %809 = vmatprep.mubr.bf16.mxu1 %v870_v23 }
  0x30   :  { %1025 = vmatpush3.bf16.msra.mxu0 %v1120_v54 }
  0x31   :  { %1053 = vmatpush3.bf16.msra.mxu1 %v1121_v55  ;;  %1026 = vmatprep.subr.bf16.mxu0 %v1122_v56 }
  0x32   :  { %1054 = vmatprep.subr.bf16.mxu1 %v1123_v57 }
  0x34   :  { %1027 = vmatpush3.bf16.msra.mxu0 %v1124_v58 }
  0x35   :  { %1055 = vmatpush3.bf16.msra.mxu1 %v1125_v59  ;;  %1028 = vmatprep.subr.bf16.mxu0 %v1126_v63 }
  0x36   :  { %1056 = vmatprep.subr.bf16.mxu1 %v1127_v1 }
  0x38   :  { %1029 = vmatpush3.bf16.msra.mxu0 %v1128_v2 }
  0x39   :  { %1057 = vmatpush3.bf16.msra.mxu1 %v1129_v3  ;;  %1030 = vmatprep.subr.bf16.mxu0 %v1130_v8 }
  0x3a   :  { %1058 = vmatprep.subr.bf16.mxu1 %v1131_v9 }
  0x3c   :  { %1031 = vmatpush3.bf16.msra.mxu0 %v1132_v10 }
  0x3d   :  { %1059 = vmatpush3.bf16.msra.mxu1 %v1133_v11  ;;  %1032 = vmatprep.subr.bf16.mxu0 %v1134_v12 }
  0x3e   :  { %1060 = vmatprep.subr.bf16.mxu1 %v1135_v13 }
  0x40   :  { %1033 = vmatpush3.bf16.msra.mxu0 %v1136_v14 }
  0x41   :  { %1061 = vmatpush3.bf16.msra.mxu1 %v1137_v15 }
  0x43   :  { %761 = vmatmul.mubr.bf16.vlgmr.msra.gmra.mrb[8].mxu0 %v867_v20 }
  0x44   :  { %810 = vmatmul.mubr.bf16.vlgmr.msra.gmra.mrb[8].mxu1 %v869_v22  ;;  %768 = vmatprep.mubr.bf16.mxu0 %v876_v27 }
  0x45   :  { %817 = vmatprep.mubr.bf16.mxu1 %v878_v29 }
  0x4b   :  { %769 = vmatmul.mubr.bf16.gmra.mrb[12].mxu0 %v875_v30 }
  0x4c   :  { %818 = vmatmul.mubr.bf16.gmra.mrb[12].mxu1 %v877_v31 }
  0xf6   :  { %v978_v32 = vpop.f32.mrb[0].mxu0 }
  0xf7   :  { %v1006_v33 = vpop.f32.mrb[0].mxu1  ;;  %v979_v35 = vpop.f32.mrb[1].mxu0 }
  0xf8   :  { %v980_v36 = vadd.f32 %v979_v35, %v978_v32  ;;  %v1007_v37 = vpop.f32.mrb[1].mxu1  ;;  %v981_v38 = vpop.f32.mrb[2].mxu0 }
  0xf9   :  { %v1008_v39 = vadd.f32 %v1007_v37, %v1006_v33  ;;  %v1009_v40 = vpop.f32.mrb[2].mxu1  ;;  %v982_v41 = vpop.f32.mrb[3].mxu0 }
  0xfa   :  { %v665_v42 = vadd.f32 %v980_v36, %v862_v34  ;;  %v983_v43 = vadd.f32 %v982_v41, %v981_v38  ;;  %v1010_v44 = vpop.f32.mrb[3].mxu1 }
  0xfb   :  { %v1011_v45 = vadd.f32 %v1010_v44, %v1009_v40 }
  0xfc   :  { %v714_v46 = vadd.f32 %v1008_v39, %v665_v42  ;;  %v668_v47 = vadd.f32 %v983_v43, %v862_v34 }
  0xfe   :  { %v717_v48 = vadd.f32 %v1011_v45, %v668_v47  ;;  %v984_v49 = vpop.f32.mrb[4].mxu0 }
  0xff   :  { %v985_v50 = vpop.f32.mrb[5].mxu0  ;;  %v1012_v56 = vpop.f32.mrb[4].mxu1 }
 0x100   :  { %v986_v51 = vadd.f32 %v985_v50, %v984_v49  ;;  %v987_v52 = vpop.f32.mrb[6].mxu0  ;;  %v1013_v57 = vpop.f32.mrb[5].mxu1 }
 0x101   :  { %v988_v53 = vpop.f32.mrb[7].mxu0  ;;  %v1014_v59 = vadd.f32 %v1013_v57, %v1012_v56  ;;  %v1015_v60 = vpop.f32.mrb[6].mxu1 }
 0x102   :  { %v989_v54 = vadd.f32 %v988_v53, %v987_v52  ;;  %v673_v55 = vadd.f32 %v986_v51, %v862_v34  ;;  %v1016_v61 = vpop.f32.mrb[7].mxu1 }
 0x103   :  { %v1017_v63 = vadd.f32 %v1016_v61, %v1015_v60 }
 0x104   :  { %v676_v58 = vadd.f32 %v989_v54, %v862_v34  ;;  %v722_v62 = vadd.f32 %v1014_v59, %v673_v55 }
 0x106   :  { %v725_v0 = vadd.f32 %v1017_v63, %v676_v58 }
 0x116   :  { %v1034_v1 = vpop.f32.mrb[8].mxu0 }
 0x117   :  { %v1062_v2 = vpop.f32.mrb[8].mxu1  ;;  %v1035_v3 = vpop.f32.mrb[9].mxu0 }
 0x118   :  { %v1063_v4 = vpop.f32.mrb[9].mxu1  ;;  %v1036_v5 = vadd.f32 %v1035_v3, %v1034_v1  ;;  %v1037_v7 = vpop.f32.mrb[10].mxu0 }
 0x119   :  { %v1064_v6 = vadd.f32 %v1063_v4, %v1062_v2  ;;  %v1065_v8 = vpop.f32.mrb[10].mxu1  ;;  %v1038_v9 = vpop.f32.mrb[11].mxu0 }
 0x11a   :  { %v1066_v10 = vpop.f32.mrb[11].mxu1  ;;  %v763_v11 = vadd.f32 %v1036_v5, %v714_v46  ;;  %v1039_v12 = vadd.f32 %v1038_v9, %v1037_v7 }
 0x11b   :  { %v1067_v13 = vadd.f32 %v1066_v10, %v1065_v8 }
 0x11c   :  { %v812_v14 = vadd.f32 %v1064_v6, %v763_v11  ;;  %v766_v15 = vadd.f32 %v1039_v12, %v717_v48 }
 0x11e   :  { %vm826_vm0 = vcmp.ge.f32.partialorder %v812_v14, 0.0  ;;  %v830_v16 = vmul.f32 0.2, %v812_v14  ;;  %v815_v17 = vadd.f32 %v1067_v13, %v766_v15  ;;  %v1040_v18 = vpop.f32.mrb[12].mxu0 }
 0x11f   :  { %v1068_v19 = vpop.f32.mrb[12].mxu1  ;;  %v1041_v20 = vpop.f32.mrb[13].mxu0 }
 0x120   :  { %v1069_v21 = vpop.f32.mrb[13].mxu1  ;;  %vm827_vm1 = vcmp.ge.f32.partialorder %v815_v17, 0.0  ;;  %v831_v22 = vmul.f32 0.2, %v815_v17  ;;  %v1042_v23 = vadd.f32 %v1041_v20, %v1040_v18  ;;  %v1043_v24 = vpop.f32.mrb[14].mxu0  ;;  %v834_v26 = vsel %vm826_vm0, %v812_v14, %v830_v16 }
 0x121   :  { %v1071_v25 = vpop.f32.mrb[14].mxu1  ;;  %v1070_v27 = vadd.f32 %v1069_v21, %v1068_v19  ;;  %v1044_v28 = vpop.f32.mrb[15].mxu0 }
 0x122   :  { %v1072_v29 = vpop.f32.mrb[15].mxu1  ;;  %v835_v30 = vsel %vm827_vm1, %v815_v17, %v831_v22  ;;  %v771_v31 = vadd.f32 %v1042_v23, %v722_v62  ;;  %v1045_v32 = vadd.f32 %v1044_v28, %v1043_v24 }
 0x123   :  { %v1073_v33 = vadd.f32 %v1072_v29, %v1071_v25  ;;  %v954_v34 = vpack.c.bf16 %v835_v30, %v834_v26 }
 0x124   :  { %v820_v35 = vadd.f32 %v1070_v27, %v771_v31  ;;  %v774_v36 = vadd.f32 %v1045_v32, %v725_v0 }
 0x125   :  { %955 = vst [vmem:[%s1410_s3] sm:$0xff] %v954_v34  }
 0x126   :  { %v832_v37 = vmul.f32 0.2, %v820_v35  ;;  %v823_v38 = vadd.f32 %v1073_v33, %v774_v36  ;;  %vm828_vm2 = vcmp.ge.f32.partialorder %v820_v35, 0.0 }
 0x128   :  { %vm829_vm3 = vcmp.ge.f32.partialorder %v823_v38, 0.0  ;;  %v833_v39 = vmul.f32 0.2, %v823_v38  ;;  %v836_v40 = vsel %vm828_vm2, %v820_v35, %v832_v37 }
 0x12a   :  { %v837_v41 = vsel %vm829_vm3, %v823_v38, %v833_v39 }
 0x12b   :  { %v959_v42 = vpack.c.bf16 %v837_v41, %v836_v40 }
 0x12d   :  { %961 = vst [vmem:[%s1410_s3 + $0x8] sm:$0xff] %v959_v42  }

// kernel: sp_fc_discriminator_forward.8
= control target key start
LH: loop header
LB: loop body
LE: loop exit
PB: predicated region body
PF: predicated region fallthrough
CT: control target
= control target key end

     0   :  { %s3529_s1 = inlined_call_operand.vmem [shape: bf16[2048,256], index: 1, kind: input, shape index: {}]   ;;  %s3530_s0 = inlined_call_operand.vmem [shape: bf16[8,2048], index: 0, kind: input, shape index: {}]   ;;  %s3531_s2 = inlined_call_operand.vmem [shape: f32[1,256], index: 2, kind: input, shape index: {}]   ;;  %s3532_s3 = inlined_call_operand.vmem [shape: bf16[8,256], index: 3, kind: output, shape index: {}]  }
   0x1   :  { %v2275_v0 = vld [vmem:[%s3529_s1 + $0x4] ss:$8 sps:$4 sm:$0xff]   ;;  %v2279_v2 = vld [vmem:[%s3529_s1] ss:$8 sps:$4 sm:$0xff]   ;;  %v2281_v4 = vld [vmem:[%s3529_s1 + $0x14] ss:$8 sps:$4 sm:$0xff]  }
   0x2   :  { %v2277_v1 = vld [vmem:[%s3529_s1 + $0x404] ss:$8 sps:$4 sm:$0xff]   ;;  %1626 = vmatprep.subr.bf16.mxu1 %v2275_v0  ;;  %v2280_v3 = vld [vmem:[%s3529_s1 + $0x400] ss:$8 sps:$4 sm:$0xff]   ;;  %v2283_v5 = vld [vmem:[%s3529_s1 + $0x414] ss:$8 sps:$4 sm:$0xff]  }
   0x3   :  { %1790 = vmatprep.subr.bf16.mxu0 %v2277_v1  ;;  %1627 = vmatpush1.bf16.msra.mxu1 %v2279_v2  ;;  %v2285_v6 = vld [vmem:[%s3529_s1 + $0x10] ss:$8 sps:$4 sm:$0xff]   ;;  %v2287_v8 = vld [vmem:[%s3529_s1 + $0x24] ss:$8 sps:$4 sm:$0xff]   ;;  %v2291_v10 = vld [vmem:[%s3529_s1 + $0x20] ss:$8 sps:$4 sm:$0xff]  }
   0x4   :  { %1791 = vmatpush1.bf16.msra.mxu0 %v2280_v3  ;;  %1628 = vmatprep.subr.bf16.mxu1 %v2281_v4  ;;  %v2286_v7 = vld [vmem:[%s3529_s1 + $0x410] ss:$8 sps:$4 sm:$0xff]   ;;  %v2289_v9 = vld [vmem:[%s3529_s1 + $0x424] ss:$8 sps:$4 sm:$0xff]   ;;  %v2292_v11 = vld [vmem:[%s3529_s1 + $0x420] ss:$8 sps:$4 sm:$0xff]  }
   0x5   :  { %1792 = vmatprep.subr.bf16.mxu0 %v2283_v5  ;;  %v2293_v12 = vld [vmem:[%s3529_s1 + $0x34] ss:$8 sps:$4 sm:$0xff]   ;;  %v2297_v14 = vld [vmem:[%s3529_s1 + $0x30] ss:$8 sps:$4 sm:$0xff]   ;;  %v2299_v16 = vld [vmem:[%s3529_s1 + $0x44] ss:$8 sps:$4 sm:$0xff]  }
   0x6   :  { %v2295_v13 = vld [vmem:[%s3529_s1 + $0x434] ss:$8 sps:$4 sm:$0xff]   ;;  %v2298_v15 = vld [vmem:[%s3529_s1 + $0x430] ss:$8 sps:$4 sm:$0xff]   ;;  %v2301_v17 = vld [vmem:[%s3529_s1 + $0x444] ss:$8 sps:$4 sm:$0xff]  }
   0x7   :  { %1629 = vmatpush1.bf16.msra.mxu1 %v2285_v6  ;;  %v2303_v18 = vld [vmem:[%s3529_s1 + $0x40] ss:$8 sps:$4 sm:$0xff]   ;;  %v2305_v20 = vld [vmem:[%s3529_s1 + $0x54] ss:$8 sps:$4 sm:$0xff]   ;;  %v2309_v22 = vld [vmem:[%s3529_s1 + $0x50] ss:$8 sps:$4 sm:$0xff]  }
   0x8   :  { %1793 = vmatpush1.bf16.msra.mxu0 %v2286_v7  ;;  %1630 = vmatprep.subr.bf16.mxu1 %v2287_v8  ;;  %v2304_v19 = vld [vmem:[%s3529_s1 + $0x440] ss:$8 sps:$4 sm:$0xff]   ;;  %v2307_v21 = vld [vmem:[%s3529_s1 + $0x454] ss:$8 sps:$4 sm:$0xff]   ;;  %v2310_v23 = vld [vmem:[%s3529_s1 + $0x450] ss:$8 sps:$4 sm:$0xff]  }
   0x9   :  { %1794 = vmatprep.subr.bf16.mxu0 %v2289_v9  ;;  %v2311_v24 = vld [vmem:[%s3529_s1 + $0x64] ss:$8 sps:$4 sm:$0xff]   ;;  %v2315_v26 = vld [vmem:[%s3529_s1 + $0x60] ss:$8 sps:$4 sm:$0xff]   ;;  %v2317_v28 = vld [vmem:[%s3529_s1 + $0x74] ss:$8 sps:$4 sm:$0xff]  }
   0xa   :  { %v2313_v25 = vld [vmem:[%s3529_s1 + $0x464] ss:$8 sps:$4 sm:$0xff]   ;;  %v2316_v27 = vld [vmem:[%s3529_s1 + $0x460] ss:$8 sps:$4 sm:$0xff]   ;;  %v2319_v29 = vld [vmem:[%s3529_s1 + $0x474] ss:$8 sps:$4 sm:$0xff]  }
   0xb   :  { %1631 = vmatpush1.bf16.msra.mxu1 %v2291_v10  ;;  %v2321_v30 = vld [vmem:[%s3529_s1 + $0x70] ss:$8 sps:$4 sm:$0xff]   ;;  %v2323_v32 = vld [vmem:[%s3529_s1 + $0x84] ss:$8 sps:$4 sm:$0xff]   ;;  %v2327_v34 = vld [vmem:[%s3529_s1 + $0x80] ss:$8 sps:$4 sm:$0xff]  }
   0xc   :  { %1795 = vmatpush1.bf16.msra.mxu0 %v2292_v11  ;;  %1632 = vmatprep.subr.bf16.mxu1 %v2293_v12  ;;  %v2322_v31 = vld [vmem:[%s3529_s1 + $0x470] ss:$8 sps:$4 sm:$0xff]   ;;  %v2325_v33 = vld [vmem:[%s3529_s1 + $0x484] ss:$8 sps:$4 sm:$0xff]   ;;  %v2328_v35 = vld [vmem:[%s3529_s1 + $0x480] ss:$8 sps:$4 sm:$0xff]  }
   0xd   :  { %1796 = vmatprep.subr.bf16.mxu0 %v2295_v13  ;;  %v2329_v36 = vld [vmem:[%s3529_s1 + $0x94] ss:$8 sps:$4 sm:$0xff]   ;;  %v2333_v38 = vld [vmem:[%s3529_s1 + $0x90] ss:$8 sps:$4 sm:$0xff]   ;;  %v2335_v40 = vld [vmem:[%s3529_s1 + $0xa4] ss:$8 sps:$4 sm:$0xff]  }
   0xe   :  { %v2331_v37 = vld [vmem:[%s3529_s1 + $0x494] ss:$8 sps:$4 sm:$0xff]   ;;  %v2334_v39 = vld [vmem:[%s3529_s1 + $0x490] ss:$8 sps:$4 sm:$0xff]   ;;  %v2337_v41 = vld [vmem:[%s3529_s1 + $0x4a4] ss:$8 sps:$4 sm:$0xff]  }
   0xf   :  { %1633 = vmatpush1.bf16.msra.mxu1 %v2297_v14  ;;  %v2339_v42 = vld [vmem:[%s3529_s1 + $0xa0] ss:$8 sps:$4 sm:$0xff]   ;;  %v2341_v44 = vld [vmem:[%s3529_s1 + $0xb4] ss:$8 sps:$4 sm:$0xff]   ;;  %v2345_v47 = vld [vmem:[%s3529_s1 + $0xb0] ss:$8 sps:$4 sm:$0xff]  }
  0x10   :  { %1797 = vmatpush1.bf16.msra.mxu0 %v2298_v15  ;;  %1634 = vmatprep.subr.bf16.mxu1 %v2299_v16  ;;  %v2340_v43 = vld [vmem:[%s3529_s1 + $0x4a0] ss:$8 sps:$4 sm:$0xff]   ;;  %v2343_v45 = vld [vmem:[%s3529_s1 + $0x4b4] ss:$8 sps:$4 sm:$0xff]   ;;  %v2346_v49 = vld [vmem:[%s3529_s1 + $0x4b0] ss:$8 sps:$4 sm:$0xff]  }
  0x11   :  { %1798 = vmatprep.subr.bf16.mxu0 %v2301_v17  ;;  %v14_v46 = vld [vmem:[%s3530_s0] sm:$0xff]  ;;  %v2353_v56 = vld [vmem:[%s3529_s1 + $0xd4] ss:$8 sps:$4 sm:$0xff]   ;;  %v2357_v58 = vld [vmem:[%s3529_s1 + $0xd0] ss:$8 sps:$4 sm:$0xff]  }
  0x12   :  { %v1974_v48 = vcombine.high %v14_v46, %v14_v46  ;;  %v18_v50 = vld [vmem:[%s3530_s0 + $0x20] sm:$0xff]  ;;  %v2355_v57 = vld [vmem:[%s3529_s1 + $0x4d4] ss:$8 sps:$4 sm:$0xff]   ;;  %v2358_v59 = vld [vmem:[%s3529_s1 + $0x4d0] ss:$8 sps:$4 sm:$0xff]   ;;  %v1973_v6 = vcombine.low %v14_v46, %v14_v46 }
  0x13   :  { %1635 = vmatpush1.bf16.msra.mxu1 %v2303_v18  ;;  %v2347_v51 = vld [vmem:[%s3529_s1 + $0xc4] ss:$8 sps:$4 sm:$0xff]   ;;  %v1982_v53 = vcombine.high %v18_v50, %v18_v50  ;;  %v2351_v54 = vld [vmem:[%s3529_s1 + $0xc0] ss:$8 sps:$4 sm:$0xff]   ;;  %v2365_v0 = vld [vmem:[%s3529_s1 + $0xf4] ss:$8 sps:$4 sm:$0xff]   ;;  %v1981_v7 = vcombine.low %v18_v50, %v18_v50 }
  0x14   :  { %1799 = vmatpush1.bf16.msra.mxu0 %v2304_v19  ;;  %1636 = vmatprep.subr.bf16.mxu1 %v2305_v20  ;;  %v2349_v52 = vld [vmem:[%s3529_s1 + $0x4c4] ss:$8 sps:$4 sm:$0xff]   ;;  %v2352_v55 = vld [vmem:[%s3529_s1 + $0x4c0] ss:$8 sps:$4 sm:$0xff]   ;;  %v2367_v1 = vld [vmem:[%s3529_s1 + $0x4f4] ss:$8 sps:$4 sm:$0xff]  }
  0x15   :  { %1800 = vmatprep.subr.bf16.mxu0 %v2307_v21  ;;  %1658 = vmatprep.mubr.bf16.mxu1 %v1974_v48  ;;  %v2359_v60 = vld [vmem:[%s3529_s1 + $0xe4] ss:$8 sps:$4 sm:$0xff]   ;;  %v2363_v62 = vld [vmem:[%s3529_s1 + $0xe0] ss:$8 sps:$4 sm:$0xff]   ;;  %v2369_v2 = vld [vmem:[%s3529_s1 + $0xf0] ss:$8 sps:$4 sm:$0xff]  }
  0x16   :  { %1822 = vmatprep.mubr.bf16.mxu0 %v1982_v53  ;;  %v2361_v61 = vld [vmem:[%s3529_s1 + $0x4e4] ss:$8 sps:$4 sm:$0xff]   ;;  %v2364_v63 = vld [vmem:[%s3529_s1 + $0x4e0] ss:$8 sps:$4 sm:$0xff]   ;;  %v2370_v3 = vld [vmem:[%s3529_s1 + $0x4f0] ss:$8 sps:$4 sm:$0xff]  }
  0x17   :  { %1637 = vmatpush1.bf16.msra.mxu1 %v2309_v22  ;;  %v2375_v4 = vld [vmem:[%s3529_s1 + $0x104] ss:$8 sps:$4 sm:$0xff]   ;;  %v2373_v8 = vld [vmem:[%s3529_s1 + $0x100] ss:$8 sps:$4 sm:$0xff]   ;;  %v2383_v10 = vld [vmem:[%s3529_s1 + $0x114] ss:$8 sps:$4 sm:$0xff]  }
  0x18   :  { %1801 = vmatpush1.bf16.msra.mxu0 %v2310_v23  ;;  %1638 = vmatprep.subr.bf16.mxu1 %v2311_v24  ;;  %v2380_v5 = vld [vmem:[%s3529_s1 + $0x504] ss:$8 sps:$4 sm:$0xff]   ;;  %v2378_v9 = vld [vmem:[%s3529_s1 + $0x500] ss:$8 sps:$4 sm:$0xff]   ;;  %v2386_v11 = vld [vmem:[%s3529_s1 + $0x514] ss:$8 sps:$4 sm:$0xff]  }
  0x19   :  { %1802 = vmatprep.subr.bf16.mxu0 %v2313_v25  ;;  %v2381_v12 = vld [vmem:[%s3529_s1 + $0x110] ss:$8 sps:$4 sm:$0xff]   ;;  %v2389_v14 = vld [vmem:[%s3529_s1 + $0x124] ss:$8 sps:$4 sm:$0xff]   ;;  %v2387_v16 = vld [vmem:[%s3529_s1 + $0x120] ss:$8 sps:$4 sm:$0xff]  }
  0x1a   :  { %v2384_v13 = vld [vmem:[%s3529_s1 + $0x510] ss:$8 sps:$4 sm:$0xff]   ;;  %v2392_v15 = vld [vmem:[%s3529_s1 + $0x524] ss:$8 sps:$4 sm:$0xff]   ;;  %v2390_v17 = vld [vmem:[%s3529_s1 + $0x520] ss:$8 sps:$4 sm:$0xff]  }
  0x1b   :  { %1639 = vmatpush1.bf16.msra.mxu1 %v2315_v26  ;;  %v2395_v18 = vld [vmem:[%s3529_s1 + $0x134] ss:$8 sps:$4 sm:$0xff]   ;;  %v2393_v20 = vld [vmem:[%s3529_s1 + $0x130] ss:$8 sps:$4 sm:$0xff]   ;;  %v2401_v22 = vld [vmem:[%s3529_s1 + $0x144] ss:$8 sps:$4 sm:$0xff]  }
  0x1c   :  { %1803 = vmatpush1.bf16.msra.mxu0 %v2316_v27  ;;  %1640 = vmatprep.subr.bf16.mxu1 %v2317_v28  ;;  %v2398_v19 = vld [vmem:[%s3529_s1 + $0x534] ss:$8 sps:$4 sm:$0xff]   ;;  %v2396_v21 = vld [vmem:[%s3529_s1 + $0x530] ss:$8 sps:$4 sm:$0xff]   ;;  %v2404_v23 = vld [vmem:[%s3529_s1 + $0x544] ss:$8 sps:$4 sm:$0xff]  }
  0x1d   :  { %1804 = vmatprep.subr.bf16.mxu0 %v2319_v29  ;;  %v2399_v24 = vld [vmem:[%s3529_s1 + $0x140] ss:$8 sps:$4 sm:$0xff]   ;;  %v2407_v26 = vld [vmem:[%s3529_s1 + $0x154] ss:$8 sps:$4 sm:$0xff]   ;;  %v2405_v28 = vld [vmem:[%s3529_s1 + $0x150] ss:$8 sps:$4 sm:$0xff]  }
  0x1e   :  { %v2402_v25 = vld [vmem:[%s3529_s1 + $0x540] ss:$8 sps:$4 sm:$0xff]   ;;  %v2410_v27 = vld [vmem:[%s3529_s1 + $0x554] ss:$8 sps:$4 sm:$0xff]   ;;  %v2408_v29 = vld [vmem:[%s3529_s1 + $0x550] ss:$8 sps:$4 sm:$0xff]  }
  0x1f   :  { %1641 = vmatpush1.bf16.msra.mxu1 %v2321_v30  ;;  %v2413_v30 = vld [vmem:[%s3529_s1 + $0x164] ss:$8 sps:$4 sm:$0xff]   ;;  %v2431_v46 = vld [vmem:[%s3529_s1 + $0x194] ss:$8 sps:$4 sm:$0xff]   ;;  %v2429_v48 = vld [vmem:[%s3529_s1 + $0x190] ss:$8 sps:$4 sm:$0xff]  }
  0x20   :  { %1805 = vmatpush1.bf16.msra.mxu0 %v2322_v31  ;;  %1642 = vmatprep.subr.bf16.mxu1 %v2323_v32  ;;  %v2416_v31 = vld [vmem:[%s3529_s1 + $0x564] ss:$8 sps:$4 sm:$0xff]   ;;  %v2438_v53 = vld [vmem:[%s3529_s1 + $0x5a0] ss:$8 sps:$4 sm:$0xff]  }
  0x21   :  { %1806 = vmatprep.subr.bf16.mxu0 %v2325_v33  ;;  %v2974_v32 = vld [vmem:[%s3530_s0 + $0x8] sm:$0xff] }
  0x22   :  { %v2411_v33 = vld [vmem:[%s3529_s1 + $0x160] ss:$8 sps:$4 sm:$0xff]   ;;  %v2437_v50 = vld [vmem:[%s3529_s1 + $0x1a4] ss:$8 sps:$4 sm:$0xff]  }
  0x23   :  { %1643 = vmatpush1.bf16.msra.mxu1 %v2327_v34  ;;  %v2414_v34 = vld [vmem:[%s3529_s1 + $0x560] ss:$8 sps:$4 sm:$0xff]  }
  0x24   :  { %1807 = vmatpush1.bf16.msra.mxu0 %v2328_v35  ;;  %1644 = vmatprep.subr.bf16.mxu1 %v2329_v36  ;;  %v1976_v35 = vcombine.high %v2974_v32, %v2974_v32  ;;  %v2987_v36 = vld [vmem:[%s3530_s0 + $0x28] sm:$0xff] }
  0x25   :  { %1808 = vmatprep.subr.bf16.mxu0 %v2331_v37  ;;  %v2419_v37 = vld [vmem:[%s3529_s1 + $0x174] ss:$8 sps:$4 sm:$0xff]  }
  0x27   :  { %1645 = vmatpush1.bf16.msra.mxu1 %v2333_v38  ;;  %v1984_v38 = vcombine.high %v2987_v36, %v2987_v36 }
  0x28   :  { %1809 = vmatpush1.bf16.msra.mxu0 %v2334_v39  ;;  %1646 = vmatprep.subr.bf16.mxu1 %v2335_v40  ;;  %v2422_v39 = vld [vmem:[%s3529_s1 + $0x574] ss:$8 sps:$4 sm:$0xff]   ;;  %v2417_v40 = vld [vmem:[%s3529_s1 + $0x170] ss:$8 sps:$4 sm:$0xff]  }
  0x29   :  { %1810 = vmatprep.subr.bf16.mxu0 %v2337_v41  ;;  %v2420_v41 = vld [vmem:[%s3529_s1 + $0x570] ss:$8 sps:$4 sm:$0xff]  }
  0x2b   :  { %1647 = vmatpush1.bf16.msra.mxu1 %v2339_v42  ;;  %v2425_v42 = vld [vmem:[%s3529_s1 + $0x184] ss:$8 sps:$4 sm:$0xff]  }
  0x2c   :  { %1811 = vmatpush1.bf16.msra.mxu0 %v2340_v43  ;;  %1648 = vmatprep.subr.bf16.mxu1 %v2341_v44  ;;  %v2428_v43 = vld [vmem:[%s3529_s1 + $0x584] ss:$8 sps:$4 sm:$0xff]   ;;  %v2423_v44 = vld [vmem:[%s3529_s1 + $0x180] ss:$8 sps:$4 sm:$0xff]  }
  0x2d   :  { %1812 = vmatprep.subr.bf16.mxu0 %v2343_v45  ;;  %v2426_v45 = vld [vmem:[%s3529_s1 + $0x580] ss:$8 sps:$4 sm:$0xff]  }
  0x2f   :  { %1649 = vmatpush1.bf16.msra.mxu1 %v2345_v47  ;;  %v2434_v47 = vld [vmem:[%s3529_s1 + $0x594] ss:$8 sps:$4 sm:$0xff]  }
  0x30   :  { %1813 = vmatpush1.bf16.msra.mxu0 %v2346_v49  ;;  %1650 = vmatprep.subr.bf16.mxu1 %v2347_v51  ;;  %v2432_v49 = vld [vmem:[%s3529_s1 + $0x590] ss:$8 sps:$4 sm:$0xff]   ;;  %v2440_v51 = vld [vmem:[%s3529_s1 + $0x5a4] ss:$8 sps:$4 sm:$0xff]  }
  0x31   :  { %1814 = vmatprep.subr.bf16.mxu0 %v2349_v52  ;;  %v2435_v52 = vld [vmem:[%s3529_s1 + $0x1a0] ss:$8 sps:$4 sm:$0xff]  }
  0x33   :  { %1651 = vmatpush1.bf16.msra.mxu1 %v2351_v54  ;;  %v2443_v54 = vld [vmem:[%s3529_s1 + $0x1b4] ss:$8 sps:$4 sm:$0xff]  }
  0x34   :  { %1815 = vmatpush1.bf16.msra.mxu0 %v2352_v55  ;;  %1652 = vmatprep.subr.bf16.mxu1 %v2353_v56  ;;  %v2446_v55 = vld [vmem:[%s3529_s1 + $0x5b4] ss:$8 sps:$4 sm:$0xff]   ;;  %v2441_v56 = vld [vmem:[%s3529_s1 + $0x1b0] ss:$8 sps:$4 sm:$0xff]  }
  0x35   :  { %1816 = vmatprep.subr.bf16.mxu0 %v2355_v57  ;;  %v2444_v57 = vld [vmem:[%s3529_s1 + $0x5b0] ss:$8 sps:$4 sm:$0xff]  }
  0x37   :  { %1653 = vmatpush1.bf16.msra.mxu1 %v2357_v58  ;;  %v2449_v58 = vld [vmem:[%s3529_s1 + $0x1c4] ss:$8 sps:$4 sm:$0xff]  }
  0x38   :  { %1817 = vmatpush1.bf16.msra.mxu0 %v2358_v59  ;;  %1654 = vmatprep.subr.bf16.mxu1 %v2359_v60  ;;  %v2452_v59 = vld [vmem:[%s3529_s1 + $0x5c4] ss:$8 sps:$4 sm:$0xff]   ;;  %v2447_v60 = vld [vmem:[%s3529_s1 + $0x1c0] ss:$8 sps:$4 sm:$0xff]  }
  0x39   :  { %1818 = vmatprep.subr.bf16.mxu0 %v2361_v61  ;;  %v2450_v61 = vld [vmem:[%s3529_s1 + $0x5c0] ss:$8 sps:$4 sm:$0xff]  }
  0x3b   :  { %1655 = vmatpush1.bf16.msra.mxu1 %v2363_v62  ;;  %v2455_v62 = vld [vmem:[%s3529_s1 + $0x1d4] ss:$8 sps:$4 sm:$0xff]  }
  0x3c   :  { %1819 = vmatpush1.bf16.msra.mxu0 %v2364_v63  ;;  %1656 = vmatprep.subr.bf16.mxu1 %v2365_v0  ;;  %v2458_v63 = vld [vmem:[%s3529_s1 + $0x5d4] ss:$8 sps:$4 sm:$0xff]   ;;  %v2453_v0 = vld [vmem:[%s3529_s1 + $0x1d0] ss:$8 sps:$4 sm:$0xff]  }
  0x3d   :  { %1820 = vmatprep.subr.bf16.mxu0 %v2367_v1  ;;  %v2456_v1 = vld [vmem:[%s3529_s1 + $0x5d0] ss:$8 sps:$4 sm:$0xff]  }
  0x3f   :  { %1657 = vmatpush1.bf16.msra.mxu1 %v2369_v2  ;;  %v2461_v2 = vld [vmem:[%s3529_s1 + $0x1e4] ss:$8 sps:$4 sm:$0xff]  }
  0x40   :  { %1821 = vmatpush1.bf16.msra.mxu0 %v2370_v3  ;;  %1667 = vmatprep.subr.bf16.mxu1 %v2375_v4  ;;  %v2464_v3 = vld [vmem:[%s3529_s1 + $0x5e4] ss:$8 sps:$4 sm:$0xff]   ;;  %v2459_v4 = vld [vmem:[%s3529_s1 + $0x1e0] ss:$8 sps:$4 sm:$0xff]  }
  0x41   :  { %1831 = vmatprep.subr.bf16.mxu0 %v2380_v5  ;;  %v2462_v5 = vld [vmem:[%s3529_s1 + $0x5e0] ss:$8 sps:$4 sm:$0xff]  }
  0x42   :  { %1659 = vmatmul.mubr.bf16.vlgmr.msra.gmra.mrb[0].mxu1 %v1973_v6  ;;  %v2467_v6 = vld [vmem:[%s3529_s1 + $0x1f4] ss:$8 sps:$4 sm:$0xff]  }
  0x43   :  { %1823 = vmatmul.mubr.bf16.vlgmr.msra.gmra.mrb[0].mxu0 %v1981_v7  ;;  %1668 = vmatpush1.bf16.msra.mxu1 %v2373_v8  ;;  %v2470_v7 = vld [vmem:[%s3529_s1 + $0x5f4] ss:$8 sps:$4 sm:$0xff]   ;;  %v2465_v8 = vld [vmem:[%s3529_s1 + $0x1f0] ss:$8 sps:$4 sm:$0xff]  }
  0x44   :  { %1832 = vmatpush1.bf16.msra.mxu0 %v2378_v9  ;;  %1669 = vmatprep.subr.bf16.mxu1 %v2383_v10  ;;  %v2468_v9 = vld [vmem:[%s3529_s1 + $0x5f0] ss:$8 sps:$4 sm:$0xff]   ;;  %v2475_v10 = vld [vmem:[%s3529_s1 + $0x204] ss:$8 sps:$4 sm:$0xff]  }
  0x45   :  { %1833 = vmatprep.subr.bf16.mxu0 %v2386_v11  ;;  %1699 = vmatprep.mubr.bf16.mxu1 %v1976_v35  ;;  %v2480_v11 = vld [vmem:[%s3529_s1 + $0x604] ss:$8 sps:$4 sm:$0xff]   ;;  %v2502_v35 = vld [vmem:[%s3529_s1 + $0x640] ss:$8 sps:$4 sm:$0xff]  }
  0x46   :  { %1863 = vmatprep.mubr.bf16.mxu0 %v1984_v38  ;;  %v2505_v38 = vld [vmem:[%s3529_s1 + $0x250] ss:$8 sps:$4 sm:$0xff]  }
  0x47   :  { %1670 = vmatpush1.bf16.msra.mxu1 %v2381_v12  ;;  %v1975_v12 = vcombine.low %v2974_v32, %v2974_v32  ;;  %v2501_v32 = vld [vmem:[%s3529_s1 + $0x244] ss:$8 sps:$4 sm:$0xff]  }
  0x48   :  { %1834 = vmatpush1.bf16.msra.mxu0 %v2384_v13  ;;  %1671 = vmatprep.subr.bf16.mxu1 %v2389_v14  ;;  %v2473_v13 = vld [vmem:[%s3529_s1 + $0x200] ss:$8 sps:$4 sm:$0xff]   ;;  %v1983_v14 = vcombine.low %v2987_v36, %v2987_v36  ;;  %v2507_v36 = vld [vmem:[%s3529_s1 + $0x254] ss:$8 sps:$4 sm:$0xff]  }
  0x49   :  { %1835 = vmatprep.subr.bf16.mxu0 %v2392_v15  ;;  %v2478_v15 = vld [vmem:[%s3529_s1 + $0x600] ss:$8 sps:$4 sm:$0xff]  }
  0x4b   :  { %1672 = vmatpush1.bf16.msra.mxu1 %v2387_v16  ;;  %v2483_v16 = vld [vmem:[%s3529_s1 + $0x214] ss:$8 sps:$4 sm:$0xff]  }
  0x4c   :  { %1836 = vmatpush1.bf16.msra.mxu0 %v2390_v17  ;;  %1673 = vmatprep.subr.bf16.mxu1 %v2395_v18  ;;  %v2486_v17 = vld [vmem:[%s3529_s1 + $0x614] ss:$8 sps:$4 sm:$0xff]  }
  0x4d   :  { %1837 = vmatprep.subr.bf16.mxu0 %v2398_v19  ;;  %v3124_v18 = vld [vmem:[%s3530_s0 + $0x10] sm:$0xff] }
  0x4e   :  { %v1978_v19 = vcombine.high %v3124_v18, %v3124_v18 }
  0x4f   :  { %1674 = vmatpush1.bf16.msra.mxu1 %v2393_v20  ;;  %v3131_v20 = vld [vmem:[%s3530_s0 + $0x30] sm:$0xff] }
  0x50   :  { %1838 = vmatpush1.bf16.msra.mxu0 %v2396_v21  ;;  %1675 = vmatprep.subr.bf16.mxu1 %v2401_v22  ;;  %v2481_v21 = vld [vmem:[%s3529_s1 + $0x210] ss:$8 sps:$4 sm:$0xff]  }
  0x51   :  { %1839 = vmatprep.subr.bf16.mxu0 %v2404_v23  ;;  %v2484_v22 = vld [vmem:[%s3529_s1 + $0x610] ss:$8 sps:$4 sm:$0xff]   ;;  %v1986_v23 = vcombine.high %v3131_v20, %v3131_v20 }
  0x53   :  { %1676 = vmatpush1.bf16.msra.mxu1 %v2399_v24  ;;  %v2489_v24 = vld [vmem:[%s3529_s1 + $0x224] ss:$8 sps:$4 sm:$0xff]  }
  0x54   :  { %1840 = vmatpush1.bf16.msra.mxu0 %v2402_v25  ;;  %1677 = vmatprep.subr.bf16.mxu1 %v2407_v26  ;;  %v2492_v25 = vld [vmem:[%s3529_s1 + $0x624] ss:$8 sps:$4 sm:$0xff]   ;;  %v2487_v26 = vld [vmem:[%s3529_s1 + $0x220] ss:$8 sps:$4 sm:$0xff]  }
  0x55   :  { %1841 = vmatprep.subr.bf16.mxu0 %v2410_v27  ;;  %v2490_v27 = vld [vmem:[%s3529_s1 + $0x620] ss:$8 sps:$4 sm:$0xff]  }
  0x57   :  { %1678 = vmatpush1.bf16.msra.mxu1 %v2405_v28  ;;  %v2495_v28 = vld [vmem:[%s3529_s1 + $0x234] ss:$8 sps:$4 sm:$0xff]  }
  0x58   :  { %1842 = vmatpush1.bf16.msra.mxu0 %v2408_v29  ;;  %1679 = vmatprep.subr.bf16.mxu1 %v2413_v30  ;;  %v2498_v29 = vld [vmem:[%s3529_s1 + $0x634] ss:$8 sps:$4 sm:$0xff]   ;;  %v2493_v30 = vld [vmem:[%s3529_s1 + $0x230] ss:$8 sps:$4 sm:$0xff]  }
  0x59   :  { %1843 = vmatprep.subr.bf16.mxu0 %v2416_v31  ;;  %v2496_v31 = vld [vmem:[%s3529_s1 + $0x630] ss:$8 sps:$4 sm:$0xff]  }
  0x5b   :  { %1680 = vmatpush1.bf16.msra.mxu1 %v2411_v33  ;;  %v2504_v33 = vld [vmem:[%s3529_s1 + $0x644] ss:$8 sps:$4 sm:$0xff]  }
  0x5c   :  { %1844 = vmatpush1.bf16.msra.mxu0 %v2414_v34  ;;  %1681 = vmatprep.subr.bf16.mxu1 %v2419_v37  ;;  %v2499_v34 = vld [vmem:[%s3529_s1 + $0x240] ss:$8 sps:$4 sm:$0xff]   ;;  %v2510_v37 = vld [vmem:[%s3529_s1 + $0x654] ss:$8 sps:$4 sm:$0xff]  }
  0x5d   :  { %1845 = vmatprep.subr.bf16.mxu0 %v2422_v39  ;;  %v2508_v39 = vld [vmem:[%s3529_s1 + $0x650] ss:$8 sps:$4 sm:$0xff]  }
  0x5f   :  { %1682 = vmatpush1.bf16.msra.mxu1 %v2417_v40  ;;  %v2513_v40 = vld [vmem:[%s3529_s1 + $0x264] ss:$8 sps:$4 sm:$0xff]  }
  0x60   :  { %1846 = vmatpush1.bf16.msra.mxu0 %v2420_v41  ;;  %1683 = vmatprep.subr.bf16.mxu1 %v2425_v42  ;;  %v2516_v41 = vld [vmem:[%s3529_s1 + $0x664] ss:$8 sps:$4 sm:$0xff]   ;;  %v2511_v42 = vld [vmem:[%s3529_s1 + $0x260] ss:$8 sps:$4 sm:$0xff]  }
  0x61   :  { %1847 = vmatprep.subr.bf16.mxu0 %v2428_v43  ;;  %v2514_v43 = vld [vmem:[%s3529_s1 + $0x660] ss:$8 sps:$4 sm:$0xff]  }
  0x63   :  { %1684 = vmatpush1.bf16.msra.mxu1 %v2423_v44  ;;  %v2519_v44 = vld [vmem:[%s3529_s1 + $0x274] ss:$8 sps:$4 sm:$0xff]  }
  0x64   :  { %1848 = vmatpush1.bf16.msra.mxu0 %v2426_v45  ;;  %1685 = vmatprep.subr.bf16.mxu1 %v2431_v46  ;;  %v2522_v45 = vld [vmem:[%s3529_s1 + $0x674] ss:$8 sps:$4 sm:$0xff]   ;;  %v2517_v46 = vld [vmem:[%s3529_s1 + $0x270] ss:$8 sps:$4 sm:$0xff]  }
  0x65   :  { %1849 = vmatprep.subr.bf16.mxu0 %v2434_v47  ;;  %v2520_v47 = vld [vmem:[%s3529_s1 + $0x670] ss:$8 sps:$4 sm:$0xff]  }
  0x67   :  { %1686 = vmatpush1.bf16.msra.mxu1 %v2429_v48  ;;  %v2525_v48 = vld [vmem:[%s3529_s1 + $0x284] ss:$8 sps:$4 sm:$0xff]  }
  0x68   :  { %1850 = vmatpush1.bf16.msra.mxu0 %v2432_v49  ;;  %1687 = vmatprep.subr.bf16.mxu1 %v2437_v50  ;;  %v2528_v49 = vld [vmem:[%s3529_s1 + $0x684] ss:$8 sps:$4 sm:$0xff]   ;;  %v2523_v50 = vld [vmem:[%s3529_s1 + $0x280] ss:$8 sps:$4 sm:$0xff]  }
  0x69   :  { %1851 = vmatprep.subr.bf16.mxu0 %v2440_v51  ;;  %v2526_v51 = vld [vmem:[%s3529_s1 + $0x680] ss:$8 sps:$4 sm:$0xff]  }
  0x6b   :  { %1688 = vmatpush1.bf16.msra.mxu1 %v2435_v52  ;;  %v2531_v52 = vld [vmem:[%s3529_s1 + $0x294] ss:$8 sps:$4 sm:$0xff]  }
  0x6c   :  { %1852 = vmatpush1.bf16.msra.mxu0 %v2438_v53  ;;  %1689 = vmatprep.subr.bf16.mxu1 %v2443_v54  ;;  %v2534_v53 = vld [vmem:[%s3529_s1 + $0x694] ss:$8 sps:$4 sm:$0xff]   ;;  %v2529_v54 = vld [vmem:[%s3529_s1 + $0x290] ss:$8 sps:$4 sm:$0xff]  }
  0x6d   :  { %1853 = vmatprep.subr.bf16.mxu0 %v2446_v55  ;;  %v2532_v55 = vld [vmem:[%s3529_s1 + $0x690] ss:$8 sps:$4 sm:$0xff]  }
  0x6f   :  { %1690 = vmatpush1.bf16.msra.mxu1 %v2441_v56  ;;  %v2537_v56 = vld [vmem:[%s3529_s1 + $0x2a4] ss:$8 sps:$4 sm:$0xff]  }
  0x70   :  { %1854 = vmatpush1.bf16.msra.mxu0 %v2444_v57  ;;  %1691 = vmatprep.subr.bf16.mxu1 %v2449_v58  ;;  %v2540_v57 = vld [vmem:[%s3529_s1 + $0x6a4] ss:$8 sps:$4 sm:$0xff]   ;;  %v2535_v58 = vld [vmem:[%s3529_s1 + $0x2a0] ss:$8 sps:$4 sm:$0xff]  }
  0x71   :  { %1855 = vmatprep.subr.bf16.mxu0 %v2452_v59  ;;  %v2538_v59 = vld [vmem:[%s3529_s1 + $0x6a0] ss:$8 sps:$4 sm:$0xff]  }
  0x73   :  { %1692 = vmatpush1.bf16.msra.mxu1 %v2447_v60  ;;  %v2543_v60 = vld [vmem:[%s3529_s1 + $0x2b4] ss:$8 sps:$4 sm:$0xff]  }
  0x74   :  { %1856 = vmatpush1.bf16.msra.mxu0 %v2450_v61  ;;  %1693 = vmatprep.subr.bf16.mxu1 %v2455_v62  ;;  %v2546_v61 = vld [vmem:[%s3529_s1 + $0x6b4] ss:$8 sps:$4 sm:$0xff]   ;;  %v2541_v62 = vld [vmem:[%s3529_s1 + $0x2b0] ss:$8 sps:$4 sm:$0xff]  }
  0x75   :  { %1857 = vmatprep.subr.bf16.mxu0 %v2458_v63  ;;  %v2544_v63 = vld [vmem:[%s3529_s1 + $0x6b0] ss:$8 sps:$4 sm:$0xff]  }
  0x77   :  { %1694 = vmatpush1.bf16.msra.mxu1 %v2453_v0  ;;  %v2549_v0 = vld [vmem:[%s3529_s1 + $0x2c4] ss:$8 sps:$4 sm:$0xff]  }
  0x78   :  { %1858 = vmatpush1.bf16.msra.mxu0 %v2456_v1  ;;  %1695 = vmatprep.subr.bf16.mxu1 %v2461_v2  ;;  %v2552_v1 = vld [vmem:[%s3529_s1 + $0x6c4] ss:$8 sps:$4 sm:$0xff]   ;;  %v2547_v2 = vld [vmem:[%s3529_s1 + $0x2c0] ss:$8 sps:$4 sm:$0xff]  }
  0x79   :  { %1859 = vmatprep.subr.bf16.mxu0 %v2464_v3  ;;  %v2550_v3 = vld [vmem:[%s3529_s1 + $0x6c0] ss:$8 sps:$4 sm:$0xff]  }
  0x7b   :  { %1696 = vmatpush1.bf16.msra.mxu1 %v2459_v4  ;;  %v2555_v4 = vld [vmem:[%s3529_s1 + $0x2d4] ss:$8 sps:$4 sm:$0xff]  }
  0x7c   :  { %1860 = vmatpush1.bf16.msra.mxu0 %v2462_v5  ;;  %1697 = vmatprep.subr.bf16.mxu1 %v2467_v6  ;;  %v2558_v5 = vld [vmem:[%s3529_s1 + $0x6d4] ss:$8 sps:$4 sm:$0xff]   ;;  %v2553_v6 = vld [vmem:[%s3529_s1 + $0x2d0] ss:$8 sps:$4 sm:$0xff]  }
  0x7d   :  { %1861 = vmatprep.subr.bf16.mxu0 %v2470_v7  ;;  %v2556_v7 = vld [vmem:[%s3529_s1 + $0x6d0] ss:$8 sps:$4 sm:$0xff]  }
  0x7f   :  { %1698 = vmatpush1.bf16.msra.mxu1 %v2465_v8  ;;  %v2561_v8 = vld [vmem:[%s3529_s1 + $0x2e4] ss:$8 sps:$4 sm:$0xff]  }
  0x80   :  { %1862 = vmatpush1.bf16.msra.mxu0 %v2468_v9  ;;  %1708 = vmatprep.subr.bf16.mxu1 %v2475_v10  ;;  %v2564_v9 = vld [vmem:[%s3529_s1 + $0x6e4] ss:$8 sps:$4 sm:$0xff]   ;;  %v2559_v10 = vld [vmem:[%s3529_s1 + $0x2e0] ss:$8 sps:$4 sm:$0xff]  }
  0x81   :  { %1872 = vmatprep.subr.bf16.mxu0 %v2480_v11  ;;  %v2562_v11 = vld [vmem:[%s3529_s1 + $0x6e0] ss:$8 sps:$4 sm:$0xff]  }
  0x82   :  { %1700 = vmatmul.mubr.bf16.vlgmr.msra.gmra.mrb[0].mxu1 %v1975_v12  ;;  %v2567_v12 = vld [vmem:[%s3529_s1 + $0x2f4] ss:$8 sps:$4 sm:$0xff]  }
  0x83   :  { %1864 = vmatmul.mubr.bf16.vlgmr.msra.gmra.mrb[0].mxu0 %v1983_v14  ;;  %1709 = vmatpush1.bf16.msra.mxu1 %v2473_v13  ;;  %v2570_v13 = vld [vmem:[%s3529_s1 + $0x6f4] ss:$8 sps:$4 sm:$0xff]   ;;  %v2565_v14 = vld [vmem:[%s3529_s1 + $0x2f0] ss:$8 sps:$4 sm:$0xff]  }
  0x84   :  { %1873 = vmatpush1.bf16.msra.mxu0 %v2478_v15  ;;  %1710 = vmatprep.subr.bf16.mxu1 %v2483_v16  ;;  %v2568_v15 = vld [vmem:[%s3529_s1 + $0x6f0] ss:$8 sps:$4 sm:$0xff]   ;;  %v2575_v16 = vld [vmem:[%s3529_s1 + $0x304] ss:$8 sps:$4 sm:$0xff]  }
  0x85   :  { %1874 = vmatprep.subr.bf16.mxu0 %v2486_v17  ;;  %1740 = vmatprep.mubr.bf16.mxu1 %v1978_v19  ;;  %v2580_v17 = vld [vmem:[%s3529_s1 + $0x704] ss:$8 sps:$4 sm:$0xff]   ;;  %v1977_v19 = vcombine.low %v3124_v18, %v3124_v18  ;;  %v2578_v18 = vld [vmem:[%s3529_s1 + $0x700] ss:$8 sps:$4 sm:$0xff]  }
  0x86   :  { %1904 = vmatprep.mubr.bf16.mxu0 %v1986_v23  ;;  %v3327_v23 = vld [vmem:[%s3530_s0 + $0x38] sm:$0xff] }
  0x87   :  { %1711 = vmatpush1.bf16.msra.mxu1 %v2481_v21  ;;  %v1985_v21 = vcombine.low %v3131_v20, %v3131_v20  ;;  %v2583_v20 = vld [vmem:[%s3529_s1 + $0x314] ss:$8 sps:$4 sm:$0xff]  }
  0x88   :  { %1875 = vmatpush1.bf16.msra.mxu0 %v2484_v22  ;;  %1712 = vmatprep.subr.bf16.mxu1 %v2489_v24  ;;  %v3322_v22 = vld [vmem:[%s3530_s0 + $0x18] sm:$0xff]  ;;  %v2573_v24 = vld [vmem:[%s3529_s1 + $0x300] ss:$8 sps:$4 sm:$0xff]  }
  0x89   :  { %1876 = vmatprep.subr.bf16.mxu0 %v2492_v25  ;;  %v2586_v25 = vld [vmem:[%s3529_s1 + $0x714] ss:$8 sps:$4 sm:$0xff]  }
  0x8b   :  { %1713 = vmatpush1.bf16.msra.mxu1 %v2487_v26  ;;  %v1980_v26 = vcombine.high %v3322_v22, %v3322_v22 }
  0x8c   :  { %1877 = vmatpush1.bf16.msra.mxu0 %v2490_v27  ;;  %1714 = vmatprep.subr.bf16.mxu1 %v2495_v28  ;;  %v1988_v27 = vcombine.high %v3327_v23, %v3327_v23  ;;  %v2581_v28 = vld [vmem:[%s3529_s1 + $0x310] ss:$8 sps:$4 sm:$0xff]  }
  0x8d   :  { %1878 = vmatprep.subr.bf16.mxu0 %v2498_v29  ;;  %v2584_v29 = vld [vmem:[%s3529_s1 + $0x710] ss:$8 sps:$4 sm:$0xff]  }
  0x8f   :  { %1715 = vmatpush1.bf16.msra.mxu1 %v2493_v30  ;;  %v2589_v30 = vld [vmem:[%s3529_s1 + $0x324] ss:$8 sps:$4 sm:$0xff]  }
  0x90   :  { %1879 = vmatpush1.bf16.msra.mxu0 %v2496_v31  ;;  %1716 = vmatprep.subr.bf16.mxu1 %v2501_v32  ;;  %v2592_v31 = vld [vmem:[%s3529_s1 + $0x724] ss:$8 sps:$4 sm:$0xff]   ;;  %v2587_v32 = vld [vmem:[%s3529_s1 + $0x320] ss:$8 sps:$4 sm:$0xff]  }
  0x91   :  { %1880 = vmatprep.subr.bf16.mxu0 %v2504_v33  ;;  %v2590_v33 = vld [vmem:[%s3529_s1 + $0x720] ss:$8 sps:$4 sm:$0xff]  }
  0x93   :  { %1717 = vmatpush1.bf16.msra.mxu1 %v2499_v34  ;;  %v2595_v34 = vld [vmem:[%s3529_s1 + $0x334] ss:$8 sps:$4 sm:$0xff]  }
  0x94   :  { %1881 = vmatpush1.bf16.msra.mxu0 %v2502_v35  ;;  %1718 = vmatprep.subr.bf16.mxu1 %v2507_v36  ;;  %v2598_v35 = vld [vmem:[%s3529_s1 + $0x734] ss:$8 sps:$4 sm:$0xff]   ;;  %v2593_v36 = vld [vmem:[%s3529_s1 + $0x330] ss:$8 sps:$4 sm:$0xff]  }
  0x95   :  { %1882 = vmatprep.subr.bf16.mxu0 %v2510_v37  ;;  %v2596_v37 = vld [vmem:[%s3529_s1 + $0x730] ss:$8 sps:$4 sm:$0xff]  }
  0x97   :  { %1719 = vmatpush1.bf16.msra.mxu1 %v2505_v38  ;;  %v2601_v38 = vld [vmem:[%s3529_s1 + $0x344] ss:$8 sps:$4 sm:$0xff]  }
  0x98   :  { %1883 = vmatpush1.bf16.msra.mxu0 %v2508_v39  ;;  %1720 = vmatprep.subr.bf16.mxu1 %v2513_v40  ;;  %v2604_v39 = vld [vmem:[%s3529_s1 + $0x744] ss:$8 sps:$4 sm:$0xff]   ;;  %v2599_v40 = vld [vmem:[%s3529_s1 + $0x340] ss:$8 sps:$4 sm:$0xff]  }
  0x99   :  { %1884 = vmatprep.subr.bf16.mxu0 %v2516_v41  ;;  %v2602_v41 = vld [vmem:[%s3529_s1 + $0x740] ss:$8 sps:$4 sm:$0xff]  }
  0x9b   :  { %1721 = vmatpush1.bf16.msra.mxu1 %v2511_v42  ;;  %v2607_v42 = vld [vmem:[%s3529_s1 + $0x354] ss:$8 sps:$4 sm:$0xff]  }
  0x9c   :  { %1885 = vmatpush1.bf16.msra.mxu0 %v2514_v43  ;;  %1722 = vmatprep.subr.bf16.mxu1 %v2519_v44  ;;  %v2610_v43 = vld [vmem:[%s3529_s1 + $0x754] ss:$8 sps:$4 sm:$0xff]   ;;  %v2605_v44 = vld [vmem:[%s3529_s1 + $0x350] ss:$8 sps:$4 sm:$0xff]  }
  0x9d   :  { %1886 = vmatprep.subr.bf16.mxu0 %v2522_v45  ;;  %v2608_v45 = vld [vmem:[%s3529_s1 + $0x750] ss:$8 sps:$4 sm:$0xff]  }
  0x9f   :  { %1723 = vmatpush1.bf16.msra.mxu1 %v2517_v46  ;;  %v2613_v46 = vld [vmem:[%s3529_s1 + $0x364] ss:$8 sps:$4 sm:$0xff]  }
  0xa0   :  { %1887 = vmatpush1.bf16.msra.mxu0 %v2520_v47  ;;  %1724 = vmatprep.subr.bf16.mxu1 %v2525_v48  ;;  %v2616_v47 = vld [vmem:[%s3529_s1 + $0x764] ss:$8 sps:$4 sm:$0xff]   ;;  %v2611_v48 = vld [vmem:[%s3529_s1 + $0x360] ss:$8 sps:$4 sm:$0xff]  }
  0xa1   :  { %1888 = vmatprep.subr.bf16.mxu0 %v2528_v49  ;;  %v2614_v49 = vld [vmem:[%s3529_s1 + $0x760] ss:$8 sps:$4 sm:$0xff]  }
  0xa3   :  { %1725 = vmatpush1.bf16.msra.mxu1 %v2523_v50  ;;  %v2619_v50 = vld [vmem:[%s3529_s1 + $0x374] ss:$8 sps:$4 sm:$0xff]  }
  0xa4   :  { %1889 = vmatpush1.bf16.msra.mxu0 %v2526_v51  ;;  %1726 = vmatprep.subr.bf16.mxu1 %v2531_v52  ;;  %v2622_v51 = vld [vmem:[%s3529_s1 + $0x774] ss:$8 sps:$4 sm:$0xff]   ;;  %v2617_v52 = vld [vmem:[%s3529_s1 + $0x370] ss:$8 sps:$4 sm:$0xff]  }
  0xa5   :  { %1890 = vmatprep.subr.bf16.mxu0 %v2534_v53  ;;  %v2620_v53 = vld [vmem:[%s3529_s1 + $0x770] ss:$8 sps:$4 sm:$0xff]  }
  0xa7   :  { %1727 = vmatpush1.bf16.msra.mxu1 %v2529_v54  ;;  %v2625_v54 = vld [vmem:[%s3529_s1 + $0x384] ss:$8 sps:$4 sm:$0xff]  }
  0xa8   :  { %1891 = vmatpush1.bf16.msra.mxu0 %v2532_v55  ;;  %1728 = vmatprep.subr.bf16.mxu1 %v2537_v56  ;;  %v2628_v55 = vld [vmem:[%s3529_s1 + $0x784] ss:$8 sps:$4 sm:$0xff]   ;;  %v2623_v56 = vld [vmem:[%s3529_s1 + $0x380] ss:$8 sps:$4 sm:$0xff]  }
  0xa9   :  { %1892 = vmatprep.subr.bf16.mxu0 %v2540_v57  ;;  %v2626_v57 = vld [vmem:[%s3529_s1 + $0x780] ss:$8 sps:$4 sm:$0xff]  }
  0xab   :  { %1729 = vmatpush1.bf16.msra.mxu1 %v2535_v58  ;;  %v2631_v58 = vld [vmem:[%s3529_s1 + $0x394] ss:$8 sps:$4 sm:$0xff]  }
  0xac   :  { %1893 = vmatpush1.bf16.msra.mxu0 %v2538_v59  ;;  %1730 = vmatprep.subr.bf16.mxu1 %v2543_v60  ;;  %v2634_v59 = vld [vmem:[%s3529_s1 + $0x794] ss:$8 sps:$4 sm:$0xff]   ;;  %v2629_v60 = vld [vmem:[%s3529_s1 + $0x390] ss:$8 sps:$4 sm:$0xff]  }
  0xad   :  { %1894 = vmatprep.subr.bf16.mxu0 %v2546_v61  ;;  %v2632_v61 = vld [vmem:[%s3529_s1 + $0x790] ss:$8 sps:$4 sm:$0xff]  }
  0xaf   :  { %1731 = vmatpush1.bf16.msra.mxu1 %v2541_v62  ;;  %v2637_v62 = vld [vmem:[%s3529_s1 + $0x3a4] ss:$8 sps:$4 sm:$0xff]  }
  0xb0   :  { %1895 = vmatpush1.bf16.msra.mxu0 %v2544_v63  ;;  %1732 = vmatprep.subr.bf16.mxu1 %v2549_v0  ;;  %v2640_v63 = vld [vmem:[%s3529_s1 + $0x7a4] ss:$8 sps:$4 sm:$0xff]   ;;  %v2635_v0 = vld [vmem:[%s3529_s1 + $0x3a0] ss:$8 sps:$4 sm:$0xff]  }
  0xb1   :  { %1896 = vmatprep.subr.bf16.mxu0 %v2552_v1  ;;  %v2638_v1 = vld [vmem:[%s3529_s1 + $0x7a0] ss:$8 sps:$4 sm:$0xff]  }
  0xb3   :  { %1733 = vmatpush1.bf16.msra.mxu1 %v2547_v2  ;;  %v2643_v2 = vld [vmem:[%s3529_s1 + $0x3b4] ss:$8 sps:$4 sm:$0xff]  }
  0xb4   :  { %1897 = vmatpush1.bf16.msra.mxu0 %v2550_v3  ;;  %1734 = vmatprep.subr.bf16.mxu1 %v2555_v4  ;;  %v2646_v3 = vld [vmem:[%s3529_s1 + $0x7b4] ss:$8 sps:$4 sm:$0xff]   ;;  %v2641_v4 = vld [vmem:[%s3529_s1 + $0x3b0] ss:$8 sps:$4 sm:$0xff]  }
  0xb5   :  { %1898 = vmatprep.subr.bf16.mxu0 %v2558_v5  ;;  %v2644_v5 = vld [vmem:[%s3529_s1 + $0x7b0] ss:$8 sps:$4 sm:$0xff]  }
  0xb7   :  { %1735 = vmatpush1.bf16.msra.mxu1 %v2553_v6  ;;  %v2649_v6 = vld [vmem:[%s3529_s1 + $0x3c4] ss:$8 sps:$4 sm:$0xff]  }
  0xb8   :  { %1899 = vmatpush1.bf16.msra.mxu0 %v2556_v7  ;;  %1736 = vmatprep.subr.bf16.mxu1 %v2561_v8  ;;  %v2652_v7 = vld [vmem:[%s3529_s1 + $0x7c4] ss:$8 sps:$4 sm:$0xff]   ;;  %v2647_v8 = vld [vmem:[%s3529_s1 + $0x3c0] ss:$8 sps:$4 sm:$0xff]  }
  0xb9   :  { %1900 = vmatprep.subr.bf16.mxu0 %v2564_v9  ;;  %v2650_v9 = vld [vmem:[%s3529_s1 + $0x7c0] ss:$8 sps:$4 sm:$0xff]  }
  0xbb   :  { %1737 = vmatpush1.bf16.msra.mxu1 %v2559_v10  ;;  %v2655_v10 = vld [vmem:[%s3529_s1 + $0x3d4] ss:$8 sps:$4 sm:$0xff]  }
  0xbc   :  { %1901 = vmatpush1.bf16.msra.mxu0 %v2562_v11  ;;  %1738 = vmatprep.subr.bf16.mxu1 %v2567_v12  ;;  %v2658_v11 = vld [vmem:[%s3529_s1 + $0x7d4] ss:$8 sps:$4 sm:$0xff]   ;;  %v2653_v12 = vld [vmem:[%s3529_s1 + $0x3d0] ss:$8 sps:$4 sm:$0xff]  }
  0xbd   :  { %1902 = vmatprep.subr.bf16.mxu0 %v2570_v13  ;;  %v2656_v13 = vld [vmem:[%s3529_s1 + $0x7d0] ss:$8 sps:$4 sm:$0xff]  }
  0xbf   :  { %1739 = vmatpush1.bf16.msra.mxu1 %v2565_v14  ;;  %v2661_v14 = vld [vmem:[%s3529_s1 + $0x3e4] ss:$8 sps:$4 sm:$0xff]  }
  0xc0   :  { %1903 = vmatpush1.bf16.msra.mxu0 %v2568_v15  ;;  %1749 = vmatprep.subr.bf16.mxu1 %v2575_v16  ;;  %v2664_v15 = vld [vmem:[%s3529_s1 + $0x7e4] ss:$8 sps:$4 sm:$0xff]   ;;  %v2659_v16 = vld [vmem:[%s3529_s1 + $0x3e0] ss:$8 sps:$4 sm:$0xff]  }
  0xc1   :  { %1913 = vmatprep.subr.bf16.mxu0 %v2580_v17  ;;  %v2662_v17 = vld [vmem:[%s3529_s1 + $0x7e0] ss:$8 sps:$4 sm:$0xff]  }
  0xc2   :  { %1741 = vmatmul.mubr.bf16.vlgmr.msra.gmra.mrb[0].mxu1 %v1977_v19  ;;  %v2667_v19 = vld [vmem:[%s3529_s1 + $0x3f4] ss:$8 sps:$4 sm:$0xff]  }
  0xc3   :  { %1905 = vmatmul.mubr.bf16.vlgmr.msra.gmra.mrb[0].mxu0 %v1985_v21  ;;  %1750 = vmatpush1.bf16.msra.mxu1 %v2573_v24  ;;  %v2670_v21 = vld [vmem:[%s3529_s1 + $0x7f4] ss:$8 sps:$4 sm:$0xff]   ;;  %v2665_v24 = vld [vmem:[%s3529_s1 + $0x3f0] ss:$8 sps:$4 sm:$0xff]  }
  0xc4   :  { %1914 = vmatpush1.bf16.msra.mxu0 %v2578_v18  ;;  %1751 = vmatprep.subr.bf16.mxu1 %v2583_v20  ;;  %v2668_v18 = vld [vmem:[%s3529_s1 + $0x7f0] ss:$8 sps:$4 sm:$0xff]   ;;  %v1979_v20 = vcombine.low %v3322_v22, %v3322_v22 }
  0xc5   :  { %1915 = vmatprep.subr.bf16.mxu0 %v2586_v25  ;;  %1781 = vmatprep.mubr.bf16.mxu1 %v1980_v26  ;;  %v1987_v25 = vcombine.low %v3327_v23, %v3327_v23  ;;  %v280_v26 = vlaneseq }
  0xc6   :  { %1945 = vmatprep.mubr.bf16.mxu0 %v1988_v27 }
  0xc7   :  { %1752 = vmatpush1.bf16.msra.mxu1 %v2581_v28  ;;  %v281_v27 = vshrl.u32 %v280_v26, 7 }
  0xc8   :  { %1916 = vmatpush1.bf16.msra.mxu0 %v2584_v29  ;;  %1753 = vmatprep.subr.bf16.mxu1 %v2589_v30  ;;  %v278_v29 = vld [vmem:[%s3531_s2] sm:$0x3] }
  0xc9   :  { %1917 = vmatprep.subr.bf16.mxu0 %v2592_v31  ;;  %v282_v28 = vsub.s32 0, %v281_v27  ;;  %v286_v30 = vsub.s32 1, %v281_v27 }
  0xcb   :  { %1754 = vmatpush1.bf16.msra.mxu1 %v2587_v32  ;;  %v283_v31 = vrot.slane %v278_v29, %v282_v28  ;;  %v287_v32 = vrot.slane %v278_v29, %v286_v30 }
  0xcc   :  { %1918 = vmatpush1.bf16.msra.mxu0 %v2590_v33  ;;  %1755 = vmatprep.subr.bf16.mxu1 %v2595_v34 }
  0xcd   :  { %1919 = vmatprep.subr.bf16.mxu0 %v2598_v35 }
  0xcf   :  { %1756 = vmatpush1.bf16.msra.mxu1 %v2593_v36 }
  0xd0   :  { %1920 = vmatpush1.bf16.msra.mxu0 %v2596_v37  ;;  %1757 = vmatprep.subr.bf16.mxu1 %v2601_v38 }
  0xd1   :  { %1921 = vmatprep.subr.bf16.mxu0 %v2604_v39 }
  0xd3   :  { %1758 = vmatpush1.bf16.msra.mxu1 %v2599_v40 }
  0xd4   :  { %1922 = vmatpush1.bf16.msra.mxu0 %v2602_v41  ;;  %1759 = vmatprep.subr.bf16.mxu1 %v2607_v42 }
  0xd5   :  { %1923 = vmatprep.subr.bf16.mxu0 %v2610_v43 }
  0xd7   :  { %1760 = vmatpush1.bf16.msra.mxu1 %v2605_v44 }
  0xd8   :  { %1924 = vmatpush1.bf16.msra.mxu0 %v2608_v45  ;;  %1761 = vmatprep.subr.bf16.mxu1 %v2613_v46 }
  0xd9   :  { %1925 = vmatprep.subr.bf16.mxu0 %v2616_v47 }
  0xdb   :  { %1762 = vmatpush1.bf16.msra.mxu1 %v2611_v48 }
  0xdc   :  { %1926 = vmatpush1.bf16.msra.mxu0 %v2614_v49  ;;  %1763 = vmatprep.subr.bf16.mxu1 %v2619_v50 }
  0xdd   :  { %1927 = vmatprep.subr.bf16.mxu0 %v2622_v51 }
  0xdf   :  { %1764 = vmatpush1.bf16.msra.mxu1 %v2617_v52 }
  0xe0   :  { %1928 = vmatpush1.bf16.msra.mxu0 %v2620_v53  ;;  %1765 = vmatprep.subr.bf16.mxu1 %v2625_v54 }
  0xe1   :  { %1929 = vmatprep.subr.bf16.mxu0 %v2628_v55 }
  0xe3   :  { %1766 = vmatpush1.bf16.msra.mxu1 %v2623_v56 }
  0xe4   :  { %1930 = vmatpush1.bf16.msra.mxu0 %v2626_v57  ;;  %1767 = vmatprep.subr.bf16.mxu1 %v2631_v58 }
  0xe5   :  { %1931 = vmatprep.subr.bf16.mxu0 %v2634_v59 }
  0xe7   :  { %1768 = vmatpush1.bf16.msra.mxu1 %v2629_v60 }
  0xe8   :  { %1932 = vmatpush1.bf16.msra.mxu0 %v2632_v61  ;;  %1769 = vmatprep.subr.bf16.mxu1 %v2637_v62 }
  0xe9   :  { %1933 = vmatprep.subr.bf16.mxu0 %v2640_v63 }
  0xeb   :  { %1770 = vmatpush1.bf16.msra.mxu1 %v2635_v0 }
  0xec   :  { %1934 = vmatpush1.bf16.msra.mxu0 %v2638_v1  ;;  %1771 = vmatprep.subr.bf16.mxu1 %v2643_v2 }
  0xed   :  { %1935 = vmatprep.subr.bf16.mxu0 %v2646_v3 }
  0xef   :  { %1772 = vmatpush1.bf16.msra.mxu1 %v2641_v4 }
  0xf0   :  { %1936 = vmatpush1.bf16.msra.mxu0 %v2644_v5  ;;  %1773 = vmatprep.subr.bf16.mxu1 %v2649_v6 }
  0xf1   :  { %1937 = vmatprep.subr.bf16.mxu0 %v2652_v7 }
  0xf3   :  { %1774 = vmatpush1.bf16.msra.mxu1 %v2647_v8 }
  0xf4   :  { %1938 = vmatpush1.bf16.msra.mxu0 %v2650_v9  ;;  %1775 = vmatprep.subr.bf16.mxu1 %v2655_v10 }
  0xf5   :  { %1939 = vmatprep.subr.bf16.mxu0 %v2658_v11 }
  0xf7   :  { %1776 = vmatpush1.bf16.msra.mxu1 %v2653_v12 }
  0xf8   :  { %1940 = vmatpush1.bf16.msra.mxu0 %v2656_v13  ;;  %1777 = vmatprep.subr.bf16.mxu1 %v2661_v14 }
  0xf9   :  { %1941 = vmatprep.subr.bf16.mxu0 %v2664_v15 }
  0xfb   :  { %1778 = vmatpush1.bf16.msra.mxu1 %v2659_v16 }
  0xfc   :  { %1942 = vmatpush1.bf16.msra.mxu0 %v2662_v17  ;;  %1779 = vmatprep.subr.bf16.mxu1 %v2667_v19 }
  0xfd   :  { %1943 = vmatprep.subr.bf16.mxu0 %v2670_v21 }
  0xff   :  { %1780 = vmatpush1.bf16.msra.mxu1 %v2665_v24 }
 0x100   :  { %1944 = vmatpush1.bf16.msra.mxu0 %v2668_v18 }
 0x102   :  { %1782 = vmatmul.mubr.bf16.vlgmr.msra.gmra.mrb[0].mxu1 %v1979_v20 }
 0x103   :  { %1946 = vmatmul.mubr.bf16.vlgmr.msra.gmra.mrb[0].mxu0 %v1987_v25 }
 0x1d5   :  { %v1783_v33 = vpop.f32.mrb[0].mxu1 }
 0x1d6   :  { %v1947_v34 = vpop.f32.mrb[0].mxu0  ;;  %v2247_v22 = vadd.f32 %v1783_v33, %v283_v31  ;;  %v1785_v35 = vpop.f32.mrb[1].mxu1 }
 0x1d7   :  { %v1949_v36 = vpop.f32.mrb[1].mxu0  ;;  %v2249_v23 = vadd.f32 %v1785_v35, %v287_v32  ;;  %v1787_v37 = vpop.f32.mrb[2].mxu1 }
 0x1d8   :  { %v1951_v38 = vpop.f32.mrb[2].mxu0  ;;  %v2248_v39 = vadd.f32 %v2247_v22, %v1947_v34  ;;  %v1788_v40 = vpop.f32.mrb[3].mxu1 }
 0x1d9   :  { %v1952_v41 = vpop.f32.mrb[3].mxu0  ;;  %v2250_v42 = vadd.f32 %v2249_v23, %v1949_v36 }
 0x1da   :  { %vm1954_vm0 = vcmp.ge.f32.partialorder %v2248_v39, 0.0  ;;  %v1956_v43 = vmul.f32 0.2, %v2248_v39 }
 0x1db   :  { %vm1955_vm1 = vcmp.ge.f32.partialorder %v2250_v42, 0.0  ;;  %v1957_v44 = vmul.f32 0.2, %v2250_v42 }
 0x1dc   :  { %v1958_v45 = vsel %vm1954_vm0, %v2248_v39, %v1956_v43 }
 0x1dd   :  { %v1959_v46 = vsel %vm1955_vm1, %v2250_v42, %v1957_v44 }
 0x1de   :  { %v2246_v47 = vpack.c.bf16 %v1959_v46, %v1958_v45 }
 0x1e0   :  { %1968 = vst [vmem:[%s3532_s3] sm:$0xff] %v2246_v47 }

// kernel: sp_fc_discriminator_forward.9
= control target key start
LH: loop header
LB: loop body
LE: loop exit
PB: predicated region body
PF: predicated region fallthrough
CT: control target
= control target key end

     0   :  { %s4614_s1 = inlined_call_operand.vmem [shape: bf16[4096,128], index: 1, kind: input, shape index: {}]   ;;  %s4615_s0 = inlined_call_operand.vmem [shape: bf16[8,4096], index: 0, kind: input, shape index: {}]   ;;  %s4616_s2 = inlined_call_operand.vmem [shape: f32[1,128], index: 2, kind: input, shape index: {}]   ;;  %s4617_s3 = inlined_call_operand.vmem [shape: f32[8,128], index: 3, kind: output, shape index: {}]  }
   0x1   :  { %v3484_v0 = vld [vmem:[%s4614_s1 + $0x40] sm:$0xff]   ;;  %v3488_v4 = vld [vmem:[%s4614_s1 + $0x48] sm:$0xff]   ;;  %v3492_v8 = vld [vmem:[%s4614_s1 + $0x50] sm:$0xff]  }
   0x2   :  { %v3485_v1 = vld [vmem:[%s4614_s1 + $0xc0] sm:$0xff]   ;;  %3132 = vmatprep.subr.bf16.mxu0 %v3484_v0  ;;  %v3489_v5 = vld [vmem:[%s4614_s1 + $0xc8] sm:$0xff]   ;;  %v3493_v9 = vld [vmem:[%s4614_s1 + $0xd0] sm:$0xff]  }
   0x3   :  { %v3486_v2 = vld [vmem:[%s4614_s1] sm:$0xff]   ;;  %3154 = vmatprep.subr.bf16.mxu1 %v3485_v1  ;;  %v3490_v6 = vld [vmem:[%s4614_s1 + $0x8] sm:$0xff]   ;;  %v3494_v10 = vld [vmem:[%s4614_s1 + $0x10] sm:$0xff]  }
   0x4   :  { %v3487_v3 = vld [vmem:[%s4614_s1 + $0x80] sm:$0xff]   ;;  %3133 = vmatpush3.bf16.msra.mxu0 %v3486_v2  ;;  %v3491_v7 = vld [vmem:[%s4614_s1 + $0x88] sm:$0xff]   ;;  %v3495_v11 = vld [vmem:[%s4614_s1 + $0x90] sm:$0xff]  }
   0x5   :  { %3155 = vmatpush3.bf16.msra.mxu1 %v3487_v3  ;;  %3134 = vmatprep.subr.bf16.mxu0 %v3488_v4  ;;  %v3496_v12 = vld [vmem:[%s4614_s1 + $0x58] sm:$0xff]   ;;  %v3500_v16 = vld [vmem:[%s4614_s1 + $0x60] sm:$0xff]   ;;  %v3504_v20 = vld [vmem:[%s4614_s1 + $0x68] sm:$0xff]  }
   0x6   :  { %3156 = vmatprep.subr.bf16.mxu1 %v3489_v5  ;;  %v3497_v13 = vld [vmem:[%s4614_s1 + $0xd8] sm:$0xff]   ;;  %v3501_v17 = vld [vmem:[%s4614_s1 + $0xe0] sm:$0xff]   ;;  %v3505_v21 = vld [vmem:[%s4614_s1 + $0xe8] sm:$0xff]  }
   0x7   :  { %v3498_v14 = vld [vmem:[%s4614_s1 + $0x18] sm:$0xff]   ;;  %v3502_v18 = vld [vmem:[%s4614_s1 + $0x20] sm:$0xff]   ;;  %v3506_v22 = vld [vmem:[%s4614_s1 + $0x28] sm:$0xff]  }
   0x8   :  { %3135 = vmatpush3.bf16.msra.mxu0 %v3490_v6  ;;  %v3499_v15 = vld [vmem:[%s4614_s1 + $0x98] sm:$0xff]   ;;  %v3503_v19 = vld [vmem:[%s4614_s1 + $0xa0] sm:$0xff]   ;;  %v3507_v23 = vld [vmem:[%s4614_s1 + $0xa8] sm:$0xff]  }
   0x9   :  { %3157 = vmatpush3.bf16.msra.mxu1 %v3491_v7  ;;  %3136 = vmatprep.subr.bf16.mxu0 %v3492_v8  ;;  %v3508_v24 = vld [vmem:[%s4614_s1 + $0x70] sm:$0xff]   ;;  %v3512_v28 = vld [vmem:[%s4614_s1 + $0x78] sm:$0xff]   ;;  %v15_v32 = vld [vmem:[%s4615_s0] sm:$0xff] }
   0xa   :  { %3158 = vmatprep.subr.bf16.mxu1 %v3493_v9  ;;  %v3509_v25 = vld [vmem:[%s4614_s1 + $0xf0] sm:$0xff]   ;;  %v3513_v29 = vld [vmem:[%s4614_s1 + $0xf8] sm:$0xff]   ;;  %v16_v33 = vld [vmem:[%s4615_s0 + $0x8] sm:$0xff]  ;;  %v2844_v34 = vcombine.low %v15_v32, %v15_v32  ;;  %v2845_v35 = vcombine.high %v15_v32, %v15_v32 }
   0xb   :  { %v3510_v26 = vld [vmem:[%s4614_s1 + $0x30] sm:$0xff]   ;;  %v3514_v30 = vld [vmem:[%s4614_s1 + $0x38] sm:$0xff]   ;;  %v2846_v36 = vcombine.low %v16_v33, %v16_v33  ;;  %v2847_v37 = vcombine.high %v16_v33, %v16_v33  ;;  %v3520_v38 = vld [vmem:[%s4614_s1 + $0x140] sm:$0xff]  }
   0xc   :  { %3137 = vmatpush3.bf16.msra.mxu0 %v3494_v10  ;;  %v3511_v27 = vld [vmem:[%s4614_s1 + $0xb0] sm:$0xff]   ;;  %v3515_v31 = vld [vmem:[%s4614_s1 + $0xb8] sm:$0xff]   ;;  %v3521_v39 = vld [vmem:[%s4614_s1 + $0x1c0] sm:$0xff]   ;;  %2230 = vmatprep.mubr.bf16.mxu0 %v2845_v35 }
   0xd   :  { %3159 = vmatpush3.bf16.msra.mxu1 %v3495_v11  ;;  %3138 = vmatprep.subr.bf16.mxu0 %v3496_v12  ;;  %v3522_v40 = vld [vmem:[%s4614_s1 + $0x100] sm:$0xff]   ;;  %v3524_v42 = vld [vmem:[%s4614_s1 + $0x148] sm:$0xff]   ;;  %v3528_v46 = vld [vmem:[%s4614_s1 + $0x150] sm:$0xff]  }
   0xe   :  { %3160 = vmatprep.subr.bf16.mxu1 %v3497_v13  ;;  %2270 = vmatprep.mubr.bf16.mxu1 %v2847_v37  ;;  %v3523_v41 = vld [vmem:[%s4614_s1 + $0x180] sm:$0xff]   ;;  %v3525_v43 = vld [vmem:[%s4614_s1 + $0x1c8] sm:$0xff]   ;;  %v3529_v47 = vld [vmem:[%s4614_s1 + $0x1d0] sm:$0xff]  }
   0xf   :  { %v3526_v44 = vld [vmem:[%s4614_s1 + $0x108] sm:$0xff]   ;;  %v3530_v48 = vld [vmem:[%s4614_s1 + $0x110] sm:$0xff]   ;;  %v3532_v50 = vld [vmem:[%s4614_s1 + $0x158] sm:$0xff]  }
  0x10   :  { %3139 = vmatpush3.bf16.msra.mxu0 %v3498_v14  ;;  %v3527_v45 = vld [vmem:[%s4614_s1 + $0x188] sm:$0xff]   ;;  %v3531_v49 = vld [vmem:[%s4614_s1 + $0x190] sm:$0xff]   ;;  %v3533_v51 = vld [vmem:[%s4614_s1 + $0x1d8] sm:$0xff]  }
  0x11   :  { %3161 = vmatpush3.bf16.msra.mxu1 %v3499_v15  ;;  %3140 = vmatprep.subr.bf16.mxu0 %v3500_v16  ;;  %v3534_v52 = vld [vmem:[%s4614_s1 + $0x118] sm:$0xff]   ;;  %v3536_v54 = vld [vmem:[%s4614_s1 + $0x160] sm:$0xff]   ;;  %v3540_v58 = vld [vmem:[%s4614_s1 + $0x168] sm:$0xff]  }
  0x12   :  { %3162 = vmatprep.subr.bf16.mxu1 %v3501_v17  ;;  %v3535_v53 = vld [vmem:[%s4614_s1 + $0x198] sm:$0xff]   ;;  %v3537_v55 = vld [vmem:[%s4614_s1 + $0x1e0] sm:$0xff]   ;;  %v3541_v59 = vld [vmem:[%s4614_s1 + $0x1e8] sm:$0xff]  }
  0x13   :  { %v3538_v56 = vld [vmem:[%s4614_s1 + $0x120] sm:$0xff]   ;;  %v3542_v60 = vld [vmem:[%s4614_s1 + $0x128] sm:$0xff]   ;;  %v3544_v62 = vld [vmem:[%s4614_s1 + $0x170] sm:$0xff]  }
  0x14   :  { %3141 = vmatpush3.bf16.msra.mxu0 %v3502_v18  ;;  %v3539_v57 = vld [vmem:[%s4614_s1 + $0x1a0] sm:$0xff]   ;;  %v3543_v61 = vld [vmem:[%s4614_s1 + $0x1a8] sm:$0xff]   ;;  %v3545_v63 = vld [vmem:[%s4614_s1 + $0x1f0] sm:$0xff]  }
  0x15   :  { %3163 = vmatpush3.bf16.msra.mxu1 %v3503_v19  ;;  %3142 = vmatprep.subr.bf16.mxu0 %v3504_v20  ;;  %v3546_v0 = vld [vmem:[%s4614_s1 + $0x130] sm:$0xff]   ;;  %v3548_v2 = vld [vmem:[%s4614_s1 + $0x178] sm:$0xff]   ;;  %v3556_v12 = vld [vmem:[%s4614_s1 + $0x240] sm:$0xff]  }
  0x16   :  { %3164 = vmatprep.subr.bf16.mxu1 %v3505_v21  ;;  %v3547_v1 = vld [vmem:[%s4614_s1 + $0x1b0] sm:$0xff]   ;;  %v3549_v3 = vld [vmem:[%s4614_s1 + $0x1f8] sm:$0xff]   ;;  %v3557_v13 = vld [vmem:[%s4614_s1 + $0x2c0] sm:$0xff]  }
  0x17   :  { %v3550_v4 = vld [vmem:[%s4614_s1 + $0x138] sm:$0xff]   ;;  %v17_v6 = vld [vmem:[%s4615_s0 + $0x10] sm:$0xff]  ;;  %v3558_v14 = vld [vmem:[%s4614_s1 + $0x200] sm:$0xff]  }
  0x18   :  { %3143 = vmatpush3.bf16.msra.mxu0 %v3506_v22  ;;  %v3551_v5 = vld [vmem:[%s4614_s1 + $0x1b8] sm:$0xff]   ;;  %v2848_v7 = vcombine.low %v17_v6, %v17_v6  ;;  %v2849_v8 = vcombine.high %v17_v6, %v17_v6  ;;  %v3559_v15 = vld [vmem:[%s4614_s1 + $0x280] sm:$0xff]   ;;  %v3560_v16 = vld [vmem:[%s4614_s1 + $0x248] sm:$0xff]  }
  0x19   :  { %3165 = vmatpush3.bf16.msra.mxu1 %v3507_v23  ;;  %3144 = vmatprep.subr.bf16.mxu0 %v3508_v24  ;;  %v18_v9 = vld [vmem:[%s4615_s0 + $0x18] sm:$0xff]  ;;  %v3561_v17 = vld [vmem:[%s4614_s1 + $0x2c8] sm:$0xff]   ;;  %v3564_v20 = vld [vmem:[%s4614_s1 + $0x250] sm:$0xff]  }
  0x1a   :  { %3166 = vmatprep.subr.bf16.mxu1 %v3509_v25  ;;  %v2850_v10 = vcombine.low %v18_v9, %v18_v9  ;;  %v2851_v11 = vcombine.high %v18_v9, %v18_v9  ;;  %v3562_v18 = vld [vmem:[%s4614_s1 + $0x208] sm:$0xff]   ;;  %v3565_v21 = vld [vmem:[%s4614_s1 + $0x2d0] sm:$0xff]   ;;  %v3568_v24 = vld [vmem:[%s4614_s1 + $0x258] sm:$0xff]  }
  0x1b   :  { %v3563_v19 = vld [vmem:[%s4614_s1 + $0x288] sm:$0xff]   ;;  %v3566_v22 = vld [vmem:[%s4614_s1 + $0x210] sm:$0xff]   ;;  %v3569_v25 = vld [vmem:[%s4614_s1 + $0x2d8] sm:$0xff]  }
  0x1c   :  { %3145 = vmatpush3.bf16.msra.mxu0 %v3510_v26  ;;  %v3567_v23 = vld [vmem:[%s4614_s1 + $0x290] sm:$0xff]   ;;  %v3570_v26 = vld [vmem:[%s4614_s1 + $0x218] sm:$0xff]   ;;  %v3576_v32 = vld [vmem:[%s4614_s1 + $0x268] sm:$0xff]  }
  0x1d   :  { %3167 = vmatpush3.bf16.msra.mxu1 %v3511_v27  ;;  %3146 = vmatprep.subr.bf16.mxu0 %v3512_v28  ;;  %v3571_v27 = vld [vmem:[%s4614_s1 + $0x298] sm:$0xff]   ;;  %v3572_v28 = vld [vmem:[%s4614_s1 + $0x260] sm:$0xff]   ;;  %v3577_v33 = vld [vmem:[%s4614_s1 + $0x2e8] sm:$0xff]  }
  0x1e   :  { %3168 = vmatprep.subr.bf16.mxu1 %v3513_v29  ;;  %v3573_v29 = vld [vmem:[%s4614_s1 + $0x2e0] sm:$0xff]   ;;  %v3579_v35 = vld [vmem:[%s4614_s1 + $0x2a8] sm:$0xff]   ;;  %v3581_v37 = vld [vmem:[%s4614_s1 + $0x2f0] sm:$0xff]  }
  0x1f   :  { %v3612_v6 = vld [vmem:[%s4614_s1 + $0x368] sm:$0xff]  }
  0x20   :  { %3147 = vmatpush3.bf16.msra.mxu0 %v3514_v30  ;;  %v3574_v30 = vld [vmem:[%s4614_s1 + $0x220] sm:$0xff]   ;;  %v3615_v9 = vld [vmem:[%s4614_s1 + $0x3a8] sm:$0xff]  }
  0x21   :  { %3169 = vmatpush3.bf16.msra.mxu1 %v3515_v31  ;;  %3176 = vmatprep.subr.bf16.mxu0 %v3520_v38  ;;  %v3575_v31 = vld [vmem:[%s4614_s1 + $0x2a0] sm:$0xff]   ;;  %v3582_v38 = vld [vmem:[%s4614_s1 + $0x230] sm:$0xff]  }
  0x22   :  { %3198 = vmatprep.subr.bf16.mxu1 %v3521_v39  ;;  %v3583_v39 = vld [vmem:[%s4614_s1 + $0x2b0] sm:$0xff]  }
  0x23   :  { %2231 = vmatmul.mubr.bf16.vlgmr.msra.gmra.mrb[0].mxu0 %v2844_v34  ;;  %v3578_v34 = vld [vmem:[%s4614_s1 + $0x228] sm:$0xff]  }
  0x24   :  { %2271 = vmatmul.mubr.bf16.vlgmr.msra.gmra.mrb[0].mxu1 %v2846_v36  ;;  %3177 = vmatpush3.bf16.msra.mxu0 %v3522_v40  ;;  %v3580_v36 = vld [vmem:[%s4614_s1 + $0x270] sm:$0xff]   ;;  %v3584_v40 = vld [vmem:[%s4614_s1 + $0x278] sm:$0xff]  }
  0x25   :  { %3199 = vmatpush3.bf16.msra.mxu1 %v3523_v41  ;;  %3178 = vmatprep.subr.bf16.mxu0 %v3524_v42  ;;  %v3585_v41 = vld [vmem:[%s4614_s1 + $0x2f8] sm:$0xff]  }
  0x26   :  { %3200 = vmatprep.subr.bf16.mxu1 %v3525_v43  ;;  %2310 = vmatprep.mubr.bf16.mxu0 %v2849_v8  ;;  %v3586_v42 = vld [vmem:[%s4614_s1 + $0x238] sm:$0xff]   ;;  %v3614_v8 = vld [vmem:[%s4614_s1 + $0x328] sm:$0xff]  }
  0x27   :  { %2350 = vmatprep.mubr.bf16.mxu1 %v2851_v11  ;;  %v3587_v43 = vld [vmem:[%s4614_s1 + $0x2b8] sm:$0xff]   ;;  %v3617_v11 = vld [vmem:[%s4614_s1 + $0x3f0] sm:$0xff]  }
  0x28   :  { %3179 = vmatpush3.bf16.msra.mxu0 %v3526_v44  ;;  %v19_v44 = vld [vmem:[%s4615_s0 + $0x20] sm:$0xff] }
  0x29   :  { %3201 = vmatpush3.bf16.msra.mxu1 %v3527_v45  ;;  %3180 = vmatprep.subr.bf16.mxu0 %v3528_v46  ;;  %v20_v45 = vld [vmem:[%s4615_s0 + $0x28] sm:$0xff]  ;;  %v2852_v46 = vcombine.low %v19_v44, %v19_v44 }
  0x2a   :  { %3202 = vmatprep.subr.bf16.mxu1 %v3529_v47  ;;  %v2853_v47 = vcombine.high %v19_v44, %v19_v44  ;;  %v3648_v44 = vld [vmem:[%s4614_s1 + $0x468] sm:$0xff]  }
  0x2c   :  { %3181 = vmatpush3.bf16.msra.mxu0 %v3530_v48  ;;  %v2854_v48 = vcombine.low %v20_v45, %v20_v45 }
  0x2d   :  { %3203 = vmatpush3.bf16.msra.mxu1 %v3531_v49  ;;  %3182 = vmatprep.subr.bf16.mxu0 %v3532_v50  ;;  %v2855_v49 = vcombine.high %v20_v45, %v20_v45  ;;  %v3592_v50 = vld [vmem:[%s4614_s1 + $0x340] sm:$0xff]   ;;  %v3649_v45 = vld [vmem:[%s4614_s1 + $0x4e8] sm:$0xff]  }
  0x2e   :  { %3204 = vmatprep.subr.bf16.mxu1 %v3533_v51  ;;  %v3593_v51 = vld [vmem:[%s4614_s1 + $0x3c0] sm:$0xff]  }
  0x30   :  { %3183 = vmatpush3.bf16.msra.mxu0 %v3534_v52  ;;  %v3594_v52 = vld [vmem:[%s4614_s1 + $0x300] sm:$0xff]  }
  0x31   :  { %3205 = vmatpush3.bf16.msra.mxu1 %v3535_v53  ;;  %3184 = vmatprep.subr.bf16.mxu0 %v3536_v54  ;;  %v3595_v53 = vld [vmem:[%s4614_s1 + $0x380] sm:$0xff]   ;;  %v3596_v54 = vld [vmem:[%s4614_s1 + $0x348] sm:$0xff]  }
  0x32   :  { %3206 = vmatprep.subr.bf16.mxu1 %v3537_v55  ;;  %v3597_v55 = vld [vmem:[%s4614_s1 + $0x3c8] sm:$0xff]  }
  0x34   :  { %3185 = vmatpush3.bf16.msra.mxu0 %v3538_v56  ;;  %v3598_v56 = vld [vmem:[%s4614_s1 + $0x308] sm:$0xff]  }
  0x35   :  { %3207 = vmatpush3.bf16.msra.mxu1 %v3539_v57  ;;  %3186 = vmatprep.subr.bf16.mxu0 %v3540_v58  ;;  %v3599_v57 = vld [vmem:[%s4614_s1 + $0x388] sm:$0xff]   ;;  %v3600_v58 = vld [vmem:[%s4614_s1 + $0x350] sm:$0xff]  }
  0x36   :  { %3208 = vmatprep.subr.bf16.mxu1 %v3541_v59  ;;  %v3601_v59 = vld [vmem:[%s4614_s1 + $0x3d0] sm:$0xff]  }
  0x38   :  { %3187 = vmatpush3.bf16.msra.mxu0 %v3542_v60  ;;  %v3602_v60 = vld [vmem:[%s4614_s1 + $0x310] sm:$0xff]  }
  0x39   :  { %3209 = vmatpush3.bf16.msra.mxu1 %v3543_v61  ;;  %3188 = vmatprep.subr.bf16.mxu0 %v3544_v62  ;;  %v3603_v61 = vld [vmem:[%s4614_s1 + $0x390] sm:$0xff]   ;;  %v3604_v62 = vld [vmem:[%s4614_s1 + $0x358] sm:$0xff]  }
  0x3a   :  { %3210 = vmatprep.subr.bf16.mxu1 %v3545_v63  ;;  %v3605_v63 = vld [vmem:[%s4614_s1 + $0x3d8] sm:$0xff]  }
  0x3c   :  { %3189 = vmatpush3.bf16.msra.mxu0 %v3546_v0  ;;  %v3606_v0 = vld [vmem:[%s4614_s1 + $0x318] sm:$0xff]  }
  0x3d   :  { %3211 = vmatpush3.bf16.msra.mxu1 %v3547_v1  ;;  %3190 = vmatprep.subr.bf16.mxu0 %v3548_v2  ;;  %v3607_v1 = vld [vmem:[%s4614_s1 + $0x398] sm:$0xff]   ;;  %v3608_v2 = vld [vmem:[%s4614_s1 + $0x360] sm:$0xff]  }
  0x3e   :  { %3212 = vmatprep.subr.bf16.mxu1 %v3549_v3  ;;  %v3609_v3 = vld [vmem:[%s4614_s1 + $0x3e0] sm:$0xff]  }
  0x40   :  { %3191 = vmatpush3.bf16.msra.mxu0 %v3550_v4  ;;  %v3610_v4 = vld [vmem:[%s4614_s1 + $0x320] sm:$0xff]  }
  0x41   :  { %3213 = vmatpush3.bf16.msra.mxu1 %v3551_v5  ;;  %3220 = vmatprep.subr.bf16.mxu0 %v3556_v12  ;;  %v3611_v5 = vld [vmem:[%s4614_s1 + $0x3a0] sm:$0xff]   ;;  %v3618_v12 = vld [vmem:[%s4614_s1 + $0x330] sm:$0xff]  }
  0x42   :  { %3242 = vmatprep.subr.bf16.mxu1 %v3557_v13  ;;  %v3619_v13 = vld [vmem:[%s4614_s1 + $0x3b0] sm:$0xff]  }
  0x43   :  { %2311 = vmatmul.mubr.bf16.vlgmr.msra.gmra.mrb[4].mxu0 %v2848_v7  ;;  %v3613_v7 = vld [vmem:[%s4614_s1 + $0x3e8] sm:$0xff]  }
  0x44   :  { %2351 = vmatmul.mubr.bf16.vlgmr.msra.gmra.mrb[4].mxu1 %v2850_v10  ;;  %3221 = vmatpush3.bf16.msra.mxu0 %v3558_v14  ;;  %v3616_v10 = vld [vmem:[%s4614_s1 + $0x370] sm:$0xff]   ;;  %v3620_v14 = vld [vmem:[%s4614_s1 + $0x378] sm:$0xff]  }
  0x45   :  { %3243 = vmatpush3.bf16.msra.mxu1 %v3559_v15  ;;  %3222 = vmatprep.subr.bf16.mxu0 %v3560_v16  ;;  %v3621_v15 = vld [vmem:[%s4614_s1 + $0x3f8] sm:$0xff]  }
  0x46   :  { %3244 = vmatprep.subr.bf16.mxu1 %v3561_v17  ;;  %2390 = vmatprep.mubr.bf16.mxu0 %v2853_v47  ;;  %v3622_v16 = vld [vmem:[%s4614_s1 + $0x338] sm:$0xff]   ;;  %v3651_v47 = vld [vmem:[%s4614_s1 + $0x4a8] sm:$0xff]  }
  0x47   :  { %2430 = vmatprep.mubr.bf16.mxu1 %v2855_v49  ;;  %v3623_v17 = vld [vmem:[%s4614_s1 + $0x3b8] sm:$0xff]   ;;  %v3653_v49 = vld [vmem:[%s4614_s1 + $0x4f0] sm:$0xff]  }
  0x48   :  { %3223 = vmatpush3.bf16.msra.mxu0 %v3562_v18  ;;  %v21_v18 = vld [vmem:[%s4615_s0 + $0x30] sm:$0xff] }
  0x49   :  { %3245 = vmatpush3.bf16.msra.mxu1 %v3563_v19  ;;  %3224 = vmatprep.subr.bf16.mxu0 %v3564_v20  ;;  %v22_v19 = vld [vmem:[%s4615_s0 + $0x38] sm:$0xff]  ;;  %v2856_v20 = vcombine.low %v21_v18, %v21_v18 }
  0x4a   :  { %3246 = vmatprep.subr.bf16.mxu1 %v3565_v21  ;;  %v2857_v21 = vcombine.high %v21_v18, %v21_v18  ;;  %v3684_v18 = vld [vmem:[%s4614_s1 + $0x568] sm:$0xff]  }
  0x4c   :  { %3225 = vmatpush3.bf16.msra.mxu0 %v3566_v22  ;;  %v2858_v22 = vcombine.low %v22_v19, %v22_v19 }
  0x4d   :  { %3247 = vmatpush3.bf16.msra.mxu1 %v3567_v23  ;;  %3226 = vmatprep.subr.bf16.mxu0 %v3568_v24  ;;  %v3628_v23 = vld [vmem:[%s4614_s1 + $0x440] sm:$0xff]   ;;  %v2859_v24 = vcombine.high %v22_v19, %v22_v19  ;;  %v3685_v19 = vld [vmem:[%s4614_s1 + $0x5e8] sm:$0xff]  }
  0x4e   :  { %3248 = vmatprep.subr.bf16.mxu1 %v3569_v25  ;;  %v3629_v25 = vld [vmem:[%s4614_s1 + $0x4c0] sm:$0xff]  }
  0x50   :  { %3227 = vmatpush3.bf16.msra.mxu0 %v3570_v26  ;;  %v3630_v26 = vld [vmem:[%s4614_s1 + $0x400] sm:$0xff]  }
  0x51   :  { %3249 = vmatpush3.bf16.msra.mxu1 %v3571_v27  ;;  %3228 = vmatprep.subr.bf16.mxu0 %v3572_v28  ;;  %v3631_v27 = vld [vmem:[%s4614_s1 + $0x480] sm:$0xff]   ;;  %v3632_v28 = vld [vmem:[%s4614_s1 + $0x448] sm:$0xff]  }
  0x52   :  { %3250 = vmatprep.subr.bf16.mxu1 %v3573_v29  ;;  %v3633_v29 = vld [vmem:[%s4614_s1 + $0x4c8] sm:$0xff]  }
  0x54   :  { %3229 = vmatpush3.bf16.msra.mxu0 %v3574_v30  ;;  %v3634_v30 = vld [vmem:[%s4614_s1 + $0x408] sm:$0xff]  }
  0x55   :  { %3251 = vmatpush3.bf16.msra.mxu1 %v3575_v31  ;;  %3230 = vmatprep.subr.bf16.mxu0 %v3576_v32  ;;  %v3635_v31 = vld [vmem:[%s4614_s1 + $0x488] sm:$0xff]   ;;  %v3636_v32 = vld [vmem:[%s4614_s1 + $0x450] sm:$0xff]  }
  0x56   :  { %3252 = vmatprep.subr.bf16.mxu1 %v3577_v33  ;;  %v3637_v33 = vld [vmem:[%s4614_s1 + $0x4d0] sm:$0xff]  }
  0x58   :  { %3231 = vmatpush3.bf16.msra.mxu0 %v3578_v34  ;;  %v3638_v34 = vld [vmem:[%s4614_s1 + $0x410] sm:$0xff]  }
  0x59   :  { %3253 = vmatpush3.bf16.msra.mxu1 %v3579_v35  ;;  %3232 = vmatprep.subr.bf16.mxu0 %v3580_v36  ;;  %v3639_v35 = vld [vmem:[%s4614_s1 + $0x490] sm:$0xff]   ;;  %v3640_v36 = vld [vmem:[%s4614_s1 + $0x458] sm:$0xff]  }
  0x5a   :  { %3254 = vmatprep.subr.bf16.mxu1 %v3581_v37  ;;  %v3641_v37 = vld [vmem:[%s4614_s1 + $0x4d8] sm:$0xff]  }
  0x5c   :  { %3233 = vmatpush3.bf16.msra.mxu0 %v3582_v38  ;;  %v3642_v38 = vld [vmem:[%s4614_s1 + $0x418] sm:$0xff]  }
  0x5d   :  { %3255 = vmatpush3.bf16.msra.mxu1 %v3583_v39  ;;  %3234 = vmatprep.subr.bf16.mxu0 %v3584_v40  ;;  %v3643_v39 = vld [vmem:[%s4614_s1 + $0x498] sm:$0xff]   ;;  %v3644_v40 = vld [vmem:[%s4614_s1 + $0x460] sm:$0xff]  }
  0x5e   :  { %3256 = vmatprep.subr.bf16.mxu1 %v3585_v41  ;;  %v3645_v41 = vld [vmem:[%s4614_s1 + $0x4e0] sm:$0xff]  }
  0x60   :  { %3235 = vmatpush3.bf16.msra.mxu0 %v3586_v42  ;;  %v3646_v42 = vld [vmem:[%s4614_s1 + $0x420] sm:$0xff]  }
  0x61   :  { %3257 = vmatpush3.bf16.msra.mxu1 %v3587_v43  ;;  %3264 = vmatprep.subr.bf16.mxu0 %v3592_v50  ;;  %v3647_v43 = vld [vmem:[%s4614_s1 + $0x4a0] sm:$0xff]   ;;  %v3654_v50 = vld [vmem:[%s4614_s1 + $0x430] sm:$0xff]  }
  0x62   :  { %3286 = vmatprep.subr.bf16.mxu1 %v3593_v51  ;;  %v3655_v51 = vld [vmem:[%s4614_s1 + $0x4b0] sm:$0xff]  }
  0x63   :  { %2391 = vmatmul.mubr.bf16.vlgmr.msra.gmra.mrb[8].mxu0 %v2852_v46  ;;  %v3650_v46 = vld [vmem:[%s4614_s1 + $0x428] sm:$0xff]  }
  0x64   :  { %2431 = vmatmul.mubr.bf16.vlgmr.msra.gmra.mrb[8].mxu1 %v2854_v48  ;;  %3265 = vmatpush3.bf16.msra.mxu0 %v3594_v52  ;;  %v3652_v48 = vld [vmem:[%s4614_s1 + $0x470] sm:$0xff]   ;;  %v3656_v52 = vld [vmem:[%s4614_s1 + $0x478] sm:$0xff]  }
  0x65   :  { %3287 = vmatpush3.bf16.msra.mxu1 %v3595_v53  ;;  %3266 = vmatprep.subr.bf16.mxu0 %v3596_v54  ;;  %v3657_v53 = vld [vmem:[%s4614_s1 + $0x4f8] sm:$0xff]  }
  0x66   :  { %3288 = vmatprep.subr.bf16.mxu1 %v3597_v55  ;;  %2470 = vmatprep.mubr.bf16.mxu0 %v2857_v21  ;;  %v3658_v54 = vld [vmem:[%s4614_s1 + $0x438] sm:$0xff]   ;;  %v3687_v21 = vld [vmem:[%s4614_s1 + $0x5a8] sm:$0xff]  }
  0x67   :  { %2510 = vmatprep.mubr.bf16.mxu1 %v2859_v24  ;;  %v3659_v55 = vld [vmem:[%s4614_s1 + $0x4b8] sm:$0xff]   ;;  %v3690_v24 = vld [vmem:[%s4614_s1 + $0x530] sm:$0xff]  }
  0x68   :  { %3267 = vmatpush3.bf16.msra.mxu0 %v3598_v56  ;;  %v23_v56 = vld [vmem:[%s4615_s0 + $0x40] sm:$0xff] }
  0x69   :  { %3289 = vmatpush3.bf16.msra.mxu1 %v3599_v57  ;;  %3268 = vmatprep.subr.bf16.mxu0 %v3600_v58  ;;  %v2860_v57 = vcombine.low %v23_v56, %v23_v56  ;;  %v2861_v58 = vcombine.high %v23_v56, %v23_v56  ;;  %v3720_v56 = vld [vmem:[%s4614_s1 + $0x668] sm:$0xff]  }
  0x6a   :  { %3290 = vmatprep.subr.bf16.mxu1 %v3601_v59  ;;  %v24_v59 = vld [vmem:[%s4615_s0 + $0x48] sm:$0xff] }
  0x6c   :  { %3269 = vmatpush3.bf16.msra.mxu0 %v3602_v60  ;;  %v2862_v60 = vcombine.low %v24_v59, %v24_v59 }
  0x6d   :  { %3291 = vmatpush3.bf16.msra.mxu1 %v3603_v61  ;;  %3270 = vmatprep.subr.bf16.mxu0 %v3604_v62  ;;  %v2863_v61 = vcombine.high %v24_v59, %v24_v59  ;;  %v3664_v62 = vld [vmem:[%s4614_s1 + $0x540] sm:$0xff]   ;;  %v3723_v59 = vld [vmem:[%s4614_s1 + $0x6a8] sm:$0xff]  }
  0x6e   :  { %3292 = vmatprep.subr.bf16.mxu1 %v3605_v63  ;;  %v3665_v63 = vld [vmem:[%s4614_s1 + $0x5c0] sm:$0xff]  }
  0x70   :  { %3271 = vmatpush3.bf16.msra.mxu0 %v3606_v0  ;;  %v3666_v0 = vld [vmem:[%s4614_s1 + $0x500] sm:$0xff]  }
  0x71   :  { %3293 = vmatpush3.bf16.msra.mxu1 %v3607_v1  ;;  %3272 = vmatprep.subr.bf16.mxu0 %v3608_v2  ;;  %v3667_v1 = vld [vmem:[%s4614_s1 + $0x580] sm:$0xff]   ;;  %v3668_v2 = vld [vmem:[%s4614_s1 + $0x548] sm:$0xff]  }
  0x72   :  { %3294 = vmatprep.subr.bf16.mxu1 %v3609_v3  ;;  %v3669_v3 = vld [vmem:[%s4614_s1 + $0x5c8] sm:$0xff]  }
  0x74   :  { %3273 = vmatpush3.bf16.msra.mxu0 %v3610_v4  ;;  %v3670_v4 = vld [vmem:[%s4614_s1 + $0x508] sm:$0xff]  }
  0x75   :  { %3295 = vmatpush3.bf16.msra.mxu1 %v3611_v5  ;;  %3274 = vmatprep.subr.bf16.mxu0 %v3612_v6  ;;  %v3671_v5 = vld [vmem:[%s4614_s1 + $0x588] sm:$0xff]   ;;  %v3672_v6 = vld [vmem:[%s4614_s1 + $0x550] sm:$0xff]  }
  0x76   :  { %3296 = vmatprep.subr.bf16.mxu1 %v3613_v7  ;;  %v3673_v7 = vld [vmem:[%s4614_s1 + $0x5d0] sm:$0xff]  }
  0x78   :  { %3275 = vmatpush3.bf16.msra.mxu0 %v3614_v8  ;;  %v3674_v8 = vld [vmem:[%s4614_s1 + $0x510] sm:$0xff]  }
  0x79   :  { %3297 = vmatpush3.bf16.msra.mxu1 %v3615_v9  ;;  %3276 = vmatprep.subr.bf16.mxu0 %v3616_v10  ;;  %v3675_v9 = vld [vmem:[%s4614_s1 + $0x590] sm:$0xff]   ;;  %v3676_v10 = vld [vmem:[%s4614_s1 + $0x558] sm:$0xff]  }
  0x7a   :  { %3298 = vmatprep.subr.bf16.mxu1 %v3617_v11  ;;  %v3677_v11 = vld [vmem:[%s4614_s1 + $0x5d8] sm:$0xff]  }
  0x7c   :  { %3277 = vmatpush3.bf16.msra.mxu0 %v3618_v12  ;;  %v3678_v12 = vld [vmem:[%s4614_s1 + $0x518] sm:$0xff]  }
  0x7d   :  { %3299 = vmatpush3.bf16.msra.mxu1 %v3619_v13  ;;  %3278 = vmatprep.subr.bf16.mxu0 %v3620_v14  ;;  %v3679_v13 = vld [vmem:[%s4614_s1 + $0x598] sm:$0xff]   ;;  %v3680_v14 = vld [vmem:[%s4614_s1 + $0x560] sm:$0xff]  }
  0x7e   :  { %3300 = vmatprep.subr.bf16.mxu1 %v3621_v15  ;;  %v3681_v15 = vld [vmem:[%s4614_s1 + $0x5e0] sm:$0xff]  }
  0x80   :  { %3279 = vmatpush3.bf16.msra.mxu0 %v3622_v16  ;;  %v3682_v16 = vld [vmem:[%s4614_s1 + $0x520] sm:$0xff]  }
  0x81   :  { %3301 = vmatpush3.bf16.msra.mxu1 %v3623_v17  ;;  %3308 = vmatprep.subr.bf16.mxu0 %v3628_v23  ;;  %v3683_v17 = vld [vmem:[%s4614_s1 + $0x5a0] sm:$0xff]   ;;  %v3689_v23 = vld [vmem:[%s4614_s1 + $0x5f0] sm:$0xff]  }
  0x82   :  { %3330 = vmatprep.subr.bf16.mxu1 %v3629_v25  ;;  %v3691_v25 = vld [vmem:[%s4614_s1 + $0x5b0] sm:$0xff]  }
  0x83   :  { %2471 = vmatmul.mubr.bf16.vlgmr.msra.gmra.mrb[12].mxu0 %v2856_v20  ;;  %v3686_v20 = vld [vmem:[%s4614_s1 + $0x528] sm:$0xff]  }
  0x84   :  { %2511 = vmatmul.mubr.bf16.vlgmr.msra.gmra.mrb[12].mxu1 %v2858_v22  ;;  %3309 = vmatpush3.bf16.msra.mxu0 %v3630_v26  ;;  %v3688_v22 = vld [vmem:[%s4614_s1 + $0x570] sm:$0xff]   ;;  %v3692_v26 = vld [vmem:[%s4614_s1 + $0x578] sm:$0xff]  }
  0x85   :  { %3331 = vmatpush3.bf16.msra.mxu1 %v3631_v27  ;;  %3310 = vmatprep.subr.bf16.mxu0 %v3632_v28  ;;  %v3693_v27 = vld [vmem:[%s4614_s1 + $0x5f8] sm:$0xff]  }
  0x86   :  { %3332 = vmatprep.subr.bf16.mxu1 %v3633_v29  ;;  %2550 = vmatprep.mubr.bf16.mxu0 %v2861_v58  ;;  %v3694_v28 = vld [vmem:[%s4614_s1 + $0x538] sm:$0xff]   ;;  %v3722_v58 = vld [vmem:[%s4614_s1 + $0x628] sm:$0xff]  }
  0x87   :  { %2590 = vmatprep.mubr.bf16.mxu1 %v2863_v61  ;;  %v3695_v29 = vld [vmem:[%s4614_s1 + $0x5b8] sm:$0xff]   ;;  %v3725_v61 = vld [vmem:[%s4614_s1 + $0x6f0] sm:$0xff]  }
  0x88   :  { %3311 = vmatpush3.bf16.msra.mxu0 %v3634_v30  ;;  %v25_v30 = vld [vmem:[%s4615_s0 + $0x50] sm:$0xff] }
  0x89   :  { %3333 = vmatpush3.bf16.msra.mxu1 %v3635_v31  ;;  %3312 = vmatprep.subr.bf16.mxu0 %v3636_v32  ;;  %v26_v31 = vld [vmem:[%s4615_s0 + $0x58] sm:$0xff]  ;;  %v2864_v32 = vcombine.low %v25_v30, %v25_v30 }
  0x8a   :  { %3334 = vmatprep.subr.bf16.mxu1 %v3637_v33  ;;  %v2865_v33 = vcombine.high %v25_v30, %v25_v30  ;;  %v3755_v30 = vld [vmem:[%s4614_s1 + $0x7a0] sm:$0xff]  }
  0x8c   :  { %3313 = vmatpush3.bf16.msra.mxu0 %v3638_v34  ;;  %v2866_v34 = vcombine.low %v26_v31, %v26_v31 }
  0x8d   :  { %3335 = vmatpush3.bf16.msra.mxu1 %v3639_v35  ;;  %3314 = vmatprep.subr.bf16.mxu0 %v3640_v36  ;;  %v2867_v35 = vcombine.high %v26_v31, %v26_v31  ;;  %v3700_v36 = vld [vmem:[%s4614_s1 + $0x640] sm:$0xff]  }
  0x8e   :  { %3336 = vmatprep.subr.bf16.mxu1 %v3641_v37  ;;  %v3701_v37 = vld [vmem:[%s4614_s1 + $0x6c0] sm:$0xff]  }
  0x90   :  { %3315 = vmatpush3.bf16.msra.mxu0 %v3642_v38  ;;  %v3702_v38 = vld [vmem:[%s4614_s1 + $0x600] sm:$0xff]  }
  0x91   :  { %3337 = vmatpush3.bf16.msra.mxu1 %v3643_v39  ;;  %3316 = vmatprep.subr.bf16.mxu0 %v3644_v40  ;;  %v3703_v39 = vld [vmem:[%s4614_s1 + $0x680] sm:$0xff]   ;;  %v3704_v40 = vld [vmem:[%s4614_s1 + $0x648] sm:$0xff]  }
  0x92   :  { %3338 = vmatprep.subr.bf16.mxu1 %v3645_v41  ;;  %v3705_v41 = vld [vmem:[%s4614_s1 + $0x6c8] sm:$0xff]  }
  0x94   :  { %3317 = vmatpush3.bf16.msra.mxu0 %v3646_v42  ;;  %v3706_v42 = vld [vmem:[%s4614_s1 + $0x608] sm:$0xff]  }
  0x95   :  { %3339 = vmatpush3.bf16.msra.mxu1 %v3647_v43  ;;  %3318 = vmatprep.subr.bf16.mxu0 %v3648_v44  ;;  %v3707_v43 = vld [vmem:[%s4614_s1 + $0x688] sm:$0xff]   ;;  %v3708_v44 = vld [vmem:[%s4614_s1 + $0x650] sm:$0xff]  }
  0x96   :  { %3340 = vmatprep.subr.bf16.mxu1 %v3649_v45  ;;  %v3709_v45 = vld [vmem:[%s4614_s1 + $0x6d0] sm:$0xff]  }
  0x98   :  { %3319 = vmatpush3.bf16.msra.mxu0 %v3650_v46  ;;  %v3710_v46 = vld [vmem:[%s4614_s1 + $0x610] sm:$0xff]  }
  0x99   :  { %3341 = vmatpush3.bf16.msra.mxu1 %v3651_v47  ;;  %3320 = vmatprep.subr.bf16.mxu0 %v3652_v48  ;;  %v3711_v47 = vld [vmem:[%s4614_s1 + $0x690] sm:$0xff]   ;;  %v3712_v48 = vld [vmem:[%s4614_s1 + $0x658] sm:$0xff]  }
  0x9a   :  { %3342 = vmatprep.subr.bf16.mxu1 %v3653_v49  ;;  %v3713_v49 = vld [vmem:[%s4614_s1 + $0x6d8] sm:$0xff]  }
  0x9c   :  { %3321 = vmatpush3.bf16.msra.mxu0 %v3654_v50  ;;  %v3714_v50 = vld [vmem:[%s4614_s1 + $0x618] sm:$0xff]  }
  0x9d   :  { %3343 = vmatpush3.bf16.msra.mxu1 %v3655_v51  ;;  %3322 = vmatprep.subr.bf16.mxu0 %v3656_v52  ;;  %v3715_v51 = vld [vmem:[%s4614_s1 + $0x698] sm:$0xff]   ;;  %v3716_v52 = vld [vmem:[%s4614_s1 + $0x660] sm:$0xff]  }
  0x9e   :  { %3344 = vmatprep.subr.bf16.mxu1 %v3657_v53  ;;  %v3717_v53 = vld [vmem:[%s4614_s1 + $0x6e0] sm:$0xff]  }
  0xa0   :  { %3323 = vmatpush3.bf16.msra.mxu0 %v3658_v54  ;;  %v3718_v54 = vld [vmem:[%s4614_s1 + $0x620] sm:$0xff]  }
  0xa1   :  { %3345 = vmatpush3.bf16.msra.mxu1 %v3659_v55  ;;  %3352 = vmatprep.subr.bf16.mxu0 %v3664_v62  ;;  %v3719_v55 = vld [vmem:[%s4614_s1 + $0x6a0] sm:$0xff]   ;;  %v3726_v62 = vld [vmem:[%s4614_s1 + $0x630] sm:$0xff]  }
  0xa2   :  { %3374 = vmatprep.subr.bf16.mxu1 %v3665_v63  ;;  %v3727_v63 = vld [vmem:[%s4614_s1 + $0x6b0] sm:$0xff]  }
  0xa3   :  { %2551 = vmatmul.mubr.bf16.vlgmr.msra.gmra.mrb[16].mxu0 %v2860_v57  ;;  %v3721_v57 = vld [vmem:[%s4614_s1 + $0x6e8] sm:$0xff]  }
  0xa4   :  { %2591 = vmatmul.mubr.bf16.vlgmr.msra.gmra.mrb[16].mxu1 %v2862_v60  ;;  %3353 = vmatpush3.bf16.msra.mxu0 %v3666_v0  ;;  %v3724_v60 = vld [vmem:[%s4614_s1 + $0x670] sm:$0xff]   ;;  %v3728_v0 = vld [vmem:[%s4614_s1 + $0x678] sm:$0xff]  }
  0xa5   :  { %3375 = vmatpush3.bf16.msra.mxu1 %v3667_v1  ;;  %3354 = vmatprep.subr.bf16.mxu0 %v3668_v2  ;;  %v3729_v1 = vld [vmem:[%s4614_s1 + $0x6f8] sm:$0xff]  }
  0xa6   :  { %3376 = vmatprep.subr.bf16.mxu1 %v3669_v3  ;;  %2630 = vmatprep.mubr.bf16.mxu0 %v2865_v33  ;;  %v3730_v2 = vld [vmem:[%s4614_s1 + $0x638] sm:$0xff]  }
  0xa7   :  { %2670 = vmatprep.mubr.bf16.mxu1 %v2867_v35  ;;  %v3731_v3 = vld [vmem:[%s4614_s1 + $0x6b8] sm:$0xff]  }
  0xa8   :  { %3355 = vmatpush3.bf16.msra.mxu0 %v3670_v4  ;;  %v27_v4 = vld [vmem:[%s4615_s0 + $0x60] sm:$0xff] }
  0xa9   :  { %3377 = vmatpush3.bf16.msra.mxu1 %v3671_v5  ;;  %3356 = vmatprep.subr.bf16.mxu0 %v3672_v6  ;;  %v28_v5 = vld [vmem:[%s4615_s0 + $0x68] sm:$0xff]  ;;  %v2868_v6 = vcombine.low %v27_v4, %v27_v4 }
  0xaa   :  { %3378 = vmatprep.subr.bf16.mxu1 %v3673_v7  ;;  %v2869_v7 = vcombine.high %v27_v4, %v27_v4 }
  0xac   :  { %3357 = vmatpush3.bf16.msra.mxu0 %v3674_v8  ;;  %v2870_v8 = vcombine.low %v28_v5, %v28_v5 }
  0xad   :  { %3379 = vmatpush3.bf16.msra.mxu1 %v3675_v9  ;;  %3358 = vmatprep.subr.bf16.mxu0 %v3676_v10  ;;  %v3736_v9 = vld [vmem:[%s4614_s1 + $0x740] sm:$0xff]   ;;  %v2871_v10 = vcombine.high %v28_v5, %v28_v5 }
  0xae   :  { %3380 = vmatprep.subr.bf16.mxu1 %v3677_v11  ;;  %v3737_v11 = vld [vmem:[%s4614_s1 + $0x7c0] sm:$0xff]  }
  0xb0   :  { %3359 = vmatpush3.bf16.msra.mxu0 %v3678_v12  ;;  %v3738_v12 = vld [vmem:[%s4614_s1 + $0x700] sm:$0xff]  }
  0xb1   :  { %3381 = vmatpush3.bf16.msra.mxu1 %v3679_v13  ;;  %3360 = vmatprep.subr.bf16.mxu0 %v3680_v14  ;;  %v3739_v13 = vld [vmem:[%s4614_s1 + $0x780] sm:$0xff]   ;;  %v3740_v14 = vld [vmem:[%s4614_s1 + $0x748] sm:$0xff]  }
  0xb2   :  { %3382 = vmatprep.subr.bf16.mxu1 %v3681_v15  ;;  %v3741_v15 = vld [vmem:[%s4614_s1 + $0x7c8] sm:$0xff]  }
  0xb4   :  { %3361 = vmatpush3.bf16.msra.mxu0 %v3682_v16  ;;  %v3742_v16 = vld [vmem:[%s4614_s1 + $0x708] sm:$0xff]  }
  0xb5   :  { %3383 = vmatpush3.bf16.msra.mxu1 %v3683_v17  ;;  %3362 = vmatprep.subr.bf16.mxu0 %v3684_v18  ;;  %v3743_v17 = vld [vmem:[%s4614_s1 + $0x788] sm:$0xff]   ;;  %v3744_v18 = vld [vmem:[%s4614_s1 + $0x750] sm:$0xff]  }
  0xb6   :  { %3384 = vmatprep.subr.bf16.mxu1 %v3685_v19  ;;  %v3745_v19 = vld [vmem:[%s4614_s1 + $0x7d0] sm:$0xff]  }
  0xb8   :  { %3363 = vmatpush3.bf16.msra.mxu0 %v3686_v20  ;;  %v3746_v20 = vld [vmem:[%s4614_s1 + $0x710] sm:$0xff]  }
  0xb9   :  { %3385 = vmatpush3.bf16.msra.mxu1 %v3687_v21  ;;  %3364 = vmatprep.subr.bf16.mxu0 %v3688_v22  ;;  %v3747_v21 = vld [vmem:[%s4614_s1 + $0x790] sm:$0xff]   ;;  %v3748_v22 = vld [vmem:[%s4614_s1 + $0x758] sm:$0xff]  }
  0xba   :  { %3386 = vmatprep.subr.bf16.mxu1 %v3689_v23  ;;  %v3749_v23 = vld [vmem:[%s4614_s1 + $0x7d8] sm:$0xff]  }
  0xbc   :  { %3365 = vmatpush3.bf16.msra.mxu0 %v3690_v24  ;;  %v3750_v24 = vld [vmem:[%s4614_s1 + $0x718] sm:$0xff]  }
  0xbd   :  { %3387 = vmatpush3.bf16.msra.mxu1 %v3691_v25  ;;  %3366 = vmatprep.subr.bf16.mxu0 %v3692_v26  ;;  %v3751_v25 = vld [vmem:[%s4614_s1 + $0x798] sm:$0xff]   ;;  %v3752_v26 = vld [vmem:[%s4614_s1 + $0x760] sm:$0xff]  }
  0xbe   :  { %3388 = vmatprep.subr.bf16.mxu1 %v3693_v27  ;;  %v3753_v27 = vld [vmem:[%s4614_s1 + $0x7e0] sm:$0xff]  }
  0xc0   :  { %3367 = vmatpush3.bf16.msra.mxu0 %v3694_v28  ;;  %v3754_v28 = vld [vmem:[%s4614_s1 + $0x720] sm:$0xff]  }
  0xc1   :  { %3389 = vmatpush3.bf16.msra.mxu1 %v3695_v29  ;;  %3396 = vmatprep.subr.bf16.mxu0 %v3700_v36 }
  0xc2   :  { %3418 = vmatprep.subr.bf16.mxu1 %v3701_v37  ;;  %v3756_v37 = vld [vmem:[%s4614_s1 + $0x768] sm:$0xff]  }
  0xc3   :  { %2631 = vmatmul.mubr.bf16.vlgmr.msra.gmra.mrb[20].mxu0 %v2864_v32  ;;  %v2843_v32 = vld [vmem:[%s4616_s2] ss:$0 sm:$0xff] }
  0xc4   :  { %2671 = vmatmul.mubr.bf16.vlgmr.msra.gmra.mrb[20].mxu1 %v2866_v34  ;;  %3397 = vmatpush3.bf16.msra.mxu0 %v3702_v38 }
  0xc5   :  { %3419 = vmatpush3.bf16.msra.mxu1 %v3703_v39  ;;  %3398 = vmatprep.subr.bf16.mxu0 %v3704_v40  ;;  %v3757_v39 = vld [vmem:[%s4614_s1 + $0x7e8] sm:$0xff]  }
  0xc6   :  { %3420 = vmatprep.subr.bf16.mxu1 %v3705_v41  ;;  %2710 = vmatprep.mubr.bf16.mxu0 %v2869_v7 }
  0xc7   :  { %2750 = vmatprep.mubr.bf16.mxu1 %v2871_v10 }
  0xc8   :  { %3399 = vmatpush3.bf16.msra.mxu0 %v3706_v42  ;;  %v3758_v42 = vld [vmem:[%s4614_s1 + $0x728] sm:$0xff]  }
  0xc9   :  { %3421 = vmatpush3.bf16.msra.mxu1 %v3707_v43  ;;  %3400 = vmatprep.subr.bf16.mxu0 %v3708_v44  ;;  %v3759_v44 = vld [vmem:[%s4614_s1 + $0x7a8] sm:$0xff]  }
  0xca   :  { %3422 = vmatprep.subr.bf16.mxu1 %v3709_v45 }
  0xcc   :  { %3401 = vmatpush3.bf16.msra.mxu0 %v3710_v46 }
  0xcd   :  { %3423 = vmatpush3.bf16.msra.mxu1 %v3711_v47  ;;  %3402 = vmatprep.subr.bf16.mxu0 %v3712_v48  ;;  %v3760_v47 = vld [vmem:[%s4614_s1 + $0x770] sm:$0xff]  }
  0xce   :  { %3424 = vmatprep.subr.bf16.mxu1 %v3713_v49  ;;  %v3761_v48 = vld [vmem:[%s4614_s1 + $0x7f0] sm:$0xff]  }
  0xcf   :  { %v3762_v49 = vld [vmem:[%s4614_s1 + $0x730] sm:$0xff]  }
  0xd0   :  { %3403 = vmatpush3.bf16.msra.mxu0 %v3714_v50  ;;  %v3763_v50 = vld [vmem:[%s4614_s1 + $0x7b0] sm:$0xff]  }
  0xd1   :  { %3425 = vmatpush3.bf16.msra.mxu1 %v3715_v51  ;;  %3404 = vmatprep.subr.bf16.mxu0 %v3716_v52  ;;  %v3764_v51 = vld [vmem:[%s4614_s1 + $0x778] sm:$0xff]  }
  0xd2   :  { %3426 = vmatprep.subr.bf16.mxu1 %v3717_v53  ;;  %v3765_v52 = vld [vmem:[%s4614_s1 + $0x7f8] sm:$0xff]  }
  0xd3   :  { %v3766_v53 = vld [vmem:[%s4614_s1 + $0x738] sm:$0xff]  }
  0xd4   :  { %3405 = vmatpush3.bf16.msra.mxu0 %v3718_v54  ;;  %v3767_v54 = vld [vmem:[%s4614_s1 + $0x7b8] sm:$0xff]  }
  0xd5   :  { %3427 = vmatpush3.bf16.msra.mxu1 %v3719_v55  ;;  %3406 = vmatprep.subr.bf16.mxu0 %v3720_v56  ;;  %v29_v55 = vld [vmem:[%s4615_s0 + $0x70] sm:$0xff]  ;;  %v30_v56 = vld [vmem:[%s4615_s0 + $0x78] sm:$0xff] }
  0xd6   :  { %3428 = vmatprep.subr.bf16.mxu1 %v3721_v57  ;;  %v2872_v57 = vcombine.low %v29_v55, %v29_v55 }
  0xd8   :  { %3407 = vmatpush3.bf16.msra.mxu0 %v3722_v58  ;;  %v2873_v58 = vcombine.high %v29_v55, %v29_v55 }
  0xd9   :  { %3429 = vmatpush3.bf16.msra.mxu1 %v3723_v59  ;;  %3408 = vmatprep.subr.bf16.mxu0 %v3724_v60  ;;  %v2874_v59 = vcombine.low %v30_v56, %v30_v56  ;;  %v2875_v60 = vcombine.high %v30_v56, %v30_v56 }
  0xda   :  { %3430 = vmatprep.subr.bf16.mxu1 %v3725_v61 }
  0xdc   :  { %3409 = vmatpush3.bf16.msra.mxu0 %v3726_v62 }
  0xdd   :  { %3431 = vmatpush3.bf16.msra.mxu1 %v3727_v63  ;;  %3410 = vmatprep.subr.bf16.mxu0 %v3728_v0 }
  0xde   :  { %3432 = vmatprep.subr.bf16.mxu1 %v3729_v1 }
  0xe0   :  { %3411 = vmatpush3.bf16.msra.mxu0 %v3730_v2 }
  0xe1   :  { %3433 = vmatpush3.bf16.msra.mxu1 %v3731_v3  ;;  %3440 = vmatprep.subr.bf16.mxu0 %v3736_v9 }
  0xe2   :  { %3462 = vmatprep.subr.bf16.mxu1 %v3737_v11 }
  0xe3   :  { %2711 = vmatmul.mubr.bf16.vlgmr.msra.gmra.mrb[24].mxu0 %v2868_v6 }
  0xe4   :  { %2751 = vmatmul.mubr.bf16.vlgmr.msra.gmra.mrb[24].mxu1 %v2870_v8  ;;  %3441 = vmatpush3.bf16.msra.mxu0 %v3738_v12 }
  0xe5   :  { %3463 = vmatpush3.bf16.msra.mxu1 %v3739_v13  ;;  %3442 = vmatprep.subr.bf16.mxu0 %v3740_v14 }
  0xe6   :  { %3464 = vmatprep.subr.bf16.mxu1 %v3741_v15  ;;  %2790 = vmatprep.mubr.bf16.mxu0 %v2873_v58 }
  0xe7   :  { %2830 = vmatprep.mubr.bf16.mxu1 %v2875_v60 }
  0xe8   :  { %3443 = vmatpush3.bf16.msra.mxu0 %v3742_v16 }
  0xe9   :  { %3465 = vmatpush3.bf16.msra.mxu1 %v3743_v17  ;;  %3444 = vmatprep.subr.bf16.mxu0 %v3744_v18 }
  0xea   :  { %3466 = vmatprep.subr.bf16.mxu1 %v3745_v19 }
  0xec   :  { %3445 = vmatpush3.bf16.msra.mxu0 %v3746_v20 }
  0xed   :  { %3467 = vmatpush3.bf16.msra.mxu1 %v3747_v21  ;;  %3446 = vmatprep.subr.bf16.mxu0 %v3748_v22 }
  0xee   :  { %3468 = vmatprep.subr.bf16.mxu1 %v3749_v23 }
  0xf0   :  { %3447 = vmatpush3.bf16.msra.mxu0 %v3750_v24 }
  0xf1   :  { %3469 = vmatpush3.bf16.msra.mxu1 %v3751_v25  ;;  %3448 = vmatprep.subr.bf16.mxu0 %v3752_v26 }
  0xf2   :  { %3470 = vmatprep.subr.bf16.mxu1 %v3753_v27 }
  0xf4   :  { %3449 = vmatpush3.bf16.msra.mxu0 %v3754_v28 }
  0xf5   :  { %3471 = vmatpush3.bf16.msra.mxu1 %v3755_v30  ;;  %3450 = vmatprep.subr.bf16.mxu0 %v3756_v37 }
  0xf6   :  { %v3148_v29 = vpop.f32.mrb[0].mxu0  ;;  %3472 = vmatprep.subr.bf16.mxu1 %v3757_v39 }
  0xf7   :  { %v3170_v31 = vpop.f32.mrb[0].mxu1  ;;  %v3149_v33 = vpop.f32.mrb[1].mxu0 }
  0xf8   :  { %v3171_v34 = vpop.f32.mrb[1].mxu1  ;;  %v3150_v35 = vadd.f32 %v3149_v33, %v3148_v29  ;;  %v3151_v38 = vpop.f32.mrb[2].mxu0  ;;  %3451 = vmatpush3.bf16.msra.mxu0 %v3758_v42 }
  0xf9   :  { %v3172_v36 = vadd.f32 %v3171_v34, %v3170_v31  ;;  %v3173_v40 = vpop.f32.mrb[2].mxu1  ;;  %v3152_v43 = vpop.f32.mrb[3].mxu0  ;;  %3473 = vmatpush3.bf16.msra.mxu1 %v3759_v44  ;;  %3452 = vmatprep.subr.bf16.mxu0 %v3760_v47 }
  0xfa   :  { %v2233_v41 = vadd.f32 %v3150_v35, %v2843_v32  ;;  %v3174_v45 = vpop.f32.mrb[3].mxu1  ;;  %3474 = vmatprep.subr.bf16.mxu1 %v3761_v48 }
  0xfc   :  { %v2273_v46 = vadd.f32 %v3172_v36, %v2233_v41  ;;  %3453 = vmatpush3.bf16.msra.mxu0 %v3762_v49 }
  0xfd   :  { %3475 = vmatpush3.bf16.msra.mxu1 %v3763_v50  ;;  %3454 = vmatprep.subr.bf16.mxu0 %v3764_v51 }
  0xfe   :  { %3476 = vmatprep.subr.bf16.mxu1 %v3765_v52 }
 0x100   :  { %3455 = vmatpush3.bf16.msra.mxu0 %v3766_v53 }
 0x101   :  { %3477 = vmatpush3.bf16.msra.mxu1 %v3767_v54 }
 0x103   :  { %2791 = vmatmul.mubr.bf16.vlgmr.msra.gmra.mrb[28].mxu0 %v2872_v57 }
 0x104   :  { %2831 = vmatmul.mubr.bf16.vlgmr.msra.gmra.mrb[28].mxu1 %v2874_v59 }
 0x116   :  { %v3192_v61 = vpop.f32.mrb[4].mxu0 }
 0x117   :  { %v3214_v62 = vpop.f32.mrb[4].mxu1  ;;  %v3193_v63 = vpop.f32.mrb[5].mxu0 }
 0x118   :  { %v3215_v0 = vpop.f32.mrb[5].mxu1  ;;  %v3194_v1 = vadd.f32 %v3193_v63, %v3192_v61  ;;  %v3195_v3 = vpop.f32.mrb[6].mxu0 }
 0x119   :  { %v3216_v2 = vadd.f32 %v3215_v0, %v3214_v62  ;;  %v3217_v4 = vpop.f32.mrb[6].mxu1  ;;  %v3196_v5 = vpop.f32.mrb[7].mxu0 }
 0x11a   :  { %v3218_v6 = vpop.f32.mrb[7].mxu1  ;;  %v2313_v7 = vadd.f32 %v3194_v1, %v2273_v46 }
 0x11c   :  { %v2353_v8 = vadd.f32 %v3216_v2, %v2313_v7 }
 0x136   :  { %v3236_v9 = vpop.f32.mrb[8].mxu0 }
 0x137   :  { %v3258_v10 = vpop.f32.mrb[8].mxu1  ;;  %v3237_v11 = vpop.f32.mrb[9].mxu0 }
 0x138   :  { %v3238_v12 = vadd.f32 %v3237_v11, %v3236_v9  ;;  %v3259_v13 = vpop.f32.mrb[9].mxu1  ;;  %v3239_v14 = vpop.f32.mrb[10].mxu0 }
 0x139   :  { %v3260_v15 = vadd.f32 %v3259_v13, %v3258_v10  ;;  %v3261_v16 = vpop.f32.mrb[10].mxu1  ;;  %v3240_v17 = vpop.f32.mrb[11].mxu0 }
 0x13a   :  { %v2393_v18 = vadd.f32 %v3238_v12, %v2353_v8  ;;  %v3262_v19 = vpop.f32.mrb[11].mxu1 }
 0x13c   :  { %v2433_v20 = vadd.f32 %v3260_v15, %v2393_v18 }
 0x156   :  { %v3280_v21 = vpop.f32.mrb[12].mxu0 }
 0x157   :  { %v3302_v22 = vpop.f32.mrb[12].mxu1  ;;  %v3281_v23 = vpop.f32.mrb[13].mxu0 }
 0x158   :  { %v3282_v24 = vadd.f32 %v3281_v23, %v3280_v21  ;;  %v3303_v25 = vpop.f32.mrb[13].mxu1  ;;  %v3283_v26 = vpop.f32.mrb[14].mxu0 }
 0x159   :  { %v3304_v27 = vadd.f32 %v3303_v25, %v3302_v22  ;;  %v3305_v28 = vpop.f32.mrb[14].mxu1  ;;  %v3284_v29 = vpop.f32.mrb[15].mxu0 }
 0x15a   :  { %v2473_v30 = vadd.f32 %v3282_v24, %v2433_v20  ;;  %v3306_v31 = vpop.f32.mrb[15].mxu1 }
 0x15c   :  { %v2513_v32 = vadd.f32 %v3304_v27, %v2473_v30 }
 0x176   :  { %v3324_v33 = vpop.f32.mrb[16].mxu0 }
 0x177   :  { %v3346_v34 = vpop.f32.mrb[16].mxu1  ;;  %v3325_v35 = vpop.f32.mrb[17].mxu0 }
 0x178   :  { %v3347_v36 = vpop.f32.mrb[17].mxu1  ;;  %v3326_v37 = vadd.f32 %v3325_v35, %v3324_v33  ;;  %v3327_v39 = vpop.f32.mrb[18].mxu0 }
 0x179   :  { %v3348_v38 = vadd.f32 %v3347_v36, %v3346_v34  ;;  %v3349_v40 = vpop.f32.mrb[18].mxu1  ;;  %v3328_v41 = vpop.f32.mrb[19].mxu0 }
 0x17a   :  { %v3350_v42 = vpop.f32.mrb[19].mxu1  ;;  %v2553_v43 = vadd.f32 %v3326_v37, %v2513_v32 }
 0x17c   :  { %v2593_v44 = vadd.f32 %v3348_v38, %v2553_v43 }
 0x196   :  { %v3368_v45 = vpop.f32.mrb[20].mxu0 }
 0x197   :  { %v3390_v46 = vpop.f32.mrb[20].mxu1  ;;  %v3369_v47 = vpop.f32.mrb[21].mxu0 }
 0x198   :  { %v3370_v48 = vadd.f32 %v3369_v47, %v3368_v45  ;;  %v3391_v49 = vpop.f32.mrb[21].mxu1  ;;  %v3371_v50 = vpop.f32.mrb[22].mxu0 }
 0x199   :  { %v3392_v51 = vadd.f32 %v3391_v49, %v3390_v46  ;;  %v3393_v52 = vpop.f32.mrb[22].mxu1  ;;  %v3372_v53 = vpop.f32.mrb[23].mxu0 }
 0x19a   :  { %v2633_v54 = vadd.f32 %v3370_v48, %v2593_v44  ;;  %v3394_v55 = vpop.f32.mrb[23].mxu1 }
 0x19c   :  { %v2673_v56 = vadd.f32 %v3392_v51, %v2633_v54 }
 0x1b6   :  { %v3412_v57 = vpop.f32.mrb[24].mxu0 }
 0x1b7   :  { %v3434_v58 = vpop.f32.mrb[24].mxu1  ;;  %v3413_v59 = vpop.f32.mrb[25].mxu0 }
 0x1b8   :  { %v3414_v60 = vadd.f32 %v3413_v59, %v3412_v57  ;;  %v3435_v61 = vpop.f32.mrb[25].mxu1  ;;  %v3415_v62 = vpop.f32.mrb[26].mxu0 }
 0x1b9   :  { %v3436_v63 = vadd.f32 %v3435_v61, %v3434_v58  ;;  %v3437_v0 = vpop.f32.mrb[26].mxu1  ;;  %v3416_v1 = vpop.f32.mrb[27].mxu0 }
 0x1ba   :  { %v2713_v2 = vadd.f32 %v3414_v60, %v2673_v56  ;;  %v3438_v3 = vpop.f32.mrb[27].mxu1 }
 0x1bc   :  { %v2753_v4 = vadd.f32 %v3436_v63, %v2713_v2 }
 0x1d6   :  { %v3456_v5 = vpop.f32.mrb[28].mxu0 }
 0x1d7   :  { %v3478_v6 = vpop.f32.mrb[28].mxu1  ;;  %v3457_v7 = vpop.f32.mrb[29].mxu0 }
 0x1d8   :  { %v3458_v8 = vadd.f32 %v3457_v7, %v3456_v5  ;;  %v3479_v9 = vpop.f32.mrb[29].mxu1  ;;  %v3459_v10 = vpop.f32.mrb[30].mxu0 }
 0x1d9   :  { %v3480_v11 = vadd.f32 %v3479_v9, %v3478_v6  ;;  %v3481_v12 = vpop.f32.mrb[30].mxu1  ;;  %v3460_v13 = vpop.f32.mrb[31].mxu0 }
 0x1da   :  { %v2793_v14 = vadd.f32 %v3458_v8, %v2753_v4  ;;  %v3482_v15 = vpop.f32.mrb[31].mxu1 }
 0x1dc   :  { %v2833_v16 = vadd.f32 %v3480_v11, %v2793_v14 }
 0x1de   :  { %2838 = vst [vmem:[%s4617_s3] sm:$0xff] %v2833_v16 }

</bundles_post_ra>
